<compile_context>
chip_gen: v7x
topology: tpu7x:2x2x1
jax: 0.10.0
libtpu: 0.0.40
codegen_flags: <defaults>
</compile_context>

<pallas_src>
import jax
import jax.numpy as jnp
from jax.experimental import pallas as pl
from jax.experimental.pallas import tpu as pltpu  # noqa: F401  (TPU backend)

# ----------------------------- configuration -------------------------------
B = 2                 # batch
C_IN = 4              # env_state channels
H_IN = W_IN = 16      # env_state spatial
N_REGULAR_BLOCK = 1
HEAD_CHANNEL = 8
HEAD_KERNEL = 3
HEAD_POOL = 2
VOCAB = 12            # state_dim['objective']
SEQ_LEN = 6
WORD_EMB = 16
TEXT_LSTM = 32
N_HIDDEN = 32         # n_hidden_lstm_dyn
N_LSTM_LAYER = 1      # lstm_dyn_n_layer
N_ACTIONS = 5

H_HEAD = H_IN - HEAD_KERNEL + 1          # 14
W_HEAD = W_IN - HEAD_KERNEL + 1          # 14
H_POOL = H_HEAD // HEAD_POOL             # 7
W_POOL = W_HEAD // HEAD_POOL             # 7
VIZ_FLAT = HEAD_CHANNEL * H_POOL * W_POOL      # 392
LSTM_IN = TEXT_LSTM + VIZ_FLAT                 # 424 ('concatenate' fusion)


# ----------------------- weight preprocessing (init-time) -------------------
def _conv_to_blockmat(w_torch, wo):
    """torch conv weight (Cout,Cin,kh,kw) -> (kh*kw*wo*Cin, wo*Cout) matrix M
    such that  [concat of 9 shifted (H, wo*Cin) windows] @ M  == conv output
    in (H, wo*Cout) layout (channels fastest)."""
    cout, cin, kh, kw = w_torch.shape
    eye = jnp.eye(wo, dtype=jnp.float32)
    t = jnp.einsum('ocij,wv->ijwcvo', w_torch, eye)    # (kh,kw,wo,Cin,wo,Cout)
    return t.reshape(kh * kw * wo * cin, wo * cout)


def _head_to_poolmats(w_torch, wo, pool):
    """Head-conv weights with the W-axis max-pool folded in: two matrices that
    produce only the even / odd output columns, laid out as (co*W_POOL + wp)."""
    assert pool == 2, "even/odd folding assumes pool kernel 2"
    cout, cin, kh, kw = w_torch.shape
    wp = wo // pool
    w_idx = jnp.arange(wo)[:, None]

    def mk(offset):
        sel = (w_idx == pool * jnp.arange(wp)[None, :] + offset)
        t = jnp.einsum('ocij,wp->ijwcop', w_torch, sel.astype(jnp.float32))
        return t.reshape(kh * kw * wo * cin, cout * wp)   # cols: co*wp_cnt + wp

    return mk(0), mk(1)


def init_params(key):
    def nrm(k, shape, scale=0.1):
        return (scale * jax.random.normal(k, shape)).astype(jnp.float32)

    ks = iter(jax.random.split(key, 64))

    # ---- raw, torch-like parameters -----------------------------------
    rb = []
    for _ in range(N_REGULAR_BLOCK):
        rb.append(dict(w1=nrm(next(ks), (C_IN, C_IN, 3, 3)),   # (Cout,Cin,kh,kw)
                       b1=nrm(next(ks), (C_IN,)),
                       w2=nrm(next(ks), (C_IN, C_IN, 3, 3)),
                       b2=nrm(next(ks), (C_IN,))))
    head_w = nrm(next(ks), (HEAD_CHANNEL, C_IN, HEAD_KERNEL, HEAD_KERNEL))
    head_b = nrm(next(ks), (HEAD_CHANNEL,))
    emb = nrm(next(ks), (VOCAB, WORD_EMB), scale=0.5)
    # text LSTM (gate order i,f,g,o, already transposed vs. torch (4T,E)/(4T,T))
    txt_w_ih = nrm(next(ks), (4, WORD_EMB, TEXT_LSTM))
    txt_w_hh = nrm(next(ks), (4, TEXT_LSTM, TEXT_LSTM))
    txt_b = nrm(next(ks), (4, TEXT_LSTM))                  # bias_ih + bias_hh
    cells = []
    for _ in range(N_LSTM_LAYER):
        cells.append(dict(w_ih=nrm(next(ks), (4, LSTM_IN, N_HIDDEN)),
                          w_hh=nrm(next(ks), (4, N_HIDDEN, N_HIDDEN)),
                          b=nrm(next(ks), (4, N_HIDDEN))))
    fc_w = nrm(next(ks), (N_ACTIONS, N_HIDDEN))            # torch (out, in)
    fc_b = nrm(next(ks), (N_ACTIONS,))

    # ---- fold into kernel layouts (done ONCE, not per forward) --------
    params = dict(
        rbw1=jnp.stack([_conv_to_blockmat(r['w1'], W_IN) for r in rb]),
        rbb1=jnp.stack([jnp.tile(r['b1'], W_IN).reshape(1, -1) for r in rb]),
        rbw2=jnp.stack([_conv_to_blockmat(r['w2'], W_IN) for r in rb]),
        rbb2=jnp.stack([jnp.tile(r['b2'], W_IN).reshape(1, -1) for r in rb]),
    )
    mhe, mho = _head_to_poolmats(head_w, W_HEAD, HEAD_POOL)
    params['mhe'], params['mho'] = mhe, mho                       # (504, 56)
    params['bh'] = jnp.repeat(head_b, W_POOL).reshape(1, -1)      # (1, 56)

    # text LSTM: fold embedding into the input weight, fuse the 4 gates.
    wx = emb @ jnp.concatenate([txt_w_ih[k] for k in range(4)], axis=1)  # (12,128)
    wh = jnp.concatenate([txt_w_hh[k] for k in range(4)], axis=1)        # (32,128)
    params['txt_w'] = jnp.concatenate([wx, wh], axis=0)                  # (44,128)
    params['txt_b'] = jnp.concatenate([txt_b[k] for k in range(4)]).reshape(1, -1)

    # dynamic LSTMCell(s): [W_ih ; W_hh] with 4 gates fused -> (456, 128).
    cw, cb = [], []
    for cell in cells:
        wxc = jnp.concatenate([cell['w_ih'][k] for k in range(4)], axis=1)
        whc = jnp.concatenate([cell['w_hh'][k] for k in range(4)], axis=1)
        cw.append(jnp.concatenate([wxc, whc], axis=0))
        cb.append(jnp.concatenate([cell['b'][k] for k in range(4)]).reshape(1, -1))
    params['cell_w'] = jnp.stack(cw)           # (n_layer, 456, 128)
    params['cell_b'] = jnp.stack(cb)           # (n_layer, 1, 128)

    params['fc_w'] = fc_w.T                    # pre-transposed: (N_HIDDEN, N_ACTIONS)
    params['fc_b'] = fc_b.reshape(1, -1)
    return params


# ------------------------------ fused kernel --------------------------------
def _drqn_kernel(x_ref, oh_ref,
                 rbw1_ref, rbb1_ref, rbw2_ref, rbb2_ref,
                 mhe_ref, mho_ref, bh_ref,
                 txtw_ref, txtb_ref,
                 cellw_ref, cellb_ref,
                 fcw_ref, fcb_ref,
                 q_ref):
    f32 = jnp.float32

    def sigmoid(z):
        # exp on the EUP, approx reciprocal (vrcp) instead of an f32 divide.
        return pl.reciprocal(1.0 + jnp.exp(-z), approx=True)

    def pad_hw(a, c):
        # zero-pad a (H, W*c) slab by 1 in H and W  -> (H+2, (W+2)*c)
        h, wc = a.shape
        zr = jnp.zeros((1, wc), f32)
        a = jnp.concatenate([zr, a, zr], axis=0)
        zc = jnp.zeros((h + 2, c), f32)
        return jnp.concatenate([zc, a, zc], axis=1)

    def conv_cols(a, k, cin, ho, wo):
        # concatenate the k*k shifted windows along lanes -> (ho, k*k*wo*cin)
        wins = [a[di:di + ho, dj * cin: dj * cin + wo * cin]
                for di in range(k) for dj in range(k)]
        return jnp.concatenate(wins, axis=1)

    def mm(a, b):
        return jnp.dot(a, b, preferred_element_type=f32)

    # ----------------- vision path: per-batch 2-D (H, W*C) slabs ----------
    # TODO(synk): ResidualBlock source not provided; assumed
    # conv3x3 -> ReLU -> conv3x3 -> +residual -> ReLU (dropout = identity, eval).
    vis_rows = []
    for b in range(B):
        act = x_ref[b]                                         # (16, 64)
        for blk in range(N_REGULAR_BLOCK):
            xp = pad_hw(act, C_IN)                             # (18, 72)
            cols = conv_cols(xp, 3, C_IN, H_IN, W_IN)          # (16, 576)
            h1 = jnp.maximum(mm(cols, rbw1_ref[blk]) + rbb1_ref[blk], 0.0)
            h1p = pad_hw(h1, C_IN)
            cols2 = conv_cols(h1p, 3, C_IN, H_IN, W_IN)
            act = jnp.maximum(mm(cols2, rbw2_ref[blk]) + rbb2_ref[blk] + act, 0.0)

        # head conv (no pad) + bias with the W-axis 2x2 pool folded into the
        # even/odd weight matrices; then pool the H axis with 7 row-pair maxes.
        colsh = conv_cols(act, HEAD_KERNEL, C_IN, H_HEAD, W_HEAD)   # (14, 504)
        conv_e = mm(colsh, mhe_ref[...]) + bh_ref[...]              # (14, 56)
        conv_o = mm(colsh, mho_ref[...]) + bh_ref[...]              # (14, 56)
        wmax = jnp.maximum(conv_e, conv_o)                          # W-pooled
        prows = [jnp.maximum(wmax[2 * i:2 * i + 1, :],
                             wmax[2 * i + 1:2 * i + 2, :])
                 for i in range(H_POOL)]
        vis_rows.append(jnp.concatenate(prows, axis=1))             # (1, 392)
    vis = jnp.concatenate(vis_rows, axis=0)                         # (B, 392)

    # ----------------- text LSTM: one fused 128-lane matmul per step ------
    T = TEXT_LSTM
    h = jnp.zeros((B, T), f32)
    c = jnp.zeros((B, T), f32)
    txt_w = txtw_ref[...]
    txt_b = txtb_ref[...]
    for t in range(SEQ_LEN):                       # fully unrolled (L = 6)
        oh_t = oh_ref[:, t * VOCAB:(t + 1) * VOCAB]               # (B, 12)
        gates = mm(jnp.concatenate([oh_t, h], axis=1), txt_w) + txt_b   # (B,128)
        i_g = sigmoid(gates[:, 0:T])
        f_g = sigmoid(gates[:, T:2 * T])
        g_g = jnp.tanh(gates[:, 2 * T:3 * T])
        o_g = sigmoid(gates[:, 3 * T:4 * T])
        c = f_g * c + i_g * g_g
        h = o_g * jnp.tanh(c)
    text_h = h                                                    # (B, 32)

    # ----------- concatenate fusion + dynamic LSTMCell(s) + final FC ------
    Hd = N_HIDDEN
    xin = jnp.concatenate([vis, text_h], axis=1)                  # (B, 424)
    hd = jnp.ones((B, Hd), f32)                                   # h0 = c0 = 1
    cd = jnp.ones((B, Hd), f32)
    for l in range(N_LSTM_LAYER):
        gates = mm(jnp.concatenate([xin, hd], axis=1), cellw_ref[l]) + cellb_ref[l]
        i_g = sigmoid(gates[:, 0:Hd])
        f_g = sigmoid(gates[:, Hd:2 * Hd])
        g_g = jnp.tanh(gates[:, 2 * Hd:3 * Hd])
        o_g = sigmoid(gates[:, 3 * Hd:4 * Hd])
        cd = f_g * cd + i_g * g_g
        hd = o_g * jnp.tanh(cd)

    q_ref[...] = mm(hd, fcw_ref[...]) + fcb_ref[...]              # (B, 5)


# ------------------------------ forward wrapper ------------------------------
@jax.jit
def drqn_forward(params, env_state_nchw, tokens):
    """Mirrors DRQNText.forward for one timestep; q_values = final_fc(h)."""
    # Minimal XLA glue: NCHW -> (B, H, W*C) slab layout; tokens -> tiny one-hot
    # (the embedding matrix itself is folded into the text-LSTM weights).
    x = jnp.transpose(env_state_nchw, (0, 2, 3, 1)).reshape(B, H_IN, W_IN * C_IN)
    onehot = jax.nn.one_hot(tokens, VOCAB, dtype=jnp.float32).reshape(B, SEQ_LEN * VOCAB)

    return pl.pallas_call(
        _drqn_kernel,
        out_shape=jax.ShapeDtypeStruct((B, N_ACTIONS), jnp.float32),
        # No grid / BlockSpecs: single invocation, every operand is a whole
        # array resident in VMEM (total footprint < 1 MiB on every TPU gen).
    )(x, onehot,
      params['rbw1'], params['rbb1'], params['rbw2'], params['rbb2'],
      params['mhe'], params['mho'], params['bh'],
      params['txt_w'], params['txt_b'],
      params['cell_w'], params['cell_b'],
      params['fc_w'], params['fc_b'])


# ----------------------------------- main -----------------------------------
if __name__ == "__main__":
    key = jax.random.PRNGKey(0)
    k_params, k_state, k_tok = jax.random.split(key, 3)

    params = init_params(k_params)
    env_state = jax.random.normal(k_state, (B, C_IN, H_IN, W_IN),
                                  dtype=jnp.float32)              # NCHW like torch
    tokens = jax.random.randint(k_tok, (B, SEQ_LEN), 0, VOCAB, dtype=jnp.int32)

    q = drqn_forward(params, env_state, tokens)
    q = jax.block_until_ready(q)

    assert q.shape == (B, N_ACTIONS) and q.dtype == jnp.float32
    assert bool(jnp.all(jnp.isfinite(q)))
    print("KERNEL_OK")
</pallas_src>

<mosaic_0001>
module attributes {stable_mosaic.version = 11 : i64} {
  func.func @_drqn_kernel(%arg0: memref<2x16x64xf32, #tpu.memory_space<vmem>>, %arg1: memref<2x72xf32, #tpu.memory_space<vmem>>, %arg2: memref<1x576x64xf32, #tpu.memory_space<vmem>>, %arg3: memref<1x1x64xf32, #tpu.memory_space<vmem>>, %arg4: memref<1x576x64xf32, #tpu.memory_space<vmem>>, %arg5: memref<1x1x64xf32, #tpu.memory_space<vmem>>, %arg6: memref<504x56xf32, #tpu.memory_space<vmem>>, %arg7: memref<504x56xf32, #tpu.memory_space<vmem>>, %arg8: memref<1x56xf32, #tpu.memory_space<vmem>>, %arg9: memref<44x128xf32, #tpu.memory_space<vmem>>, %arg10: memref<1x128xf32, #tpu.memory_space<vmem>>, %arg11: memref<1x456x128xf32, #tpu.memory_space<vmem>>, %arg12: memref<1x1x128xf32, #tpu.memory_space<vmem>>, %arg13: memref<32x5xf32, #tpu.memory_space<vmem>>, %arg14: memref<1x5xf32, #tpu.memory_space<vmem>>, %arg15: memref<2x5xf32, #tpu.memory_space<vmem>>) attributes {dimension_semantics = [], scalar_prefetch = 0 : i64, scratch_operands = 0 : i64, tpu.core_type = #tpu.core_type<tc>} {
    %c0 = arith.constant 0 : index
    %c0_0 = arith.constant 0 : index
    %c0_1 = arith.constant 0 : index
    %0 = vector.load %arg0[%c0, %c0_0, %c0_1] : memref<2x16x64xf32, #tpu.memory_space<vmem>>, vector<1x16x64xf32>
    %1 = vector.shape_cast %0 : vector<1x16x64xf32> to vector<16x64xf32>
    %cst = arith.constant 0.000000e+00 : f32
    %2 = vector.broadcast %cst : f32 to vector<1x64xf32>
    %3 = tpu.concatenate %2, %1, %2 in 0 : vector<1x64xf32>, vector<16x64xf32>, vector<1x64xf32> -> vector<18x64xf32>
    %cst_2 = arith.constant 0.000000e+00 : f32
    %4 = vector.broadcast %cst_2 : f32 to vector<18x4xf32>
    %5 = tpu.concatenate %4, %3, %4 in 1 : vector<18x4xf32>, vector<18x64xf32>, vector<18x4xf32> -> vector<18x72xf32>
    %6 = vector.extract_strided_slice %5 {offsets = [0, 0], sizes = [16, 64], strides = [1, 1]} : vector<18x72xf32> to vector<16x64xf32>
    %7 = vector.extract_strided_slice %5 {offsets = [0, 4], sizes = [16, 64], strides = [1, 1]} : vector<18x72xf32> to vector<16x64xf32>
    %8 = vector.extract_strided_slice %5 {offsets = [0, 8], sizes = [16, 64], strides = [1, 1]} : vector<18x72xf32> to vector<16x64xf32>
    %9 = vector.extract_strided_slice %5 {offsets = [1, 0], sizes = [16, 64], strides = [1, 1]} : vector<18x72xf32> to vector<16x64xf32>
    %10 = vector.extract_strided_slice %5 {offsets = [1, 4], sizes = [16, 64], strides = [1, 1]} : vector<18x72xf32> to vector<16x64xf32>
    %11 = vector.extract_strided_slice %5 {offsets = [1, 8], sizes = [16, 64], strides = [1, 1]} : vector<18x72xf32> to vector<16x64xf32>
    %12 = vector.extract_strided_slice %5 {offsets = [2, 0], sizes = [16, 64], strides = [1, 1]} : vector<18x72xf32> to vector<16x64xf32>
    %13 = vector.extract_strided_slice %5 {offsets = [2, 4], sizes = [16, 64], strides = [1, 1]} : vector<18x72xf32> to vector<16x64xf32>
    %14 = vector.extract_strided_slice %5 {offsets = [2, 8], sizes = [16, 64], strides = [1, 1]} : vector<18x72xf32> to vector<16x64xf32>
    %15 = tpu.concatenate %6, %7, %8, %9, %10, %11, %12, %13, %14 in 1 : vector<16x64xf32>, vector<16x64xf32>, vector<16x64xf32>, vector<16x64xf32>, vector<16x64xf32>, vector<16x64xf32>, vector<16x64xf32>, vector<16x64xf32>, vector<16x64xf32> -> vector<16x576xf32>
    %c0_3 = arith.constant 0 : index
    %c0_4 = arith.constant 0 : index
    %c0_5 = arith.constant 0 : index
    %16 = vector.load %arg2[%c0_3, %c0_4, %c0_5] : memref<1x576x64xf32, #tpu.memory_space<vmem>>, vector<1x576x64xf32>
    %17 = vector.shape_cast %16 : vector<1x576x64xf32> to vector<576x64xf32>
    %cst_6 = arith.constant dense<0.000000e+00> : vector<16x64xf32>
    %18 = tpu.matmul %15, %17, %cst_6 {dimension_numbers = #tpu.dot_dimension_numbers<[1], [0], [0], [1], [0, 0, 1, 1], [], []>} : vector<16x576xf32>, vector<576x64xf32>, vector<16x64xf32> -> vector<16x64xf32>
    %c0_7 = arith.constant 0 : index
    %c0_8 = arith.constant 0 : index
    %c0_9 = arith.constant 0 : index
    %19 = vector.load %arg3[%c0_7, %c0_8, %c0_9] : memref<1x1x64xf32, #tpu.memory_space<vmem>>, vector<1x1x64xf32>
    %20 = vector.shape_cast %19 : vector<1x1x64xf32> to vector<1x64xf32>
    %21 = vector.broadcast %20 : vector<1x64xf32> to vector<16x64xf32>
    %22 = arith.addf %18, %21 : vector<16x64xf32>
    %cst_10 = arith.constant 0.000000e+00 : f32
    %23 = vector.broadcast %cst_10 : f32 to vector<16x64xf32>
    %24 = arith.maximumf %22, %23 : vector<16x64xf32>
    %cst_11 = arith.constant 0.000000e+00 : f32
    %25 = vector.broadcast %cst_11 : f32 to vector<1x64xf32>
    %26 = tpu.concatenate %25, %24, %25 in 0 : vector<1x64xf32>, vector<16x64xf32>, vector<1x64xf32> -> vector<18x64xf32>
    %cst_12 = arith.constant 0.000000e+00 : f32
    %27 = vector.broadcast %cst_12 : f32 to vector<18x4xf32>
    %28 = tpu.concatenate %27, %26, %27 in 1 : vector<18x4xf32>, vector<18x64xf32>, vector<18x4xf32> -> vector<18x72xf32>
    %29 = vector.extract_strided_slice %28 {offsets = [0, 0], sizes = [16, 64], strides = [1, 1]} : vector<18x72xf32> to vector<16x64xf32>
    %30 = vector.extract_strided_slice %28 {offsets = [0, 4], sizes = [16, 64], strides = [1, 1]} : vector<18x72xf32> to vector<16x64xf32>
    %31 = vector.extract_strided_slice %28 {offsets = [0, 8], sizes = [16, 64], strides = [1, 1]} : vector<18x72xf32> to vector<16x64xf32>
    %32 = vector.extract_strided_slice %28 {offsets = [1, 0], sizes = [16, 64], strides = [1, 1]} : vector<18x72xf32> to vector<16x64xf32>
    %33 = vector.extract_strided_slice %28 {offsets = [1, 4], sizes = [16, 64], strides = [1, 1]} : vector<18x72xf32> to vector<16x64xf32>
    %34 = vector.extract_strided_slice %28 {offsets = [1, 8], sizes = [16, 64], strides = [1, 1]} : vector<18x72xf32> to vector<16x64xf32>
    %35 = vector.extract_strided_slice %28 {offsets = [2, 0], sizes = [16, 64], strides = [1, 1]} : vector<18x72xf32> to vector<16x64xf32>
    %36 = vector.extract_strided_slice %28 {offsets = [2, 4], sizes = [16, 64], strides = [1, 1]} : vector<18x72xf32> to vector<16x64xf32>
    %37 = vector.extract_strided_slice %28 {offsets = [2, 8], sizes = [16, 64], strides = [1, 1]} : vector<18x72xf32> to vector<16x64xf32>
    %38 = tpu.concatenate %29, %30, %31, %32, %33, %34, %35, %36, %37 in 1 : vector<16x64xf32>, vector<16x64xf32>, vector<16x64xf32>, vector<16x64xf32>, vector<16x64xf32>, vector<16x64xf32>, vector<16x64xf32>, vector<16x64xf32>, vector<16x64xf32> -> vector<16x576xf32>
    %c0_13 = arith.constant 0 : index
    %c0_14 = arith.constant 0 : index
    %c0_15 = arith.constant 0 : index
    %39 = vector.load %arg4[%c0_13, %c0_14, %c0_15] : memref<1x576x64xf32, #tpu.memory_space<vmem>>, vector<1x576x64xf32>
    %40 = vector.shape_cast %39 : vector<1x576x64xf32> to vector<576x64xf32>
    %cst_16 = arith.constant dense<0.000000e+00> : vector<16x64xf32>
    %41 = tpu.matmul %38, %40, %cst_16 {dimension_numbers = #tpu.dot_dimension_numbers<[1], [0], [0], [1], [0, 0, 1, 1], [], []>} : vector<16x576xf32>, vector<576x64xf32>, vector<16x64xf32> -> vector<16x64xf32>
    %c0_17 = arith.constant 0 : index
    %c0_18 = arith.constant 0 : index
    %c0_19 = arith.constant 0 : index
    %42 = vector.load %arg5[%c0_17, %c0_18, %c0_19] : memref<1x1x64xf32, #tpu.memory_space<vmem>>, vector<1x1x64xf32>
    %43 = vector.shape_cast %42 : vector<1x1x64xf32> to vector<1x64xf32>
    %44 = vector.broadcast %43 : vector<1x64xf32> to vector<16x64xf32>
    %45 = arith.addf %41, %44 : vector<16x64xf32>
    %46 = arith.addf %45, %1 : vector<16x64xf32>
    %cst_20 = arith.constant 0.000000e+00 : f32
    %47 = vector.broadcast %cst_20 : f32 to vector<16x64xf32>
    %48 = arith.maximumf %46, %47 : vector<16x64xf32>
    %49 = vector.extract_strided_slice %48 {offsets = [0, 0], sizes = [14, 56], strides = [1, 1]} : vector<16x64xf32> to vector<14x56xf32>
    %50 = vector.extract_strided_slice %48 {offsets = [0, 4], sizes = [14, 56], strides = [1, 1]} : vector<16x64xf32> to vector<14x56xf32>
    %51 = vector.extract_strided_slice %48 {offsets = [0, 8], sizes = [14, 56], strides = [1, 1]} : vector<16x64xf32> to vector<14x56xf32>
    %52 = vector.extract_strided_slice %48 {offsets = [1, 0], sizes = [14, 56], strides = [1, 1]} : vector<16x64xf32> to vector<14x56xf32>
    %53 = vector.extract_strided_slice %48 {offsets = [1, 4], sizes = [14, 56], strides = [1, 1]} : vector<16x64xf32> to vector<14x56xf32>
    %54 = vector.extract_strided_slice %48 {offsets = [1, 8], sizes = [14, 56], strides = [1, 1]} : vector<16x64xf32> to vector<14x56xf32>
    %55 = vector.extract_strided_slice %48 {offsets = [2, 0], sizes = [14, 56], strides = [1, 1]} : vector<16x64xf32> to vector<14x56xf32>
    %56 = vector.extract_strided_slice %48 {offsets = [2, 4], sizes = [14, 56], strides = [1, 1]} : vector<16x64xf32> to vector<14x56xf32>
    %57 = vector.extract_strided_slice %48 {offsets = [2, 8], sizes = [14, 56], strides = [1, 1]} : vector<16x64xf32> to vector<14x56xf32>
    %58 = tpu.concatenate %49, %50, %51, %52, %53, %54, %55, %56, %57 in 1 : vector<14x56xf32>, vector<14x56xf32>, vector<14x56xf32>, vector<14x56xf32>, vector<14x56xf32>, vector<14x56xf32>, vector<14x56xf32>, vector<14x56xf32>, vector<14x56xf32> -> vector<14x504xf32>
    %c0_21 = arith.constant 0 : index
    %c0_22 = arith.constant 0 : index
    %59 = vector.load %arg6[%c0_21, %c0_22] : memref<504x56xf32, #tpu.memory_space<vmem>>, vector<504x56xf32>
    %cst_23 = arith.constant dense<0.000000e+00> : vector<14x56xf32>
    %60 = tpu.matmul %58, %59, %cst_23 {dimension_numbers = #tpu.dot_dimension_numbers<[1], [0], [0], [1], [0, 0, 1, 1], [], []>} : vector<14x504xf32>, vector<504x56xf32>, vector<14x56xf32> -> vector<14x56xf32>
    %c0_24 = arith.constant 0 : index
    %c0_25 = arith.constant 0 : index
    %61 = vector.load %arg8[%c0_24, %c0_25] : memref<1x56xf32, #tpu.memory_space<vmem>>, vector<1x56xf32>
    %62 = vector.broadcast %61 : vector<1x56xf32> to vector<14x56xf32>
    %63 = arith.addf %60, %62 : vector<14x56xf32>
    %c0_26 = arith.constant 0 : index
    %c0_27 = arith.constant 0 : index
    %64 = vector.load %arg7[%c0_26, %c0_27] : memref<504x56xf32, #tpu.memory_space<vmem>>, vector<504x56xf32>
    %cst_28 = arith.constant dense<0.000000e+00> : vector<14x56xf32>
    %65 = tpu.matmul %58, %64, %cst_28 {dimension_numbers = #tpu.dot_dimension_numbers<[1], [0], [0], [1], [0, 0, 1, 1], [], []>} : vector<14x504xf32>, vector<504x56xf32>, vector<14x56xf32> -> vector<14x56xf32>
    %c0_29 = arith.constant 0 : index
    %c0_30 = arith.constant 0 : index
    %66 = vector.load %arg8[%c0_29, %c0_30] : memref<1x56xf32, #tpu.memory_space<vmem>>, vector<1x56xf32>
    %67 = vector.broadcast %66 : vector<1x56xf32> to vector<14x56xf32>
    %68 = arith.addf %65, %67 : vector<14x56xf32>
    %69 = arith.maximumf %63, %68 : vector<14x56xf32>
    %70 = vector.extract_strided_slice %69 {offsets = [0, 0], sizes = [1, 56], strides = [1, 1]} : vector<14x56xf32> to vector<1x56xf32>
    %71 = vector.extract_strided_slice %69 {offsets = [1, 0], sizes = [1, 56], strides = [1, 1]} : vector<14x56xf32> to vector<1x56xf32>
    %72 = arith.maximumf %70, %71 : vector<1x56xf32>
    %73 = vector.extract_strided_slice %69 {offsets = [2, 0], sizes = [1, 56], strides = [1, 1]} : vector<14x56xf32> to vector<1x56xf32>
    %74 = vector.extract_strided_slice %69 {offsets = [3, 0], sizes = [1, 56], strides = [1, 1]} : vector<14x56xf32> to vector<1x56xf32>
    %75 = arith.maximumf %73, %74 : vector<1x56xf32>
    %76 = vector.extract_strided_slice %69 {offsets = [4, 0], sizes = [1, 56], strides = [1, 1]} : vector<14x56xf32> to vector<1x56xf32>
    %77 = vector.extract_strided_slice %69 {offsets = [5, 0], sizes = [1, 56], strides = [1, 1]} : vector<14x56xf32> to vector<1x56xf32>
    %78 = arith.maximumf %76, %77 : vector<1x56xf32>
    %79 = vector.extract_strided_slice %69 {offsets = [6, 0], sizes = [1, 56], strides = [1, 1]} : vector<14x56xf32> to vector<1x56xf32>
    %80 = vector.extract_strided_slice %69 {offsets = [7, 0], sizes = [1, 56], strides = [1, 1]} : vector<14x56xf32> to vector<1x56xf32>
    %81 = arith.maximumf %79, %80 : vector<1x56xf32>
    %82 = vector.extract_strided_slice %69 {offsets = [8, 0], sizes = [1, 56], strides = [1, 1]} : vector<14x56xf32> to vector<1x56xf32>
    %83 = vector.extract_strided_slice %69 {offsets = [9, 0], sizes = [1, 56], strides = [1, 1]} : vector<14x56xf32> to vector<1x56xf32>
    %84 = arith.maximumf %82, %83 : vector<1x56xf32>
    %85 = vector.extract_strided_slice %69 {offsets = [10, 0], sizes = [1, 56], strides = [1, 1]} : vector<14x56xf32> to vector<1x56xf32>
    %86 = vector.extract_strided_slice %69 {offsets = [11, 0], sizes = [1, 56], strides = [1, 1]} : vector<14x56xf32> to vector<1x56xf32>
    %87 = arith.maximumf %85, %86 : vector<1x56xf32>
    %88 = vector.extract_strided_slice %69 {offsets = [12, 0], sizes = [1, 56], strides = [1, 1]} : vector<14x56xf32> to vector<1x56xf32>
    %89 = vector.extract_strided_slice %69 {offsets = [13, 0], sizes = [1, 56], strides = [1, 1]} : vector<14x56xf32> to vector<1x56xf32>
    %90 = arith.maximumf %88, %89 : vector<1x56xf32>
    %91 = tpu.concatenate %72, %75, %78, %81, %84, %87, %90 in 1 : vector<1x56xf32>, vector<1x56xf32>, vector<1x56xf32>, vector<1x56xf32>, vector<1x56xf32>, vector<1x56xf32>, vector<1x56xf32> -> vector<1x392xf32>
    %c1 = arith.constant 1 : index
    %c0_31 = arith.constant 0 : index
    %c0_32 = arith.constant 0 : index
    %92 = vector.load %arg0[%c1, %c0_31, %c0_32] : memref<2x16x64xf32, #tpu.memory_space<vmem>>, vector<1x16x64xf32>
    %93 = vector.shape_cast %92 : vector<1x16x64xf32> to vector<16x64xf32>
    %cst_33 = arith.constant 0.000000e+00 : f32
    %94 = vector.broadcast %cst_33 : f32 to vector<1x64xf32>
    %95 = tpu.concatenate %94, %93, %94 in 0 : vector<1x64xf32>, vector<16x64xf32>, vector<1x64xf32> -> vector<18x64xf32>
    %cst_34 = arith.constant 0.000000e+00 : f32
    %96 = vector.broadcast %cst_34 : f32 to vector<18x4xf32>
    %97 = tpu.concatenate %96, %95, %96 in 1 : vector<18x4xf32>, vector<18x64xf32>, vector<18x4xf32> -> vector<18x72xf32>
    %98 = vector.extract_strided_slice %97 {offsets = [0, 0], sizes = [16, 64], strides = [1, 1]} : vector<18x72xf32> to vector<16x64xf32>
    %99 = vector.extract_strided_slice %97 {offsets = [0, 4], sizes = [16, 64], strides = [1, 1]} : vector<18x72xf32> to vector<16x64xf32>
    %100 = vector.extract_strided_slice %97 {offsets = [0, 8], sizes = [16, 64], strides = [1, 1]} : vector<18x72xf32> to vector<16x64xf32>
    %101 = vector.extract_strided_slice %97 {offsets = [1, 0], sizes = [16, 64], strides = [1, 1]} : vector<18x72xf32> to vector<16x64xf32>
    %102 = vector.extract_strided_slice %97 {offsets = [1, 4], sizes = [16, 64], strides = [1, 1]} : vector<18x72xf32> to vector<16x64xf32>
    %103 = vector.extract_strided_slice %97 {offsets = [1, 8], sizes = [16, 64], strides = [1, 1]} : vector<18x72xf32> to vector<16x64xf32>
    %104 = vector.extract_strided_slice %97 {offsets = [2, 0], sizes = [16, 64], strides = [1, 1]} : vector<18x72xf32> to vector<16x64xf32>
    %105 = vector.extract_strided_slice %97 {offsets = [2, 4], sizes = [16, 64], strides = [1, 1]} : vector<18x72xf32> to vector<16x64xf32>
    %106 = vector.extract_strided_slice %97 {offsets = [2, 8], sizes = [16, 64], strides = [1, 1]} : vector<18x72xf32> to vector<16x64xf32>
    %107 = tpu.concatenate %98, %99, %100, %101, %102, %103, %104, %105, %106 in 1 : vector<16x64xf32>, vector<16x64xf32>, vector<16x64xf32>, vector<16x64xf32>, vector<16x64xf32>, vector<16x64xf32>, vector<16x64xf32>, vector<16x64xf32>, vector<16x64xf32> -> vector<16x576xf32>
    %c0_35 = arith.constant 0 : index
    %c0_36 = arith.constant 0 : index
    %c0_37 = arith.constant 0 : index
    %108 = vector.load %arg2[%c0_35, %c0_36, %c0_37] : memref<1x576x64xf32, #tpu.memory_space<vmem>>, vector<1x576x64xf32>
    %109 = vector.shape_cast %108 : vector<1x576x64xf32> to vector<576x64xf32>
    %cst_38 = arith.constant dense<0.000000e+00> : vector<16x64xf32>
    %110 = tpu.matmul %107, %109, %cst_38 {dimension_numbers = #tpu.dot_dimension_numbers<[1], [0], [0], [1], [0, 0, 1, 1], [], []>} : vector<16x576xf32>, vector<576x64xf32>, vector<16x64xf32> -> vector<16x64xf32>
    %c0_39 = arith.constant 0 : index
    %c0_40 = arith.constant 0 : index
    %c0_41 = arith.constant 0 : index
    %111 = vector.load %arg3[%c0_39, %c0_40, %c0_41] : memref<1x1x64xf32, #tpu.memory_space<vmem>>, vector<1x1x64xf32>
    %112 = vector.shape_cast %111 : vector<1x1x64xf32> to vector<1x64xf32>
    %113 = vector.broadcast %112 : vector<1x64xf32> to vector<16x64xf32>
    %114 = arith.addf %110, %113 : vector<16x64xf32>
    %cst_42 = arith.constant 0.000000e+00 : f32
    %115 = vector.broadcast %cst_42 : f32 to vector<16x64xf32>
    %116 = arith.maximumf %114, %115 : vector<16x64xf32>
    %cst_43 = arith.constant 0.000000e+00 : f32
    %117 = vector.broadcast %cst_43 : f32 to vector<1x64xf32>
    %118 = tpu.concatenate %117, %116, %117 in 0 : vector<1x64xf32>, vector<16x64xf32>, vector<1x64xf32> -> vector<18x64xf32>
    %cst_44 = arith.constant 0.000000e+00 : f32
    %119 = vector.broadcast %cst_44 : f32 to vector<18x4xf32>
    %120 = tpu.concatenate %119, %118, %119 in 1 : vector<18x4xf32>, vector<18x64xf32>, vector<18x4xf32> -> vector<18x72xf32>
    %121 = vector.extract_strided_slice %120 {offsets = [0, 0], sizes = [16, 64], strides = [1, 1]} : vector<18x72xf32> to vector<16x64xf32>
    %122 = vector.extract_strided_slice %120 {offsets = [0, 4], sizes = [16, 64], strides = [1, 1]} : vector<18x72xf32> to vector<16x64xf32>
    %123 = vector.extract_strided_slice %120 {offsets = [0, 8], sizes = [16, 64], strides = [1, 1]} : vector<18x72xf32> to vector<16x64xf32>
    %124 = vector.extract_strided_slice %120 {offsets = [1, 0], sizes = [16, 64], strides = [1, 1]} : vector<18x72xf32> to vector<16x64xf32>
    %125 = vector.extract_strided_slice %120 {offsets = [1, 4], sizes = [16, 64], strides = [1, 1]} : vector<18x72xf32> to vector<16x64xf32>
    %126 = vector.extract_strided_slice %120 {offsets = [1, 8], sizes = [16, 64], strides = [1, 1]} : vector<18x72xf32> to vector<16x64xf32>
    %127 = vector.extract_strided_slice %120 {offsets = [2, 0], sizes = [16, 64], strides = [1, 1]} : vector<18x72xf32> to vector<16x64xf32>
    %128 = vector.extract_strided_slice %120 {offsets = [2, 4], sizes = [16, 64], strides = [1, 1]} : vector<18x72xf32> to vector<16x64xf32>
    %129 = vector.extract_strided_slice %120 {offsets = [2, 8], sizes = [16, 64], strides = [1, 1]} : vector<18x72xf32> to vector<16x64xf32>
    %130 = tpu.concatenate %121, %122, %123, %124, %125, %126, %127, %128, %129 in 1 : vector<16x64xf32>, vector<16x64xf32>, vector<16x64xf32>, vector<16x64xf32>, vector<16x64xf32>, vector<16x64xf32>, vector<16x64xf32>, vector<16x64xf32>, vector<16x64xf32> -> vector<16x576xf32>
    %c0_45 = arith.constant 0 : index
    %c0_46 = arith.constant 0 : index
    %c0_47 = arith.constant 0 : index
    %131 = vector.load %arg4[%c0_45, %c0_46, %c0_47] : memref<1x576x64xf32, #tpu.memory_space<vmem>>, vector<1x576x64xf32>
    %132 = vector.shape_cast %131 : vector<1x576x64xf32> to vector<576x64xf32>
    %cst_48 = arith.constant dense<0.000000e+00> : vector<16x64xf32>
    %133 = tpu.matmul %130, %132, %cst_48 {dimension_numbers = #tpu.dot_dimension_numbers<[1], [0], [0], [1], [0, 0, 1, 1], [], []>} : vector<16x576xf32>, vector<576x64xf32>, vector<16x64xf32> -> vector<16x64xf32>
    %c0_49 = arith.constant 0 : index
    %c0_50 = arith.constant 0 : index
    %c0_51 = arith.constant 0 : index
    %134 = vector.load %arg5[%c0_49, %c0_50, %c0_51] : memref<1x1x64xf32, #tpu.memory_space<vmem>>, vector<1x1x64xf32>
    %135 = vector.shape_cast %134 : vector<1x1x64xf32> to vector<1x64xf32>
    %136 = vector.broadcast %135 : vector<1x64xf32> to vector<16x64xf32>
    %137 = arith.addf %133, %136 : vector<16x64xf32>
    %138 = arith.addf %137, %93 : vector<16x64xf32>
    %cst_52 = arith.constant 0.000000e+00 : f32
    %139 = vector.broadcast %cst_52 : f32 to vector<16x64xf32>
    %140 = arith.maximumf %138, %139 : vector<16x64xf32>
    %141 = vector.extract_strided_slice %140 {offsets = [0, 0], sizes = [14, 56], strides = [1, 1]} : vector<16x64xf32> to vector<14x56xf32>
    %142 = vector.extract_strided_slice %140 {offsets = [0, 4], sizes = [14, 56], strides = [1, 1]} : vector<16x64xf32> to vector<14x56xf32>
    %143 = vector.extract_strided_slice %140 {offsets = [0, 8], sizes = [14, 56], strides = [1, 1]} : vector<16x64xf32> to vector<14x56xf32>
    %144 = vector.extract_strided_slice %140 {offsets = [1, 0], sizes = [14, 56], strides = [1, 1]} : vector<16x64xf32> to vector<14x56xf32>
    %145 = vector.extract_strided_slice %140 {offsets = [1, 4], sizes = [14, 56], strides = [1, 1]} : vector<16x64xf32> to vector<14x56xf32>
    %146 = vector.extract_strided_slice %140 {offsets = [1, 8], sizes = [14, 56], strides = [1, 1]} : vector<16x64xf32> to vector<14x56xf32>
    %147 = vector.extract_strided_slice %140 {offsets = [2, 0], sizes = [14, 56], strides = [1, 1]} : vector<16x64xf32> to vector<14x56xf32>
    %148 = vector.extract_strided_slice %140 {offsets = [2, 4], sizes = [14, 56], strides = [1, 1]} : vector<16x64xf32> to vector<14x56xf32>
    %149 = vector.extract_strided_slice %140 {offsets = [2, 8], sizes = [14, 56], strides = [1, 1]} : vector<16x64xf32> to vector<14x56xf32>
    %150 = tpu.concatenate %141, %142, %143, %144, %145, %146, %147, %148, %149 in 1 : vector<14x56xf32>, vector<14x56xf32>, vector<14x56xf32>, vector<14x56xf32>, vector<14x56xf32>, vector<14x56xf32>, vector<14x56xf32>, vector<14x56xf32>, vector<14x56xf32> -> vector<14x504xf32>
    %c0_53 = arith.constant 0 : index
    %c0_54 = arith.constant 0 : index
    %151 = vector.load %arg6[%c0_53, %c0_54] : memref<504x56xf32, #tpu.memory_space<vmem>>, vector<504x56xf32>
    %cst_55 = arith.constant dense<0.000000e+00> : vector<14x56xf32>
    %152 = tpu.matmul %150, %151, %cst_55 {dimension_numbers = #tpu.dot_dimension_numbers<[1], [0], [0], [1], [0, 0, 1, 1], [], []>} : vector<14x504xf32>, vector<504x56xf32>, vector<14x56xf32> -> vector<14x56xf32>
    %c0_56 = arith.constant 0 : index
    %c0_57 = arith.constant 0 : index
    %153 = vector.load %arg8[%c0_56, %c0_57] : memref<1x56xf32, #tpu.memory_space<vmem>>, vector<1x56xf32>
    %154 = vector.broadcast %153 : vector<1x56xf32> to vector<14x56xf32>
    %155 = arith.addf %152, %154 : vector<14x56xf32>
    %c0_58 = arith.constant 0 : index
    %c0_59 = arith.constant 0 : index
    %156 = vector.load %arg7[%c0_58, %c0_59] : memref<504x56xf32, #tpu.memory_space<vmem>>, vector<504x56xf32>
    %cst_60 = arith.constant dense<0.000000e+00> : vector<14x56xf32>
    %157 = tpu.matmul %150, %156, %cst_60 {dimension_numbers = #tpu.dot_dimension_numbers<[1], [0], [0], [1], [0, 0, 1, 1], [], []>} : vector<14x504xf32>, vector<504x56xf32>, vector<14x56xf32> -> vector<14x56xf32>
    %c0_61 = arith.constant 0 : index
    %c0_62 = arith.constant 0 : index
    %158 = vector.load %arg8[%c0_61, %c0_62] : memref<1x56xf32, #tpu.memory_space<vmem>>, vector<1x56xf32>
    %159 = vector.broadcast %158 : vector<1x56xf32> to vector<14x56xf32>
    %160 = arith.addf %157, %159 : vector<14x56xf32>
    %161 = arith.maximumf %155, %160 : vector<14x56xf32>
    %162 = vector.extract_strided_slice %161 {offsets = [0, 0], sizes = [1, 56], strides = [1, 1]} : vector<14x56xf32> to vector<1x56xf32>
    %163 = vector.extract_strided_slice %161 {offsets = [1, 0], sizes = [1, 56], strides = [1, 1]} : vector<14x56xf32> to vector<1x56xf32>
    %164 = arith.maximumf %162, %163 : vector<1x56xf32>
    %165 = vector.extract_strided_slice %161 {offsets = [2, 0], sizes = [1, 56], strides = [1, 1]} : vector<14x56xf32> to vector<1x56xf32>
    %166 = vector.extract_strided_slice %161 {offsets = [3, 0], sizes = [1, 56], strides = [1, 1]} : vector<14x56xf32> to vector<1x56xf32>
    %167 = arith.maximumf %165, %166 : vector<1x56xf32>
    %168 = vector.extract_strided_slice %161 {offsets = [4, 0], sizes = [1, 56], strides = [1, 1]} : vector<14x56xf32> to vector<1x56xf32>
    %169 = vector.extract_strided_slice %161 {offsets = [5, 0], sizes = [1, 56], strides = [1, 1]} : vector<14x56xf32> to vector<1x56xf32>
    %170 = arith.maximumf %168, %169 : vector<1x56xf32>
    %171 = vector.extract_strided_slice %161 {offsets = [6, 0], sizes = [1, 56], strides = [1, 1]} : vector<14x56xf32> to vector<1x56xf32>
    %172 = vector.extract_strided_slice %161 {offsets = [7, 0], sizes = [1, 56], strides = [1, 1]} : vector<14x56xf32> to vector<1x56xf32>
    %173 = arith.maximumf %171, %172 : vector<1x56xf32>
    %174 = vector.extract_strided_slice %161 {offsets = [8, 0], sizes = [1, 56], strides = [1, 1]} : vector<14x56xf32> to vector<1x56xf32>
    %175 = vector.extract_strided_slice %161 {offsets = [9, 0], sizes = [1, 56], strides = [1, 1]} : vector<14x56xf32> to vector<1x56xf32>
    %176 = arith.maximumf %174, %175 : vector<1x56xf32>
    %177 = vector.extract_strided_slice %161 {offsets = [10, 0], sizes = [1, 56], strides = [1, 1]} : vector<14x56xf32> to vector<1x56xf32>
    %178 = vector.extract_strided_slice %161 {offsets = [11, 0], sizes = [1, 56], strides = [1, 1]} : vector<14x56xf32> to vector<1x56xf32>
    %179 = arith.maximumf %177, %178 : vector<1x56xf32>
    %180 = vector.extract_strided_slice %161 {offsets = [12, 0], sizes = [1, 56], strides = [1, 1]} : vector<14x56xf32> to vector<1x56xf32>
    %181 = vector.extract_strided_slice %161 {offsets = [13, 0], sizes = [1, 56], strides = [1, 1]} : vector<14x56xf32> to vector<1x56xf32>
    %182 = arith.maximumf %180, %181 : vector<1x56xf32>
    %183 = tpu.concatenate %164, %167, %170, %173, %176, %179, %182 in 1 : vector<1x56xf32>, vector<1x56xf32>, vector<1x56xf32>, vector<1x56xf32>, vector<1x56xf32>, vector<1x56xf32>, vector<1x56xf32> -> vector<1x392xf32>
    %184 = tpu.concatenate %91, %183 in 0 : vector<1x392xf32>, vector<1x392xf32> -> vector<2x392xf32>
    %cst_63 = arith.constant 0.000000e+00 : f32
    %185 = vector.broadcast %cst_63 : f32 to vector<2x32xf32>
    %cst_64 = arith.constant 0.000000e+00 : f32
    %186 = vector.broadcast %cst_64 : f32 to vector<2x32xf32>
    %c0_65 = arith.constant 0 : index
    %c0_66 = arith.constant 0 : index
    %187 = vector.load %arg9[%c0_65, %c0_66] : memref<44x128xf32, #tpu.memory_space<vmem>>, vector<44x128xf32>
    %c0_67 = arith.constant 0 : index
    %c0_68 = arith.constant 0 : index
    %188 = vector.load %arg10[%c0_67, %c0_68] : memref<1x128xf32, #tpu.memory_space<vmem>>, vector<1x128xf32>
    %c0_69 = arith.constant 0 : index
    %c0_70 = arith.constant 0 : index
    %189 = vector.load %arg1[%c0_69, %c0_70] : memref<2x72xf32, #tpu.memory_space<vmem>>, vector<2x12xf32>
    %190 = tpu.concatenate %189, %185 in 1 : vector<2x12xf32>, vector<2x32xf32> -> vector<2x44xf32>
    %cst_71 = arith.constant dense<0.000000e+00> : vector<2x128xf32>
    %191 = tpu.matmul %190, %187, %cst_71 {dimension_numbers = #tpu.dot_dimension_numbers<[1], [0], [0], [1], [0, 0, 1, 1], [], []>} : vector<2x44xf32>, vector<44x128xf32>, vector<2x128xf32> -> vector<2x128xf32>
    %192 = vector.broadcast %188 : vector<1x128xf32> to vector<2x128xf32>
    %193 = arith.addf %191, %192 : vector<2x128xf32>
    %194 = vector.extract_strided_slice %193 {offsets = [0, 0], sizes = [2, 32], strides = [1, 1]} : vector<2x128xf32> to vector<2x32xf32>
    %cst_72 = arith.constant 0.000000e+00 : f32
    %195 = vector.broadcast %cst_72 : f32 to vector<2x32xf32>
    %196 = arith.subf %195, %194 : vector<2x32xf32>
    %197 = math.exp %196 : vector<2x32xf32>
    %cst_73 = arith.constant 1.000000e+00 : f32
    %198 = vector.broadcast %cst_73 : f32 to vector<2x32xf32>
    %199 = arith.addf %198, %197 : vector<2x32xf32>
    %200 = tpu.reciprocal %199 {approx = true} : vector<2x32xf32> -> vector<2x32xf32>
    %201 = vector.extract_strided_slice %193 {offsets = [0, 32], sizes = [2, 32], strides = [1, 1]} : vector<2x128xf32> to vector<2x32xf32>
    %cst_74 = arith.constant 0.000000e+00 : f32
    %202 = vector.broadcast %cst_74 : f32 to vector<2x32xf32>
    %203 = arith.subf %202, %201 : vector<2x32xf32>
    %204 = math.exp %203 : vector<2x32xf32>
    %cst_75 = arith.constant 1.000000e+00 : f32
    %205 = vector.broadcast %cst_75 : f32 to vector<2x32xf32>
    %206 = arith.addf %205, %204 : vector<2x32xf32>
    %207 = tpu.reciprocal %206 {approx = true} : vector<2x32xf32> -> vector<2x32xf32>
    %208 = vector.extract_strided_slice %193 {offsets = [0, 64], sizes = [2, 32], strides = [1, 1]} : vector<2x128xf32> to vector<2x32xf32>
    %209 = math.tanh %208 : vector<2x32xf32>
    %210 = vector.extract_strided_slice %193 {offsets = [0, 96], sizes = [2, 32], strides = [1, 1]} : vector<2x128xf32> to vector<2x32xf32>
    %cst_76 = arith.constant 0.000000e+00 : f32
    %211 = vector.broadcast %cst_76 : f32 to vector<2x32xf32>
    %212 = arith.subf %211, %210 : vector<2x32xf32>
    %213 = math.exp %212 : vector<2x32xf32>
    %cst_77 = arith.constant 1.000000e+00 : f32
    %214 = vector.broadcast %cst_77 : f32 to vector<2x32xf32>
    %215 = arith.addf %214, %213 : vector<2x32xf32>
    %216 = tpu.reciprocal %215 {approx = true} : vector<2x32xf32> -> vector<2x32xf32>
    %217 = arith.mulf %207, %186 : vector<2x32xf32>
    %218 = arith.mulf %200, %209 : vector<2x32xf32>
    %219 = arith.addf %217, %218 : vector<2x32xf32>
    %220 = math.tanh %219 : vector<2x32xf32>
    %221 = arith.mulf %216, %220 : vector<2x32xf32>
    %c0_78 = arith.constant 0 : index
    %c12 = arith.constant 12 : index
    %222 = vector.load %arg1[%c0_78, %c12] : memref<2x72xf32, #tpu.memory_space<vmem>>, vector<2x12xf32>
    %223 = tpu.concatenate %222, %221 in 1 : vector<2x12xf32>, vector<2x32xf32> -> vector<2x44xf32>
    %cst_79 = arith.constant dense<0.000000e+00> : vector<2x128xf32>
    %224 = tpu.matmul %223, %187, %cst_79 {dimension_numbers = #tpu.dot_dimension_numbers<[1], [0], [0], [1], [0, 0, 1, 1], [], []>} : vector<2x44xf32>, vector<44x128xf32>, vector<2x128xf32> -> vector<2x128xf32>
    %225 = vector.broadcast %188 : vector<1x128xf32> to vector<2x128xf32>
    %226 = arith.addf %224, %225 : vector<2x128xf32>
    %227 = vector.extract_strided_slice %226 {offsets = [0, 0], sizes = [2, 32], strides = [1, 1]} : vector<2x128xf32> to vector<2x32xf32>
    %cst_80 = arith.constant 0.000000e+00 : f32
    %228 = vector.broadcast %cst_80 : f32 to vector<2x32xf32>
    %229 = arith.subf %228, %227 : vector<2x32xf32>
    %230 = math.exp %229 : vector<2x32xf32>
    %cst_81 = arith.constant 1.000000e+00 : f32
    %231 = vector.broadcast %cst_81 : f32 to vector<2x32xf32>
    %232 = arith.addf %231, %230 : vector<2x32xf32>
    %233 = tpu.reciprocal %232 {approx = true} : vector<2x32xf32> -> vector<2x32xf32>
    %234 = vector.extract_strided_slice %226 {offsets = [0, 32], sizes = [2, 32], strides = [1, 1]} : vector<2x128xf32> to vector<2x32xf32>
    %cst_82 = arith.constant 0.000000e+00 : f32
    %235 = vector.broadcast %cst_82 : f32 to vector<2x32xf32>
    %236 = arith.subf %235, %234 : vector<2x32xf32>
    %237 = math.exp %236 : vector<2x32xf32>
    %cst_83 = arith.constant 1.000000e+00 : f32
    %238 = vector.broadcast %cst_83 : f32 to vector<2x32xf32>
    %239 = arith.addf %238, %237 : vector<2x32xf32>
    %240 = tpu.reciprocal %239 {approx = true} : vector<2x32xf32> -> vector<2x32xf32>
    %241 = vector.extract_strided_slice %226 {offsets = [0, 64], sizes = [2, 32], strides = [1, 1]} : vector<2x128xf32> to vector<2x32xf32>
    %242 = math.tanh %241 : vector<2x32xf32>
    %243 = vector.extract_strided_slice %226 {offsets = [0, 96], sizes = [2, 32], strides = [1, 1]} : vector<2x128xf32> to vector<2x32xf32>
    %cst_84 = arith.constant 0.000000e+00 : f32
    %244 = vector.broadcast %cst_84 : f32 to vector<2x32xf32>
    %245 = arith.subf %244, %243 : vector<2x32xf32>
    %246 = math.exp %245 : vector<2x32xf32>
    %cst_85 = arith.constant 1.000000e+00 : f32
    %247 = vector.broadcast %cst_85 : f32 to vector<2x32xf32>
    %248 = arith.addf %247, %246 : vector<2x32xf32>
    %249 = tpu.reciprocal %248 {approx = true} : vector<2x32xf32> -> vector<2x32xf32>
    %250 = arith.mulf %240, %219 : vector<2x32xf32>
    %251 = arith.mulf %233, %242 : vector<2x32xf32>
    %252 = arith.addf %250, %251 : vector<2x32xf32>
    %253 = math.tanh %252 : vector<2x32xf32>
    %254 = arith.mulf %249, %253 : vector<2x32xf32>
    %c0_86 = arith.constant 0 : index
    %c24 = arith.constant 24 : index
    %255 = vector.load %arg1[%c0_86, %c24] : memref<2x72xf32, #tpu.memory_space<vmem>>, vector<2x12xf32>
    %256 = tpu.concatenate %255, %254 in 1 : vector<2x12xf32>, vector<2x32xf32> -> vector<2x44xf32>
    %cst_87 = arith.constant dense<0.000000e+00> : vector<2x128xf32>
    %257 = tpu.matmul %256, %187, %cst_87 {dimension_numbers = #tpu.dot_dimension_numbers<[1], [0], [0], [1], [0, 0, 1, 1], [], []>} : vector<2x44xf32>, vector<44x128xf32>, vector<2x128xf32> -> vector<2x128xf32>
    %258 = vector.broadcast %188 : vector<1x128xf32> to vector<2x128xf32>
    %259 = arith.addf %257, %258 : vector<2x128xf32>
    %260 = vector.extract_strided_slice %259 {offsets = [0, 0], sizes = [2, 32], strides = [1, 1]} : vector<2x128xf32> to vector<2x32xf32>
    %cst_88 = arith.constant 0.000000e+00 : f32
    %261 = vector.broadcast %cst_88 : f32 to vector<2x32xf32>
    %262 = arith.subf %261, %260 : vector<2x32xf32>
    %263 = math.exp %262 : vector<2x32xf32>
    %cst_89 = arith.constant 1.000000e+00 : f32
    %264 = vector.broadcast %cst_89 : f32 to vector<2x32xf32>
    %265 = arith.addf %264, %263 : vector<2x32xf32>
    %266 = tpu.reciprocal %265 {approx = true} : vector<2x32xf32> -> vector<2x32xf32>
    %267 = vector.extract_strided_slice %259 {offsets = [0, 32], sizes = [2, 32], strides = [1, 1]} : vector<2x128xf32> to vector<2x32xf32>
    %cst_90 = arith.constant 0.000000e+00 : f32
    %268 = vector.broadcast %cst_90 : f32 to vector<2x32xf32>
    %269 = arith.subf %268, %267 : vector<2x32xf32>
    %270 = math.exp %269 : vector<2x32xf32>
    %cst_91 = arith.constant 1.000000e+00 : f32
    %271 = vector.broadcast %cst_91 : f32 to vector<2x32xf32>
    %272 = arith.addf %271, %270 : vector<2x32xf32>
    %273 = tpu.reciprocal %272 {approx = true} : vector<2x32xf32> -> vector<2x32xf32>
    %274 = vector.extract_strided_slice %259 {offsets = [0, 64], sizes = [2, 32], strides = [1, 1]} : vector<2x128xf32> to vector<2x32xf32>
    %275 = math.tanh %274 : vector<2x32xf32>
    %276 = vector.extract_strided_slice %259 {offsets = [0, 96], sizes = [2, 32], strides = [1, 1]} : vector<2x128xf32> to vector<2x32xf32>
    %cst_92 = arith.constant 0.000000e+00 : f32
    %277 = vector.broadcast %cst_92 : f32 to vector<2x32xf32>
    %278 = arith.subf %277, %276 : vector<2x32xf32>
    %279 = math.exp %278 : vector<2x32xf32>
    %cst_93 = arith.constant 1.000000e+00 : f32
    %280 = vector.broadcast %cst_93 : f32 to vector<2x32xf32>
    %281 = arith.addf %280, %279 : vector<2x32xf32>
    %282 = tpu.reciprocal %281 {approx = true} : vector<2x32xf32> -> vector<2x32xf32>
    %283 = arith.mulf %273, %252 : vector<2x32xf32>
    %284 = arith.mulf %266, %275 : vector<2x32xf32>
    %285 = arith.addf %283, %284 : vector<2x32xf32>
    %286 = math.tanh %285 : vector<2x32xf32>
    %287 = arith.mulf %282, %286 : vector<2x32xf32>
    %c0_94 = arith.constant 0 : index
    %c36 = arith.constant 36 : index
    %288 = vector.load %arg1[%c0_94, %c36] : memref<2x72xf32, #tpu.memory_space<vmem>>, vector<2x12xf32>
    %289 = tpu.concatenate %288, %287 in 1 : vector<2x12xf32>, vector<2x32xf32> -> vector<2x44xf32>
    %cst_95 = arith.constant dense<0.000000e+00> : vector<2x128xf32>
    %290 = tpu.matmul %289, %187, %cst_95 {dimension_numbers = #tpu.dot_dimension_numbers<[1], [0], [0], [1], [0, 0, 1, 1], [], []>} : vector<2x44xf32>, vector<44x128xf32>, vector<2x128xf32> -> vector<2x128xf32>
    %291 = vector.broadcast %188 : vector<1x128xf32> to vector<2x128xf32>
    %292 = arith.addf %290, %291 : vector<2x128xf32>
    %293 = vector.extract_strided_slice %292 {offsets = [0, 0], sizes = [2, 32], strides = [1, 1]} : vector<2x128xf32> to vector<2x32xf32>
    %cst_96 = arith.constant 0.000000e+00 : f32
    %294 = vector.broadcast %cst_96 : f32 to vector<2x32xf32>
    %295 = arith.subf %294, %293 : vector<2x32xf32>
    %296 = math.exp %295 : vector<2x32xf32>
    %cst_97 = arith.constant 1.000000e+00 : f32
    %297 = vector.broadcast %cst_97 : f32 to vector<2x32xf32>
    %298 = arith.addf %297, %296 : vector<2x32xf32>
    %299 = tpu.reciprocal %298 {approx = true} : vector<2x32xf32> -> vector<2x32xf32>
    %300 = vector.extract_strided_slice %292 {offsets = [0, 32], sizes = [2, 32], strides = [1, 1]} : vector<2x128xf32> to vector<2x32xf32>
    %cst_98 = arith.constant 0.000000e+00 : f32
    %301 = vector.broadcast %cst_98 : f32 to vector<2x32xf32>
    %302 = arith.subf %301, %300 : vector<2x32xf32>
    %303 = math.exp %302 : vector<2x32xf32>
    %cst_99 = arith.constant 1.000000e+00 : f32
    %304 = vector.broadcast %cst_99 : f32 to vector<2x32xf32>
    %305 = arith.addf %304, %303 : vector<2x32xf32>
    %306 = tpu.reciprocal %305 {approx = true} : vector<2x32xf32> -> vector<2x32xf32>
    %307 = vector.extract_strided_slice %292 {offsets = [0, 64], sizes = [2, 32], strides = [1, 1]} : vector<2x128xf32> to vector<2x32xf32>
    %308 = math.tanh %307 : vector<2x32xf32>
    %309 = vector.extract_strided_slice %292 {offsets = [0, 96], sizes = [2, 32], strides = [1, 1]} : vector<2x128xf32> to vector<2x32xf32>
    %cst_100 = arith.constant 0.000000e+00 : f32
    %310 = vector.broadcast %cst_100 : f32 to vector<2x32xf32>
    %311 = arith.subf %310, %309 : vector<2x32xf32>
    %312 = math.exp %311 : vector<2x32xf32>
    %cst_101 = arith.constant 1.000000e+00 : f32
    %313 = vector.broadcast %cst_101 : f32 to vector<2x32xf32>
    %314 = arith.addf %313, %312 : vector<2x32xf32>
    %315 = tpu.reciprocal %314 {approx = true} : vector<2x32xf32> -> vector<2x32xf32>
    %316 = arith.mulf %306, %285 : vector<2x32xf32>
    %317 = arith.mulf %299, %308 : vector<2x32xf32>
    %318 = arith.addf %316, %317 : vector<2x32xf32>
    %319 = math.tanh %318 : vector<2x32xf32>
    %320 = arith.mulf %315, %319 : vector<2x32xf32>
    %c0_102 = arith.constant 0 : index
    %c48 = arith.constant 48 : index
    %321 = vector.load %arg1[%c0_102, %c48] : memref<2x72xf32, #tpu.memory_space<vmem>>, vector<2x12xf32>
    %322 = tpu.concatenate %321, %320 in 1 : vector<2x12xf32>, vector<2x32xf32> -> vector<2x44xf32>
    %cst_103 = arith.constant dense<0.000000e+00> : vector<2x128xf32>
    %323 = tpu.matmul %322, %187, %cst_103 {dimension_numbers = #tpu.dot_dimension_numbers<[1], [0], [0], [1], [0, 0, 1, 1], [], []>} : vector<2x44xf32>, vector<44x128xf32>, vector<2x128xf32> -> vector<2x128xf32>
    %324 = vector.broadcast %188 : vector<1x128xf32> to vector<2x128xf32>
    %325 = arith.addf %323, %324 : vector<2x128xf32>
    %326 = vector.extract_strided_slice %325 {offsets = [0, 0], sizes = [2, 32], strides = [1, 1]} : vector<2x128xf32> to vector<2x32xf32>
    %cst_104 = arith.constant 0.000000e+00 : f32
    %327 = vector.broadcast %cst_104 : f32 to vector<2x32xf32>
    %328 = arith.subf %327, %326 : vector<2x32xf32>
    %329 = math.exp %328 : vector<2x32xf32>
    %cst_105 = arith.constant 1.000000e+00 : f32
    %330 = vector.broadcast %cst_105 : f32 to vector<2x32xf32>
    %331 = arith.addf %330, %329 : vector<2x32xf32>
    %332 = tpu.reciprocal %331 {approx = true} : vector<2x32xf32> -> vector<2x32xf32>
    %333 = vector.extract_strided_slice %325 {offsets = [0, 32], sizes = [2, 32], strides = [1, 1]} : vector<2x128xf32> to vector<2x32xf32>
    %cst_106 = arith.constant 0.000000e+00 : f32
    %334 = vector.broadcast %cst_106 : f32 to vector<2x32xf32>
    %335 = arith.subf %334, %333 : vector<2x32xf32>
    %336 = math.exp %335 : vector<2x32xf32>
    %cst_107 = arith.constant 1.000000e+00 : f32
    %337 = vector.broadcast %cst_107 : f32 to vector<2x32xf32>
    %338 = arith.addf %337, %336 : vector<2x32xf32>
    %339 = tpu.reciprocal %338 {approx = true} : vector<2x32xf32> -> vector<2x32xf32>
    %340 = vector.extract_strided_slice %325 {offsets = [0, 64], sizes = [2, 32], strides = [1, 1]} : vector<2x128xf32> to vector<2x32xf32>
    %341 = math.tanh %340 : vector<2x32xf32>
    %342 = vector.extract_strided_slice %325 {offsets = [0, 96], sizes = [2, 32], strides = [1, 1]} : vector<2x128xf32> to vector<2x32xf32>
    %cst_108 = arith.constant 0.000000e+00 : f32
    %343 = vector.broadcast %cst_108 : f32 to vector<2x32xf32>
    %344 = arith.subf %343, %342 : vector<2x32xf32>
    %345 = math.exp %344 : vector<2x32xf32>
    %cst_109 = arith.constant 1.000000e+00 : f32
    %346 = vector.broadcast %cst_109 : f32 to vector<2x32xf32>
    %347 = arith.addf %346, %345 : vector<2x32xf32>
    %348 = tpu.reciprocal %347 {approx = true} : vector<2x32xf32> -> vector<2x32xf32>
    %349 = arith.mulf %339, %318 : vector<2x32xf32>
    %350 = arith.mulf %332, %341 : vector<2x32xf32>
    %351 = arith.addf %349, %350 : vector<2x32xf32>
    %352 = math.tanh %351 : vector<2x32xf32>
    %353 = arith.mulf %348, %352 : vector<2x32xf32>
    %c0_110 = arith.constant 0 : index
    %c60 = arith.constant 60 : index
    %354 = vector.load %arg1[%c0_110, %c60] : memref<2x72xf32, #tpu.memory_space<vmem>>, vector<2x12xf32>
    %355 = tpu.concatenate %354, %353 in 1 : vector<2x12xf32>, vector<2x32xf32> -> vector<2x44xf32>
    %cst_111 = arith.constant dense<0.000000e+00> : vector<2x128xf32>
    %356 = tpu.matmul %355, %187, %cst_111 {dimension_numbers = #tpu.dot_dimension_numbers<[1], [0], [0], [1], [0, 0, 1, 1], [], []>} : vector<2x44xf32>, vector<44x128xf32>, vector<2x128xf32> -> vector<2x128xf32>
    %357 = vector.broadcast %188 : vector<1x128xf32> to vector<2x128xf32>
    %358 = arith.addf %356, %357 : vector<2x128xf32>
    %359 = vector.extract_strided_slice %358 {offsets = [0, 0], sizes = [2, 32], strides = [1, 1]} : vector<2x128xf32> to vector<2x32xf32>
    %cst_112 = arith.constant 0.000000e+00 : f32
    %360 = vector.broadcast %cst_112 : f32 to vector<2x32xf32>
    %361 = arith.subf %360, %359 : vector<2x32xf32>
    %362 = math.exp %361 : vector<2x32xf32>
    %cst_113 = arith.constant 1.000000e+00 : f32
    %363 = vector.broadcast %cst_113 : f32 to vector<2x32xf32>
    %364 = arith.addf %363, %362 : vector<2x32xf32>
    %365 = tpu.reciprocal %364 {approx = true} : vector<2x32xf32> -> vector<2x32xf32>
    %366 = vector.extract_strided_slice %358 {offsets = [0, 32], sizes = [2, 32], strides = [1, 1]} : vector<2x128xf32> to vector<2x32xf32>
    %cst_114 = arith.constant 0.000000e+00 : f32
    %367 = vector.broadcast %cst_114 : f32 to vector<2x32xf32>
    %368 = arith.subf %367, %366 : vector<2x32xf32>
    %369 = math.exp %368 : vector<2x32xf32>
    %cst_115 = arith.constant 1.000000e+00 : f32
    %370 = vector.broadcast %cst_115 : f32 to vector<2x32xf32>
    %371 = arith.addf %370, %369 : vector<2x32xf32>
    %372 = tpu.reciprocal %371 {approx = true} : vector<2x32xf32> -> vector<2x32xf32>
    %373 = vector.extract_strided_slice %358 {offsets = [0, 64], sizes = [2, 32], strides = [1, 1]} : vector<2x128xf32> to vector<2x32xf32>
    %374 = math.tanh %373 : vector<2x32xf32>
    %375 = vector.extract_strided_slice %358 {offsets = [0, 96], sizes = [2, 32], strides = [1, 1]} : vector<2x128xf32> to vector<2x32xf32>
    %cst_116 = arith.constant 0.000000e+00 : f32
    %376 = vector.broadcast %cst_116 : f32 to vector<2x32xf32>
    %377 = arith.subf %376, %375 : vector<2x32xf32>
    %378 = math.exp %377 : vector<2x32xf32>
    %cst_117 = arith.constant 1.000000e+00 : f32
    %379 = vector.broadcast %cst_117 : f32 to vector<2x32xf32>
    %380 = arith.addf %379, %378 : vector<2x32xf32>
    %381 = tpu.reciprocal %380 {approx = true} : vector<2x32xf32> -> vector<2x32xf32>
    %382 = arith.mulf %372, %351 : vector<2x32xf32>
    %383 = arith.mulf %365, %374 : vector<2x32xf32>
    %384 = arith.addf %382, %383 : vector<2x32xf32>
    %385 = math.tanh %384 : vector<2x32xf32>
    %386 = arith.mulf %381, %385 : vector<2x32xf32>
    %387 = tpu.concatenate %184, %386 in 1 : vector<2x392xf32>, vector<2x32xf32> -> vector<2x424xf32>
    %cst_118 = arith.constant 1.000000e+00 : f32
    %388 = vector.broadcast %cst_118 : f32 to vector<2x32xf32>
    %cst_119 = arith.constant 1.000000e+00 : f32
    %389 = vector.broadcast %cst_119 : f32 to vector<2x32xf32>
    %390 = tpu.concatenate %387, %388 in 1 : vector<2x424xf32>, vector<2x32xf32> -> vector<2x456xf32>
    %c0_120 = arith.constant 0 : index
    %c0_121 = arith.constant 0 : index
    %c0_122 = arith.constant 0 : index
    %391 = vector.load %arg11[%c0_120, %c0_121, %c0_122] : memref<1x456x128xf32, #tpu.memory_space<vmem>>, vector<1x456x128xf32>
    %392 = vector.shape_cast %391 : vector<1x456x128xf32> to vector<456x128xf32>
    %cst_123 = arith.constant dense<0.000000e+00> : vector<2x128xf32>
    %393 = tpu.matmul %390, %392, %cst_123 {dimension_numbers = #tpu.dot_dimension_numbers<[1], [0], [0], [1], [0, 0, 1, 1], [], []>} : vector<2x456xf32>, vector<456x128xf32>, vector<2x128xf32> -> vector<2x128xf32>
    %c0_124 = arith.constant 0 : index
    %c0_125 = arith.constant 0 : index
    %c0_126 = arith.constant 0 : index
    %394 = vector.load %arg12[%c0_124, %c0_125, %c0_126] : memref<1x1x128xf32, #tpu.memory_space<vmem>>, vector<1x1x128xf32>
    %395 = vector.shape_cast %394 : vector<1x1x128xf32> to vector<1x128xf32>
    %396 = vector.broadcast %395 : vector<1x128xf32> to vector<2x128xf32>
    %397 = arith.addf %393, %396 : vector<2x128xf32>
    %398 = vector.extract_strided_slice %397 {offsets = [0, 0], sizes = [2, 32], strides = [1, 1]} : vector<2x128xf32> to vector<2x32xf32>
    %cst_127 = arith.constant 0.000000e+00 : f32
    %399 = vector.broadcast %cst_127 : f32 to vector<2x32xf32>
    %400 = arith.subf %399, %398 : vector<2x32xf32>
    %401 = math.exp %400 : vector<2x32xf32>
    %cst_128 = arith.constant 1.000000e+00 : f32
    %402 = vector.broadcast %cst_128 : f32 to vector<2x32xf32>
    %403 = arith.addf %402, %401 : vector<2x32xf32>
    %404 = tpu.reciprocal %403 {approx = true} : vector<2x32xf32> -> vector<2x32xf32>
    %405 = vector.extract_strided_slice %397 {offsets = [0, 32], sizes = [2, 32], strides = [1, 1]} : vector<2x128xf32> to vector<2x32xf32>
    %cst_129 = arith.constant 0.000000e+00 : f32
    %406 = vector.broadcast %cst_129 : f32 to vector<2x32xf32>
    %407 = arith.subf %406, %405 : vector<2x32xf32>
    %408 = math.exp %407 : vector<2x32xf32>
    %cst_130 = arith.constant 1.000000e+00 : f32
    %409 = vector.broadcast %cst_130 : f32 to vector<2x32xf32>
    %410 = arith.addf %409, %408 : vector<2x32xf32>
    %411 = tpu.reciprocal %410 {approx = true} : vector<2x32xf32> -> vector<2x32xf32>
    %412 = vector.extract_strided_slice %397 {offsets = [0, 64], sizes = [2, 32], strides = [1, 1]} : vector<2x128xf32> to vector<2x32xf32>
    %413 = math.tanh %412 : vector<2x32xf32>
    %414 = vector.extract_strided_slice %397 {offsets = [0, 96], sizes = [2, 32], strides = [1, 1]} : vector<2x128xf32> to vector<2x32xf32>
    %cst_131 = arith.constant 0.000000e+00 : f32
    %415 = vector.broadcast %cst_131 : f32 to vector<2x32xf32>
    %416 = arith.subf %415, %414 : vector<2x32xf32>
    %417 = math.exp %416 : vector<2x32xf32>
    %cst_132 = arith.constant 1.000000e+00 : f32
    %418 = vector.broadcast %cst_132 : f32 to vector<2x32xf32>
    %419 = arith.addf %418, %417 : vector<2x32xf32>
    %420 = tpu.reciprocal %419 {approx = true} : vector<2x32xf32> -> vector<2x32xf32>
    %421 = arith.mulf %411, %389 : vector<2x32xf32>
    %422 = arith.mulf %404, %413 : vector<2x32xf32>
    %423 = arith.addf %421, %422 : vector<2x32xf32>
    %424 = math.tanh %423 : vector<2x32xf32>
    %425 = arith.mulf %420, %424 : vector<2x32xf32>
    %c0_133 = arith.constant 0 : index
    %c0_134 = arith.constant 0 : index
    %426 = vector.load %arg13[%c0_133, %c0_134] : memref<32x5xf32, #tpu.memory_space<vmem>>, vector<32x5xf32>
    %cst_135 = arith.constant dense<0.000000e+00> : vector<2x5xf32>
    %427 = tpu.matmul %425, %426, %cst_135 {dimension_numbers = #tpu.dot_dimension_numbers<[1], [0], [0], [1], [0, 0, 1, 1], [], []>} : vector<2x32xf32>, vector<32x5xf32>, vector<2x5xf32> -> vector<2x5xf32>
    %c0_136 = arith.constant 0 : index
    %c0_137 = arith.constant 0 : index
    %428 = vector.load %arg14[%c0_136, %c0_137] : memref<1x5xf32, #tpu.memory_space<vmem>>, vector<1x5xf32>
    %429 = vector.broadcast %428 : vector<1x5xf32> to vector<2x5xf32>
    %430 = arith.addf %427, %429 : vector<2x5xf32>
    %c0_138 = arith.constant 0 : index
    %c0_139 = arith.constant 0 : index
    %431 = vector.load %arg15[%c0_138, %c0_139] : memref<2x5xf32, #tpu.memory_space<vmem>>, vector<2x5xf32>
    tpu.vector_store %arg15[%c0_138, %c0_139], %430 {strides = array<i32>} : memref<2x5xf32, #tpu.memory_space<vmem>>, vector<2x5xf32>,
    return
  }
}

</mosaic_0001>

<bundles_post_ra>
// kernel: drqn_forward.1
= control target key start
LH: loop header
LB: loop body
LE: loop exit
PB: predicated region body
PF: predicated region fallthrough
CT: control target
= control target key end

     0   :  { %vm55_vm0 = vcmask 1040384   ;;  %s7562_s0 = inlined_call_operand.vmem [shape: f32[2,16,64], index: 0, kind: input, shape index: {}]   ;;  %s7563_s1 = inlined_call_operand.vmem [shape: f32[2,72], index: 1, kind: input, shape index: {}]   ;;  %s7564_s2 = inlined_call_operand.vmem [shape: f32[1,576,64], index: 2, kind: input, shape index: {}]   ;;  %s7565_s3 = inlined_call_operand.vmem [shape: f32[1,1,64], index: 3, kind: input, shape index: {}]   ;;  %s7566_s4 = inlined_call_operand.vmem [shape: f32[1,576,64], index: 4, kind: input, shape index: {}]   ;;  %s7567_s5 = inlined_call_operand.vmem [shape: f32[1,1,64], index: 5, kind: input, shape index: {}]   ;;  %s7568_s6 = inlined_call_operand.vmem [shape: f32[504,56], index: 6, kind: input, shape index: {}]   ;;  %s7569_s7 = inlined_call_operand.vmem [shape: f32[504,56], index: 7, kind: input, shape index: {}]   ;;  %s7570_s8 = inlined_call_operand.vmem [shape: f32[1,56], index: 8, kind: input, shape index: {}]   ;;  %s7571_s9 = inlined_call_operand.vmem [shape: f32[44,128], index: 9, kind: input, shape index: {}]   ;;  %s7572_s10 = inlined_call_operand.vmem [shape: f32[1,128], index: 10, kind: input, shape index: {}]   ;;  %s7573_s11 = inlined_call_operand.vmem [shape: f32[1,456,128], index: 11, kind: input, shape index: {}]   ;;  %s7574_s12 = inlined_call_operand.vmem [shape: f32[1,1,128], index: 12, kind: input, shape index: {}]   ;;  %s7575_s13 = inlined_call_operand.vmem [shape: f32[32,5], index: 13, kind: input, shape index: {}]   ;;  %s7576_s14 = inlined_call_operand.vmem [shape: f32[1,5], index: 14, kind: input, shape index: {}]   ;;  %s7577_s15 = inlined_call_operand.hbm [shape: f32[2,5], index: 15, kind: output, shape index: {}]  }
   0x1   :  { %v51_v0 = vld [vmem:[%s7562_s0] sm:$0xff]  ;;  %v52_v1 = vld [vmem:[%s7562_s0 + $0x8] sm:$0xff] }
   0x2   :  { %v56_v2 = vrot.slane %v51_v0, 7  ;;  %v57_v3 = vrot.slane %v52_v1, 7 }
   0x3   :  { %20 = vsyncpa [#allocation3], 0  ;;  %s7665_s22 = smov 4   ;;  %v164_v7 = vld [vmem:[%s7564_s2 + $0x80] sm:$0xff]  ;;  %v165_v8 = vld [vmem:[%s7564_s2 + $0x88] sm:$0xff]  ;;  %vm74_vm1 = vcmask 31744  }
   0x4   :  { %v61_v4 = vsel %vm55_vm0, 0.0, %v56_v2  ;;  %v62_v5 = vsel %vm55_vm0, %v57_v3, 0.0  ;;  %v58_v6 = vsel %vm55_vm0, %v56_v2, %v57_v3  ;;  %v148_v9 = vld [vmem:[%s7564_s2] sm:$0xff]  ;;  %v5326_v10 = vpack.c.bf16 %v165_v8, %v164_v7  ;;  %v149_v11 = vld [vmem:[%s7564_s2 + $0x8] sm:$0xff]  ;;  %v166_v16 = vld [vmem:[%s7564_s2 + $0x90] sm:$0xff]  ;;  %s5202_s29 = smov 120  }
   0x5   :  { %65 = vrot.lane.b32.xlu0 %v61_v4, %s7665_s22  ;;  %69 = vrot.lane.b32.xlu1 %v62_v5, %s7665_s22  ;;  %v196_v12 = vld [vmem:[%s7564_s2 + $0x180] sm:$0xff]  ;;  %v197_v13 = vld [vmem:[%s7564_s2 + $0x188] sm:$0xff]  ;;  %v5337_v14 = vpack.c.bf16 %v149_v11, %v148_v9  ;;  %vm78_vm2 = vcmask 556032   ;;  %vm97_vm3 = vcmask 1046528   ;;  %vm121_vm4 = vcmask 1045504   ;;  %s5203_s30 = smov 64  }
   0x6   :  { %v5339_v15 = vpack.c.bf16 %v197_v13, %v196_v12  ;;  %v167_v17 = vld [vmem:[%s7564_s2 + $0x98] sm:$0xff]  ;;  %v180_v18 = vld [vmem:[%s7564_s2 + $0x100] sm:$0xff]  ;;  %4269 = vmatprep.subr.bf16.mxu0 %v5326_v10  ;;  %v181_v20 = vld [vmem:[%s7564_s2 + $0x108] sm:$0xff]  ;;  %s5204_s16 = smov 60   ;;  %s5205_s17 = smov 124   ;;  %vm139_vm5 = vcmask 523264  }
   0x7   :  { %v5351_v19 = vpack.c.bf16 %v167_v17, %v166_v16  ;;  %v150_v21 = vld [vmem:[%s7564_s2 + $0x10] sm:$0xff]  ;;  %v151_v22 = vld [vmem:[%s7564_s2 + $0x18] sm:$0xff]  ;;  %4271 = vmatpush3.bf16.msra.mxu0 %v5337_v14  ;;  %v5364_v23 = vpack.c.bf16 %v181_v20, %v180_v18  ;;  %v168_v27 = vld [vmem:[%s7564_s2 + $0xa0] sm:$0xff]  ;;  %s5206_s18 = smov 56   ;;  %s7663_s24 = smov 104   ;;  %vm915_vm6 = vcmask 457728  }
   0x8   :  { %4301 = vmatprep.subr.bf16.mxu1 %v5339_v15  ;;  %v5366_v24 = vpack.c.bf16 %v151_v22, %v150_v21  ;;  %v198_v25 = vld [vmem:[%s7564_s2 + $0x190] sm:$0xff]  ;;  %v199_v26 = vld [vmem:[%s7564_s2 + $0x198] sm:$0xff]  ;;  %v169_v29 = vld [vmem:[%s7564_s2 + $0xa8] sm:$0xff]  ;;  %s7641_s20 = smov 40   ;;  %s7637_s21 = smov 52   ;;  %vm921_vm7 = vcmask 326656  }
   0x9   :  { %67 = vrot.lane.b32.xlu0 %v58_v6, %s7665_s22  ;;  %4273 = vmatprep.subr.bf16.mxu0 %v5351_v19  ;;  %v5378_v28 = vpack.c.bf16 %v199_v26, %v198_v25  ;;  %v182_v30 = vld [vmem:[%s7564_s2 + $0x110] sm:$0xff]  ;;  %v183_v31 = vld [vmem:[%s7564_s2 + $0x118] sm:$0xff]  ;;  %v5390_v32 = vpack.c.bf16 %v169_v29, %v168_v27  ;;  %v152_v34 = vld [vmem:[%s7564_s2 + $0x20] sm:$0xff]  ;;  %s7639_s27 = smov 92   ;;  %s5213_s19 = smov 80   ;;  %vm924_vm8 = vcmask 785408  }
   0xa   :  { %4303 = vmatpush3.bf16.msra.mxu1 %v5364_v23  ;;  %v5392_v33 = vpack.c.bf16 %v183_v31, %v182_v30  ;;  %v153_v35 = vld [vmem:[%s7564_s2 + $0x28] sm:$0xff]  ;;  %v200_v36 = vld [vmem:[%s7564_s2 + $0x1a0] sm:$0xff]  ;;  %v170_v38 = vld [vmem:[%s7564_s2 + $0xb0] sm:$0xff]  ;;  %vm918_vm9 = vcmask 916480   ;;  %vm933_vm10 = vcmask 64512   ;;  %vm927_vm11 = vcmask 195584  }
   0xb   :  { %4305 = vmatprep.subr.bf16.mxu1 %v5378_v28  ;;  %v201_v37 = vld [vmem:[%s7564_s2 + $0x1a8] sm:$0xff]  ;;  %v171_v39 = vld [vmem:[%s7564_s2 + $0xb8] sm:$0xff]  ;;  %4275 = vmatpush3.bf16.msra.mxu0 %v5366_v24  ;;  %v5414_v40 = vpack.c.bf16 %v153_v35, %v152_v34  ;;  %v184_v42 = vld [vmem:[%s7564_s2 + $0x120] sm:$0xff]  ;;  %vm1008_vm12 = vcmask 982016   ;;  %vm930_vm13 = vcmask 654336   ;;  %s7832_s25 = smov 40  }
   0xc   :  { %v5416_v41 = vpack.c.bf16 %v201_v37, %v200_v36  ;;  %v185_v43 = vld [vmem:[%s7564_s2 + $0x128] sm:$0xff]  ;;  %v154_v44 = vld [vmem:[%s7564_s2 + $0x30] sm:$0xff]  ;;  %4277 = vmatprep.subr.bf16.mxu0 %v5390_v32  ;;  %v5428_v45 = vpack.c.bf16 %v171_v39, %v170_v38  ;;  %v155_v46 = vld [vmem:[%s7564_s2 + $0x38] sm:$0xff]  ;;  %s7833_s26 = smov 52   ;;  %vm2518_vm14 = vcmask 1043456   ;;  %vm5215_vm15 = vmmov 1  }
   0xd   :  { %v202_v47 = vld [vmem:[%s7564_s2 + $0x1b0] sm:$0xff]  ;;  %v203_v48 = vld [vmem:[%s7564_s2 + $0x1b8] sm:$0xff]  ;;  %v5440_v49 = vpack.c.bf16 %v185_v43, %v184_v42  ;;  %v172_v50 = vld [vmem:[%s7564_s2 + $0xc0] sm:$0xff]  ;;  %v5458_v55 = vpack.c.bf16 %v155_v46, %v154_v44 }
   0xe   :  { %4307 = vmatpush3.bf16.msra.mxu1 %v5392_v33  ;;  %v173_v51 = vld [vmem:[%s7564_s2 + $0xc8] sm:$0xff]  ;;  %v5449_v52 = vpack.c.bf16 %v203_v48, %v202_v47  ;;  %v186_v53 = vld [vmem:[%s7564_s2 + $0x130] sm:$0xff]  ;;  %v187_v54 = vld [vmem:[%s7564_s2 + $0x138] sm:$0xff] }
   0xf   :  { %4309 = vmatprep.subr.bf16.mxu1 %v5416_v41  ;;  %4279 = vmatpush3.bf16.msra.mxu0 %v5414_v40  ;;  %v204_v56 = vld [vmem:[%s7564_s2 + $0x1c0] sm:$0xff]  ;;  %v205_v57 = vld [vmem:[%s7564_s2 + $0x1c8] sm:$0xff]  ;;  %v5467_v58 = vpack.c.bf16 %v173_v51, %v172_v50  ;;  %v5476_v61 = vpack.c.bf16 %v187_v54, %v186_v53  ;;  %v174_v62 = vld [vmem:[%s7564_s2 + $0xd0] sm:$0xff] }
  0x10   :  { %4281 = vmatprep.subr.bf16.mxu0 %v5428_v45  ;;  %v156_v59 = vld [vmem:[%s7564_s2 + $0x40] sm:$0xff]  ;;  %v157_v60 = vld [vmem:[%s7564_s2 + $0x48] sm:$0xff]  ;;  %v175_v63 = vld [vmem:[%s7564_s2 + $0xd8] sm:$0xff]  ;;  %v5485_v0 = vpack.c.bf16 %v205_v57, %v204_v56 }
  0x11   :  { %v188_v1 = vld [vmem:[%s7564_s2 + $0x140] sm:$0xff]  ;;  %v189_v2 = vld [vmem:[%s7564_s2 + $0x148] sm:$0xff]  ;;  %v5494_v3 = vpack.c.bf16 %v157_v60, %v156_v59  ;;  %v5497_v4 = vpack.c.bf16 %v175_v63, %v174_v62  ;;  %v158_v6 = vld [vmem:[%s7564_s2 + $0x50] sm:$0xff] }
  0x12   :  { %4311 = vmatpush3.bf16.msra.mxu1 %v5440_v49  ;;  %v5500_v5 = vpack.c.bf16 %v189_v2, %v188_v1  ;;  %v159_v7 = vld [vmem:[%s7564_s2 + $0x58] sm:$0xff]  ;;  %v206_v9 = vld [vmem:[%s7564_s2 + $0x1d0] sm:$0xff]  ;;  %v176_v12 = vld [vmem:[%s7564_s2 + $0xe0] sm:$0xff] }
  0x13   :  { %4313 = vmatprep.subr.bf16.mxu1 %v5449_v52  ;;  %4283 = vmatpush3.bf16.msra.mxu0 %v5458_v55  ;;  %v5512_v8 = vpack.c.bf16 %v159_v7, %v158_v6  ;;  %v207_v11 = vld [vmem:[%s7564_s2 + $0x1d8] sm:$0xff]  ;;  %v177_v16 = vld [vmem:[%s7564_s2 + $0xe8] sm:$0xff]  ;;  %v190_v17 = vld [vmem:[%s7564_s2 + $0x150] sm:$0xff] }
  0x14   :  { %4285 = vmatprep.subr.bf16.mxu0 %v5467_v58  ;;  %v5524_v13 = vpack.c.bf16 %v207_v11, %v206_v9  ;;  %v191_v18 = vld [vmem:[%s7564_s2 + $0x158] sm:$0xff]  ;;  %v5535_v20 = vpack.c.bf16 %v177_v16, %v176_v12  ;;  %v160_v22 = vld [vmem:[%s7564_s2 + $0x60] sm:$0xff]  ;;  %v161_v25 = vld [vmem:[%s7564_s2 + $0x68] sm:$0xff] }
  0x15   :  { %v5537_v21 = vpack.c.bf16 %v191_v18, %v190_v17  ;;  %v5546_v26 = vpack.c.bf16 %v161_v25, %v160_v22  ;;  %v208_v27 = vld [vmem:[%s7564_s2 + $0x1e0] sm:$0xff]  ;;  %v209_v29 = vld [vmem:[%s7564_s2 + $0x1e8] sm:$0xff]  ;;  %v178_v30 = vld [vmem:[%s7564_s2 + $0xf0] sm:$0xff] }
  0x16   :  { %4315 = vmatpush3.bf16.msra.mxu1 %v5476_v61  ;;  %v5560_v31 = vpack.c.bf16 %v209_v29, %v208_v27  ;;  %v179_v34 = vld [vmem:[%s7564_s2 + $0xf8] sm:$0xff]  ;;  %v192_v35 = vld [vmem:[%s7564_s2 + $0x160] sm:$0xff]  ;;  %v193_v36 = vld [vmem:[%s7564_s2 + $0x168] sm:$0xff] }
  0x17   :  { %4317 = vmatprep.subr.bf16.mxu1 %v5485_v0  ;;  %4287 = vmatpush3.bf16.msra.mxu0 %v5494_v3  ;;  %v5571_v37 = vpack.c.bf16 %v179_v34, %v178_v30  ;;  %v5573_v38 = vpack.c.bf16 %v193_v36, %v192_v35  ;;  %v162_v39 = vld [vmem:[%s7564_s2 + $0x70] sm:$0xff]  ;;  %v163_v42 = vld [vmem:[%s7564_s2 + $0x78] sm:$0xff]  ;;  %v212_v51 = vld [vmem:[%s7564_s2 + $0x200] sm:$0xff] }
  0x18   :  { %4289 = vmatprep.subr.bf16.mxu0 %v5497_v4  ;;  %v5582_v43 = vpack.c.bf16 %v163_v42, %v162_v39  ;;  %v210_v44 = vld [vmem:[%s7564_s2 + $0x1f0] sm:$0xff]  ;;  %v211_v46 = vld [vmem:[%s7564_s2 + $0x1f8] sm:$0xff]  ;;  %v213_v54 = vld [vmem:[%s7564_s2 + $0x208] sm:$0xff] }
  0x19   :  { %v5593_v47 = vpack.c.bf16 %v211_v46, %v210_v44  ;;  %v194_v48 = vld [vmem:[%s7564_s2 + $0x170] sm:$0xff]  ;;  %v195_v50 = vld [vmem:[%s7564_s2 + $0x178] sm:$0xff]  ;;  %v5610_v59 = vpack.c.bf16 %v213_v54, %v212_v51 }
  0x1a   :  { %4319 = vmatpush3.bf16.msra.mxu1 %v5500_v5  ;;  %v5604_v53 = vpack.c.bf16 %v195_v50, %v194_v48  ;;  %v214_v42 = vld [vmem:[%s7564_s2 + $0x210] sm:$0xff]  ;;  %v215_v44 = vld [vmem:[%s7564_s2 + $0x218] sm:$0xff] }
  0x1b   :  { %4291 = vmatpush3.bf16.msra.mxu0 %v5512_v8  ;;  %4321 = vmatprep.subr.bf16.mxu1 %v5524_v13  ;;  %7676 = vst [vmem:[#allocation5_spill] sm:$0xff] %v5593_v47  ;;  %v5649_v54 = vpack.c.bf16 %v215_v44, %v214_v42  ;;  %v3475_v42 = vld [vmem:[%s7565_s3] ss:$0 sm:$0xff] }
  0x1c   :  { %4293 = vmatprep.subr.bf16.mxu0 %v5535_v20  ;;  %7677 = vst [vmem:[#allocation6_spill] sm:$0xff] %v5604_v53 }
  0x1e   :  { %4323 = vmatpush3.bf16.msra.mxu1 %v5537_v21 }
  0x1f   :  { %4295 = vmatpush3.bf16.msra.mxu0 %v5546_v26  ;;  %4325 = vmatprep.subr.bf16.mxu1 %v5560_v31 }
  0x20   :  { %4297 = vmatprep.subr.bf16.mxu0 %v5571_v37 }
  0x22   :  { %4327 = vmatpush3.bf16.msra.mxu1 %v5573_v38 }
  0x23   :  { %4299 = vmatpush3.bf16.msra.mxu0 %v5582_v43  ;;  %4329 = vmatprep.subr.bf16.mxu1 %v5593_v47 }
  0x24   :  { %4333 = vmatprep.subr.bf16.mxu0 %v5610_v59 }
  0x26   :  { %4331 = vmatpush3.bf16.msra.mxu1 %v5604_v53  ;;  %v1175_v53 = vld [vmem:[%s7569_s7 + $0x50] sm:$0xff] }
  0x77   :  { %v66_v56 = vpop.permute.xlu0 %65  ;;  %v70_v57 = vpop.permute.xlu1 %69 }
  0x78   :  { %v75_v60 = vsel %vm74_vm1, 0.0, %v66_v56  ;;  %v77_v63 = vsel %vm74_vm1, 0.0, %v70_v57 }
  0x79   :  { %v79_v62 = vsel %vm78_vm2, %v75_v60, 0.0  ;;  %v81_v6 = vsel %vm78_vm2, %v77_v63, 0.0  ;;  %v216_v63 = vld [vmem:[%s7564_s2 + $0x220] sm:$0xff] }
  0x7a   :  { %90 = vrot.lane.b32.xlu1 %v79_v62, %s5202_s29  ;;  %v122_v9 = vrot.slane %v79_v62, 2  ;;  %v98_v12 = vrot.slane %v79_v62, 1  ;;  %v125_v22 = vrot.slane %v81_v6, 2  ;;  %v101_v29 = vrot.slane %v81_v6, 1 }
  0x7b   :  { %v68_v1 = vpop.permute.xlu0 %67 }
  0x7c   :  { %v76_v2 = vsel %vm74_vm1, 0.0, %v68_v1  ;;  %v217_v1 = vld [vmem:[%s7564_s2 + $0x228] sm:$0xff] }
  0x7d   :  { %v5621_v7 = vsel %vm78_vm2, %v76_v2, 0.0 }
  0x7e   :  { %v123_v11 = vrot.slane %v5621_v7, 2  ;;  %92 = vrot.lane.b32.xlu0 %v5621_v7, %s5202_s29  ;;  %v99_v16 = vrot.slane %v5621_v7, 1 }
  0x80   :  { %v100_v17 = vsel %vm97_vm3, %v98_v12, %v99_v16  ;;  %v124_v18 = vsel %vm121_vm4, %v122_v9, %v123_v11  ;;  %v126_v27 = vsel %vm121_vm4, %v123_v11, %v125_v22  ;;  %v102_v34 = vsel %vm97_vm3, %v99_v16, %v101_v29  ;;  %v218_v11 = vld [vmem:[%s7564_s2 + $0x230] sm:$0xff]  ;;  %v219_v12 = vld [vmem:[%s7564_s2 + $0x238] sm:$0xff]  ;;  %s5214_s2 = smov 16  }
  0x81   :  { %v5054_v25 = vpack.i.bf16 %v124_v18, %v79_v62  ;;  %v5059_v30 = vpack.i.bf16 %v126_v27, %v5621_v7  ;;  %v5662_v9 = vpack.c.bf16 %v217_v1, %v216_v63 }
  0x82   :  { %103 = vrot.lane.b32.xlu0 %v100_v17, %s5203_s30 }
  0x83   :  { %5055 = vrot.lane.b32.xlu1 %v5054_v25, %s5204_s16 }
  0x86   :  { %109 = vrot.lane.b32.xlu0 %v100_v17, %s5205_s17 }
  0x87   :  { %115 = vrot.lane.b32.xlu1 %v100_v17, %s5206_s18 }
  0x8a   :  { %5060 = vrot.lane.b32.xlu0 %v5059_v30, %s5204_s16  ;;  %v5676_v30 = vpack.c.bf16 %v219_v12, %v218_v11 }
  0x8b   :  { %105 = vrot.lane.b32.xlu1 %v102_v34, %s5203_s30 }
  0x8e   :  { %117 = vrot.lane.b32.xlu0 %v102_v34, %s5206_s18 }
  0x8f   :  { %111 = vrot.lane.b32.xlu1 %v102_v34, %s5205_s17 }
  0x92   :  { %137 = vrot.lane.b32.xlu0 %v126_v27, %s5202_s29 }
  0x93   :  { %135 = vrot.lane.b32.xlu1 %v124_v18, %s5202_s29 }
  0xec   :  { %v91_v36 = vpop.permute.xlu1 %90 }
  0xf0   :  { %v93_v35 = vpop.permute.xlu0 %92 }
  0xf4   :  { %v104_v39 = vpop.permute.xlu0 %103 }
  0xf5   :  { %v5056_v46 = vpop.permute.xlu1 %5055  ;;  %v142_v48 = vsel %vm139_vm5, %v91_v36, %v104_v39 }
  0xf6   :  { %v5058_v50 = vunpack.i.h.bf16 %v5056_v46  ;;  %v5057_v51 = vunpack.i.l.bf16 %v5056_v46  ;;  %295 = vmatprep.mubr.f32.mxu0 %v142_v48 }
  0xf8   :  { %v110_v56 = vpop.permute.xlu0 %109  ;;  %v146_v57 = vsel %vm139_vm5, %v124_v18, %v5058_v50  ;;  %v140_v60 = vsel %vm139_vm5, %v79_v62, %v5057_v51 }
  0xf9   :  { %370 = vmatprep.mubr.f32.mxu1 %v146_v57  ;;  %v116_v2 = vpop.permute.xlu1 %115  ;;  %296 = vmatmul.mubr.f32.vlgmr.msra.gmra.mrb[0].mxu0 %v140_v60 }
  0xfa   :  { %4335 = vmatpush3.bf16.msra.mxu0 %v5610_v59  ;;  %v144_v6 = vsel %vm139_vm5, %v110_v56, %v116_v2 }
  0xfb   :  { %371 = vmatmul.mubr.f32.vlgmr.msra.gmra.mrb[0].mxu1 %v144_v6  ;;  %4337 = vmatprep.subr.bf16.mxu0 %v5649_v54 }
  0xfc   :  { %v5061_v62 = vpop.permute.xlu0 %5060 }
  0xfd   :  { %v5063_v16 = vunpack.i.h.bf16 %v5061_v62  ;;  %v5062_v17 = vunpack.i.l.bf16 %v5061_v62  ;;  %v106_v18 = vpop.permute.xlu1 %105 }
  0xfe   :  { %4339 = vmatpush3.bf16.msra.mxu0 %v5649_v54  ;;  %v143_v22 = vsel %vm139_vm5, %v93_v35, %v106_v18 }
  0xff   :  { %300 = vmatprep.mubr.f32.mxu0 %v143_v22  ;;  %4341 = vmatprep.subr.bf16.mxu0 %v5662_v9  ;;  %v141_v25 = vsel %vm139_vm5, %v5621_v7, %v5062_v17  ;;  %v147_v29 = vsel %vm139_vm5, %v126_v27, %v5063_v16 }
 0x100   :  { %v118_v34 = vpop.permute.xlu0 %117  ;;  %301 = vmatmul.mubr.f32.gmra.mrb[2].mxu0 %v141_v25  ;;  %375 = vmatprep.mubr.f32.mxu1 %v147_v29 }
 0x101   :  { %v112_v36 = vpop.permute.xlu1 %111 }
 0x102   :  { %4343 = vmatpush3.bf16.msra.mxu0 %v5662_v9  ;;  %v145_v39 = vsel %vm139_vm5, %v112_v36, %v118_v34 }
 0x103   :  { %376 = vmatmul.mubr.f32.gmra.mrb[2].mxu1 %v145_v39  ;;  %4345 = vmatprep.subr.bf16.mxu0 %v5676_v30 }
 0x104   :  { %v138_v7 = vpop.permute.xlu0 %137 }
 0x105   :  { %v136_v35 = vpop.permute.xlu1 %135 }
 0x106   :  { %4347 = vmatpush3.bf16.msra.mxu0 %v5676_v30  ;;  %4107 = vmatprep.mubr.msk.f32.mxu0 %vm139_vm5, %v136_v35 }
 0x109   :  { %4108 = vmatmul.mubr.msk.f32.vlgmr.msra.gmra.mrb[4].mxu0 %vm139_vm5, %v138_v7 }
 0x1cc   :  { %v3545_v27 = vpop.f32.mrb[0].mxu0 }
 0x1cd   :  { %v3546_v44 = vpop.f32.mrb[1].mxu0 }
 0x1ce   :  { %v3547_v46 = vadd.f32 %v3546_v44, %v3545_v27  ;;  %v3583_v48 = vpop.f32.mrb[0].mxu1  ;;  %v563_v27 = vld [vmem:[%s7566_s4 + $0x80] sm:$0xff] }
 0x1cf   :  { %v3584_v50 = vpop.f32.mrb[1].mxu1  ;;  %v547_v44 = vld [vmem:[%s7566_s4] sm:$0xff] }
 0x1d0   :  { %v298_v51 = vadd.f32 %v3547_v46, %v3475_v42  ;;  %v3585_v56 = vadd.f32 %v3584_v50, %v3583_v48  ;;  %v548_v48 = vld [vmem:[%s7566_s4 + $0x8] sm:$0xff]  ;;  %v595_v50 = vld [vmem:[%s7566_s4 + $0x180] sm:$0xff] }
 0x1d2   :  { %v373_v57 = vadd.f32 %v3585_v56, %v298_v51  ;;  %v596_v51 = vld [vmem:[%s7566_s4 + $0x188] sm:$0xff]  ;;  %v5713_v56 = vpack.c.bf16 %v548_v48, %v547_v44  ;;  %v569_v48 = vld [vmem:[%s7566_s4 + $0xb0] sm:$0xff] }
 0x1d3   :  { %v3548_v60 = vpop.f32.mrb[2].mxu0  ;;  %v600_v44 = vld [vmem:[%s7566_s4 + $0x1a8] sm:$0xff] }
 0x1d4   :  { %v3549_v63 = vpop.f32.mrb[3].mxu0  ;;  %7679 = vst [vmem:[#allocation8_spill] sm:$0xff] %v5713_v56 }
 0x1d5   :  { %v3550_v1 = vadd.f32 %v3549_v63, %v3548_v60  ;;  %v565_v60 = vld [vmem:[%s7566_s4 + $0x90] sm:$0xff]  ;;  %v566_v63 = vld [vmem:[%s7566_s4 + $0x98] sm:$0xff] }
 0x1d6   :  { %v3586_v2 = vpop.f32.mrb[2].mxu1 }
 0x1d7   :  { %v303_v6 = vadd.f32 %v3550_v1, %v3475_v42  ;;  %v3587_v62 = vpop.f32.mrb[3].mxu1  ;;  %v564_v42 = vld [vmem:[%s7566_s4 + $0x88] sm:$0xff]  ;;  %v579_v1 = vld [vmem:[%s7566_s4 + $0x100] sm:$0xff] }
 0x1d8   :  { %v3588_v11 = vadd.f32 %v3587_v62, %v3586_v2  ;;  %v5702_v46 = vpack.c.bf16 %v564_v42, %v563_v27  ;;  %v5727_v2 = vpack.c.bf16 %v566_v63, %v565_v60  ;;  %v549_v62 = vld [vmem:[%s7566_s4 + $0x10] sm:$0xff]  ;;  %v552_v27 = vld [vmem:[%s7566_s4 + $0x28] sm:$0xff]  ;;  %v599_v42 = vld [vmem:[%s7566_s4 + $0x1a0] sm:$0xff] }
 0x1d9   :  { %v5792_v60 = vpack.c.bf16 %v600_v44, %v599_v42  ;;  %v583_v63 = vld [vmem:[%s7566_s4 + $0x120] sm:$0xff] }
 0x1da   :  { %v378_v12 = vadd.f32 %v3588_v11, %v303_v6  ;;  %7678 = vst [vmem:[#allocation7_spill] sm:$0xff] %v5702_v46  ;;  %4349 = vmatprep.subr.bf16.mxu1 %v5702_v46  ;;  %7681 = vst [vmem:[#allocation10_spill] sm:$0xff] %v5727_v2  ;;  %v580_v6 = vld [vmem:[%s7566_s4 + $0x108] sm:$0xff]  ;;  %v550_v11 = vld [vmem:[%s7566_s4 + $0x18] sm:$0xff] }
 0x1db   :  { %4351 = vmatpush3.bf16.msra.mxu1 %v5713_v56  ;;  %7688 = vst [vmem:[#allocation17_spill] sm:$0xff] %v5792_v60  ;;  %v603_v44 = vld [vmem:[%s7566_s4 + $0x1c0] sm:$0xff]  ;;  %v1191_v56 = vld [vmem:[%s7569_s7 + $0xd0] sm:$0xff] }
 0x1dc   :  { %v4109_v16 = vpop.f32.mrb[4].mxu0  ;;  %4353 = vmatprep.subr.bf16.mxu1 %v5727_v2  ;;  %v1172_v2 = vld [vmem:[%s7569_s7 + $0x38] sm:$0xff] }
 0x1dd   :  { %v453_v17 = vadd.f32 %v4109_v16, %v378_v12  ;;  %v447_v18 = vpop.f32.mrb[5].mxu0  ;;  %v5740_v12 = vpack.c.bf16 %v580_v6, %v579_v1  ;;  %v5742_v16 = vpack.c.bf16 %v550_v11, %v549_v62  ;;  %v584_v1 = vld [vmem:[%s7566_s4 + $0x128] sm:$0xff]  ;;  %v553_v6 = vld [vmem:[%s7566_s4 + $0x30] sm:$0xff]  ;;  %v554_v11 = vld [vmem:[%s7566_s4 + $0x38] sm:$0xff] }
 0x1de   :  { %v448_v22 = vadd.f32 %v447_v18, %v373_v57  ;;  %v5715_v57 = vpack.c.bf16 %v596_v51, %v595_v50  ;;  %v598_v18 = vld [vmem:[%s7566_s4 + $0x198] sm:$0xff]  ;;  %v5834_v42 = vpack.c.bf16 %v554_v11, %v553_v6  ;;  %v573_v11 = vld [vmem:[%s7566_s4 + $0xd0] sm:$0xff] }
 0x1df   :  { %v457_v25 = vmax.f32 %v453_v17, 0.0  ;;  %7682 = vst [vmem:[#allocation11_spill] sm:$0xff] %v5740_v12  ;;  %7683 = vst [vmem:[#allocation12_spill] sm:$0xff] %v5742_v16  ;;  %v597_v17 = vld [vmem:[%s7566_s4 + $0x190] sm:$0xff]  ;;  %v570_v50 = vld [vmem:[%s7566_s4 + $0xb8] sm:$0xff]  ;;  %4355 = vmatpush3.bf16.msra.mxu1 %v5742_v16 }
 0x1e0   :  { %v456_v29 = vmax.f32 %v448_v22, 0.0  ;;  %7680 = vst [vmem:[#allocation9_spill] sm:$0xff] %v5715_v57  ;;  %4381 = vmatprep.subr.bf16.mxu0 %v5715_v57  ;;  %v567_v22 = vld [vmem:[%s7566_s4 + $0xa0] sm:$0xff]  ;;  %v5804_v62 = vpack.c.bf16 %v570_v50, %v569_v48  ;;  %7692 = vst [vmem:[#allocation21_spill] sm:$0xff] %v5834_v42  ;;  %v604_v48 = vld [vmem:[%s7566_s4 + $0x1c8] sm:$0xff] }
 0x1e1   :  { %v461_v34 = vrot.slane %v457_v25, 7  ;;  %v5754_v25 = vpack.c.bf16 %v598_v18, %v597_v17  ;;  %4383 = vmatpush3.bf16.msra.mxu0 %v5740_v12  ;;  %v601_v17 = vld [vmem:[%s7566_s4 + $0x1b0] sm:$0xff]  ;;  %v602_v18 = vld [vmem:[%s7566_s4 + $0x1b8] sm:$0xff] }
 0x1e2   :  { %v460_v36 = vrot.slane %v456_v29, 7  ;;  %v568_v29 = vld [vmem:[%s7566_s4 + $0xa8] sm:$0xff]  ;;  %7689 = vst [vmem:[#allocation18_spill] sm:$0xff] %v5804_v62 }
 0x1e3   :  { %v466_v7 = vsel %vm55_vm0, %v461_v34, 0.0  ;;  %7684 = vst [vmem:[#allocation13_spill] sm:$0xff] %v5754_v25  ;;  %4385 = vmatprep.subr.bf16.mxu0 %v5754_v25 }
 0x1e4   :  { %v465_v39 = vsel %vm55_vm0, 0.0, %v460_v36  ;;  %v462_v35 = vsel %vm55_vm0, %v460_v36, %v461_v34  ;;  %v581_v34 = vld [vmem:[%s7566_s4 + $0x110] sm:$0xff]  ;;  %v582_v36 = vld [vmem:[%s7566_s4 + $0x118] sm:$0xff] }
 0x1e5   :  { %469 = vrot.lane.b32.xlu1 %v465_v39, %s7665_s22  ;;  %471 = vrot.lane.b32.xlu0 %v462_v35, %s7665_s22  ;;  %v5766_v39 = vpack.c.bf16 %v568_v29, %v567_v22  ;;  %v5768_v35 = vpack.c.bf16 %v582_v36, %v581_v34  ;;  %v5816_v22 = vpack.c.bf16 %v584_v1, %v583_v63  ;;  %v571_v29 = vld [vmem:[%s7566_s4 + $0xc0] sm:$0xff]  ;;  %v572_v34 = vld [vmem:[%s7566_s4 + $0xc8] sm:$0xff] }
 0x1e6   :  { %v5825_v36 = vpack.c.bf16 %v602_v18, %v601_v17  ;;  %v5843_v50 = vpack.c.bf16 %v572_v34, %v571_v29  ;;  %v555_v63 = vld [vmem:[%s7566_s4 + $0x40] sm:$0xff]  ;;  %v556_v1 = vld [vmem:[%s7566_s4 + $0x48] sm:$0xff]  ;;  %v574_v17 = vld [vmem:[%s7566_s4 + $0xd8] sm:$0xff]  ;;  %v5861_v18 = vpack.c.bf16 %v604_v48, %v603_v44 }
 0x1e7   :  { %7685 = vst [vmem:[#allocation14_spill] sm:$0xff] %v5766_v39  ;;  %7686 = vst [vmem:[#allocation15_spill] sm:$0xff] %v5768_v35  ;;  %4357 = vmatprep.subr.bf16.mxu1 %v5766_v39  ;;  %4387 = vmatpush3.bf16.msra.mxu0 %v5768_v35  ;;  %v587_v29 = vld [vmem:[%s7566_s4 + $0x140] sm:$0xff]  ;;  %v588_v34 = vld [vmem:[%s7566_s4 + $0x148] sm:$0xff]  ;;  %v5879_v48 = vpack.c.bf16 %v574_v17, %v573_v11 }
 0x1e8   :  { %7690 = vst [vmem:[#allocation19_spill] sm:$0xff] %v5816_v22  ;;  %4389 = vmatprep.subr.bf16.mxu0 %v5792_v60  ;;  %7691 = vst [vmem:[#allocation20_spill] sm:$0xff] %v5825_v36  ;;  %v606_v44 = vld [vmem:[%s7566_s4 + $0x1d8] sm:$0xff]  ;;  %v576_v11 = vld [vmem:[%s7566_s4 + $0xe8] sm:$0xff] }
 0x1e9   :  { %473 = vrot.lane.b32.xlu1 %v466_v7, %s7665_s22  ;;  %v551_v7 = vld [vmem:[%s7566_s4 + $0x20] sm:$0xff]  ;;  %7693 = vst [vmem:[#allocation22_spill] sm:$0xff] %v5843_v50  ;;  %7695 = vst [vmem:[#allocation24_spill] sm:$0xff] %v5861_v18  ;;  %v616_v60 = vld [vmem:[%s7566_s4 + $0x228] sm:$0xff] }
 0x1ea   :  { %v5790_v51 = vpack.c.bf16 %v552_v27, %v551_v7  ;;  %v585_v7 = vld [vmem:[%s7566_s4 + $0x130] sm:$0xff]  ;;  %v586_v27 = vld [vmem:[%s7566_s4 + $0x138] sm:$0xff]  ;;  %7697 = vst [vmem:[#allocation26_spill] sm:$0xff] %v5879_v48  ;;  %v615_v39 = vld [vmem:[%s7566_s4 + $0x220] sm:$0xff] }
 0x1eb   :  { %4391 = vmatpush3.bf16.msra.mxu0 %v5816_v22  ;;  %v5852_v6 = vpack.c.bf16 %v586_v27, %v585_v7  ;;  %v5870_v7 = vpack.c.bf16 %v556_v1, %v555_v63  ;;  %v605_v27 = vld [vmem:[%s7566_s4 + $0x1d0] sm:$0xff]  ;;  %v558_v63 = vld [vmem:[%s7566_s4 + $0x58] sm:$0xff]  ;;  %v5888_v1 = vpack.c.bf16 %v588_v34, %v587_v29 }
 0x1ec   :  { %7687 = vst [vmem:[#allocation16_spill] sm:$0xff] %v5790_v51  ;;  %4359 = vmatpush3.bf16.msra.mxu1 %v5790_v51  ;;  %4393 = vmatprep.subr.bf16.mxu0 %v5825_v36  ;;  %v5897_v17 = vpack.c.bf16 %v606_v44, %v605_v27  ;;  %v590_v29 = vld [vmem:[%s7566_s4 + $0x158] sm:$0xff] }
 0x1ed   :  { %4361 = vmatprep.subr.bf16.mxu1 %v5804_v62  ;;  %7694 = vst [vmem:[#allocation23_spill] sm:$0xff] %v5852_v6  ;;  %7696 = vst [vmem:[#allocation25_spill] sm:$0xff] %v5870_v7  ;;  %v557_v62 = vld [vmem:[%s7566_s4 + $0x50] sm:$0xff] }
 0x1ee   :  { %7698 = vst [vmem:[#allocation27_spill] sm:$0xff] %v5888_v1  ;;  %7699 = vst [vmem:[#allocation28_spill] sm:$0xff] %v5897_v17  ;;  %v5906_v34 = vpack.c.bf16 %v558_v63, %v557_v62  ;;  %v559_v62 = vld [vmem:[%s7566_s4 + $0x60] sm:$0xff]  ;;  %v608_v63 = vld [vmem:[%s7566_s4 + $0x1e8] sm:$0xff] }
 0x1ef   :  { %4395 = vmatpush3.bf16.msra.mxu0 %v5852_v6 }
 0x1f0   :  { %4363 = vmatpush3.bf16.msra.mxu1 %v5834_v42  ;;  %v575_v42 = vld [vmem:[%s7566_s4 + $0xe0] sm:$0xff]  ;;  %4397 = vmatprep.subr.bf16.mxu0 %v5861_v18  ;;  %7700 = vst [vmem:[#allocation29_spill] sm:$0xff] %v5906_v34 }
 0x1f1   :  { %4365 = vmatprep.subr.bf16.mxu1 %v5843_v50  ;;  %v589_v50 = vld [vmem:[%s7566_s4 + $0x150] sm:$0xff]  ;;  %v5909_v6 = vpack.c.bf16 %v576_v11, %v575_v42  ;;  %v560_v42 = vld [vmem:[%s7566_s4 + $0x68] sm:$0xff] }
 0x1f2   :  { %v5912_v27 = vpack.c.bf16 %v590_v29, %v589_v50  ;;  %v5924_v44 = vpack.c.bf16 %v560_v42, %v559_v62  ;;  %v607_v50 = vld [vmem:[%s7566_s4 + $0x1e0] sm:$0xff]  ;;  %v577_v11 = vld [vmem:[%s7566_s4 + $0xf0] sm:$0xff]  ;;  %v578_v62 = vld [vmem:[%s7566_s4 + $0xf8] sm:$0xff] }
 0x1f3   :  { %7701 = vst [vmem:[#allocation30_spill] sm:$0xff] %v5909_v6  ;;  %4399 = vmatpush3.bf16.msra.mxu0 %v5888_v1  ;;  %v5936_v29 = vpack.c.bf16 %v608_v63, %v607_v50  ;;  %v591_v42 = vld [vmem:[%s7566_s4 + $0x160] sm:$0xff]  ;;  %v561_v50 = vld [vmem:[%s7566_s4 + $0x70] sm:$0xff]  ;;  %v562_v63 = vld [vmem:[%s7566_s4 + $0x78] sm:$0xff] }
 0x1f4   :  { %4367 = vmatpush3.bf16.msra.mxu1 %v5870_v7  ;;  %7702 = vst [vmem:[#allocation31_spill] sm:$0xff] %v5912_v27  ;;  %4401 = vmatprep.subr.bf16.mxu0 %v5897_v17  ;;  %7703 = vst [vmem:[#allocation32_spill] sm:$0xff] %v5924_v44 }
 0x1f5   :  { %4369 = vmatprep.subr.bf16.mxu1 %v5879_v48  ;;  %7704 = vst [vmem:[#allocation33_spill] sm:$0xff] %v5936_v29 }
 0x1f7   :  { %4403 = vmatpush3.bf16.msra.mxu0 %v5912_v27 }
 0x1f8   :  { %4371 = vmatpush3.bf16.msra.mxu1 %v5906_v34  ;;  %v5947_v34 = vpack.c.bf16 %v578_v62, %v577_v11  ;;  %4405 = vmatprep.subr.bf16.mxu0 %v5936_v29  ;;  %v610_v11 = vld [vmem:[%s7566_s4 + $0x1f8] sm:$0xff] }
 0x1f9   :  { %4373 = vmatprep.subr.bf16.mxu1 %v5909_v6  ;;  %v592_v6 = vld [vmem:[%s7566_s4 + $0x168] sm:$0xff] }
 0x1fa   :  { %7705 = vst [vmem:[#allocation34_spill] sm:$0xff] %v5947_v34  ;;  %v5949_v27 = vpack.c.bf16 %v592_v6, %v591_v42  ;;  %v609_v6 = vld [vmem:[%s7566_s4 + $0x1f0] sm:$0xff] }
 0x1fb   :  { %v5969_v62 = vpack.c.bf16 %v610_v11, %v609_v6  ;;  %v593_v42 = vld [vmem:[%s7566_s4 + $0x170] sm:$0xff] }
 0x1fc   :  { %4375 = vmatpush3.bf16.msra.mxu1 %v5924_v44  ;;  %7706 = vst [vmem:[#allocation35_spill] sm:$0xff] %v5949_v27  ;;  %v5958_v44 = vpack.c.bf16 %v562_v63, %v561_v50  ;;  %4407 = vmatpush3.bf16.msra.mxu0 %v5949_v27  ;;  %v594_v50 = vld [vmem:[%s7566_s4 + $0x178] sm:$0xff]  ;;  %v611_v63 = vld [vmem:[%s7566_s4 + $0x200] sm:$0xff] }
 0x1fd   :  { %4377 = vmatprep.subr.bf16.mxu1 %v5947_v34  ;;  %7708 = vst [vmem:[#allocation37_spill] sm:$0xff] %v5969_v62  ;;  %v5980_v34 = vpack.c.bf16 %v594_v50, %v593_v42  ;;  %4409 = vmatprep.subr.bf16.mxu0 %v5969_v62 }
 0x1fe   :  { %7707 = vst [vmem:[#allocation36_spill] sm:$0xff] %v5958_v44 }
 0x1ff   :  { %7709 = vst [vmem:[#allocation38_spill] sm:$0xff] %v5980_v34 }
 0x200   :  { %4379 = vmatpush3.bf16.msra.mxu1 %v5958_v44  ;;  %v612_v44 = vld [vmem:[%s7566_s4 + $0x208] sm:$0xff]  ;;  %4411 = vmatpush3.bf16.msra.mxu0 %v5980_v34 }
 0x201   :  { %v5986_v6 = vpack.c.bf16 %v612_v44, %v611_v63 }
 0x203   :  { %7710 = vst [vmem:[#allocation39_spill] sm:$0xff] %v5986_v6  ;;  %4413 = vmatprep.subr.bf16.mxu1 %v5986_v6 }
 0x257   :  { %v470_v11 = vpop.permute.xlu1 %469  ;;  %v472_v27 = vpop.permute.xlu0 %471 }
 0x258   :  { %v478_v29 = vsel %vm74_vm1, 0.0, %v470_v11  ;;  %v479_v48 = vsel %vm74_vm1, 0.0, %v472_v27 }
 0x259   :  { %v481_v42 = vsel %vm78_vm2, %v478_v29, 0.0  ;;  %v482_v50 = vsel %vm78_vm2, %v479_v48, 0.0 }
 0x25a   :  { %v522_v17 = vrot.slane %v481_v42, 2  ;;  %v523_v7 = vrot.slane %v482_v50, 2  ;;  %492 = vrot.lane.b32.xlu0 %v481_v42, %s5202_s29  ;;  %494 = vrot.lane.b32.xlu1 %v482_v50, %s5202_s29  ;;  %v499_v44 = vrot.slane %v481_v42, 1  ;;  %v500_v63 = vrot.slane %v482_v50, 1 }
 0x25b   :  { %v474_v34 = vpop.permute.xlu1 %473 }
 0x25c   :  { %v480_v62 = vsel %vm74_vm1, 0.0, %v474_v34  ;;  %v501_v1 = vsel %vm97_vm3, %v499_v44, %v500_v63  ;;  %v524_v11 = vsel %vm121_vm4, %v522_v17, %v523_v7 }
 0x25d   :  { %v483_v27 = vsel %vm78_vm2, %v480_v62, 0.0  ;;  %v5064_v29 = vpack.i.bf16 %v524_v11, %v481_v42 }
 0x25e   :  { %v525_v18 = vrot.slane %v483_v27, 2  ;;  %504 = vrot.lane.b32.xlu1 %v501_v1, %s5203_s30  ;;  %v502_v36 = vrot.slane %v483_v27, 1 }
 0x25f   :  { %5065 = vrot.lane.b32.xlu0 %v5064_v29, %s5204_s16 }
 0x260   :  { %v526_v48 = vsel %vm121_vm4, %v523_v7, %v525_v18  ;;  %v503_v17 = vsel %vm97_vm3, %v500_v63, %v502_v36  ;;  %v614_v36 = vld [vmem:[%s7566_s4 + $0x218] sm:$0xff] }
 0x261   :  { %v5069_v34 = vpack.i.bf16 %v526_v48, %v482_v50 }
 0x262   :  { %510 = vrot.lane.b32.xlu1 %v501_v1, %s5205_s17 }
 0x263   :  { %516 = vrot.lane.b32.xlu0 %v501_v1, %s5206_s18  ;;  %v613_v1 = vld [vmem:[%s7566_s4 + $0x210] sm:$0xff] }
 0x266   :  { %5070 = vrot.lane.b32.xlu1 %v5069_v34, %s5204_s16  ;;  %v6019_v34 = vpack.c.bf16 %v614_v36, %v613_v1  ;;  %v618_v1 = vld [vmem:[%s7566_s4 + $0x238] sm:$0xff] }
 0x267   :  { %506 = vrot.lane.b32.xlu0 %v503_v17, %s5203_s30 }
 0x268   :  { %7711 = vst [vmem:[#allocation40_spill] sm:$0xff] %v6019_v34 }
 0x26a   :  { %518 = vrot.lane.b32.xlu1 %v503_v17, %s5206_s18 }
 0x26b   :  { %512 = vrot.lane.b32.xlu0 %v503_v17, %s5205_s17 }
 0x26e   :  { %537 = vrot.lane.b32.xlu1 %v526_v48, %s5202_s29 }
 0x26f   :  { %535 = vrot.lane.b32.xlu0 %v524_v11, %s5202_s29 }
 0x2cc   :  { %v495_v18 = vpop.permute.xlu1 %494  ;;  %v493_v7 = vpop.permute.xlu0 %492 }
 0x2d0   :  { %v505_v62 = vpop.permute.xlu1 %504 }
 0x2d1   :  { %v5066_v44 = vpop.permute.xlu0 %5065  ;;  %v541_v63 = vsel %vm139_vm5, %v493_v7, %v505_v62  ;;  %v617_v62 = vld [vmem:[%s7566_s4 + $0x230] sm:$0xff]  ;;  %s7834_s4 = smov 92  }
 0x2d2   :  { %v5068_v27 = vunpack.i.h.bf16 %v5066_v44  ;;  %v5067_v29 = vunpack.i.l.bf16 %v5066_v44  ;;  %694 = vmatprep.mubr.f32.mxu1 %v541_v63  ;;  %v6045_v44 = vpack.c.bf16 %v618_v1, %v617_v62  ;;  %v973_v1 = vld [vmem:[%s7568_s6 + $0x118] sm:$0xff] }
 0x2d4   :  { %v511_v17 = vpop.permute.xlu1 %510  ;;  %v539_v51 = vsel %vm139_vm5, %v481_v42, %v5067_v29  ;;  %v545_v22 = vsel %vm139_vm5, %v524_v11, %v5068_v27  ;;  %v6032_v42 = vpack.c.bf16 %v616_v60, %v615_v39  ;;  %7713 = vst [vmem:[#allocation42_spill] sm:$0xff] %v6045_v44 }
 0x2d5   :  { %v517_v16 = vpop.permute.xlu0 %516  ;;  %695 = vmatmul.mubr.f32.vlgmr.msra.gmra.mrb[4].mxu1 %v539_v51  ;;  %769 = vmatprep.mubr.f32.mxu0 %v545_v22 }
 0x2d6   :  { %v543_v7 = vsel %vm139_vm5, %v511_v17, %v517_v16  ;;  %4415 = vmatpush3.bf16.msra.mxu1 %v5986_v6  ;;  %7712 = vst [vmem:[#allocation41_spill] sm:$0xff] %v6032_v42  ;;  %v971_v17 = vld [vmem:[%s7568_s6 + $0x108] sm:$0xff]  ;;  %v1167_v6 = vld [vmem:[%s7569_s7 + $0x10] sm:$0xff] }
 0x2d7   :  { %770 = vmatmul.mubr.f32.vlgmr.msra.gmra.mrb[6].mxu0 %v543_v7  ;;  %4417 = vmatprep.subr.bf16.mxu1 %v6019_v34  ;;  %v972_v7 = vld [vmem:[%s7568_s6 + $0x110] sm:$0xff] }
 0x2d8   :  { %v5071_v11 = vpop.permute.xlu1 %5070 }
 0x2d9   :  { %v5073_v51 = vunpack.i.h.bf16 %v5071_v11  ;;  %v5072_v22 = vunpack.i.l.bf16 %v5071_v11  ;;  %v507_v36 = vpop.permute.xlu0 %506  ;;  %v7603_v11 = vmov 0.0|0.0  }
 0x2da   :  { %4419 = vmatpush3.bf16.msra.mxu1 %v6019_v34  ;;  %v542_v16 = vsel %vm139_vm5, %v495_v18, %v507_v36  ;;  %v938_v36 = vld [vmem:[%s7568_s6] sm:$0xff] }
 0x2db   :  { %699 = vmatprep.mubr.f32.mxu1 %v542_v16  ;;  %v540_v39 = vsel %vm139_vm5, %v482_v50, %v5072_v22  ;;  %v546_v60 = vsel %vm139_vm5, %v526_v48, %v5073_v51  ;;  %4421 = vmatprep.subr.bf16.mxu1 %v6032_v42  ;;  %v970_v48 = vld [vmem:[%s7568_s6 + $0x100] sm:$0xff]  ;;  %v955_v22 = vld [vmem:[%s7568_s6 + $0x88] sm:$0xff]  ;;  %v6078_v16 = vpack.c.bf16 %v973_v1, %v972_v7  ;;  %v941_v7 = vld [vmem:[%s7568_s6 + $0x18] sm:$0xff] }
 0x2dc   :  { %v519_v63 = vpop.permute.xlu1 %518  ;;  %700 = vmatmul.mubr.f32.gmra.mrb[6].mxu1 %v540_v39  ;;  %774 = vmatprep.mubr.f32.mxu0 %v546_v60  ;;  %v6063_v62 = vpack.c.bf16 %v971_v17, %v970_v48  ;;  %v954_v51 = vld [vmem:[%s7568_s6 + $0x80] sm:$0xff]  ;;  %v975_v60 = vld [vmem:[%s7568_s6 + $0x128] sm:$0xff]  ;;  %v940_v48 = vld [vmem:[%s7568_s6 + $0x10] sm:$0xff] }
 0x2dd   :  { %v513_v27 = vpop.permute.xlu0 %512  ;;  %7715 = vst [vmem:[#allocation44_spill] sm:$0xff] %v6078_v16  ;;  %v974_v39 = vld [vmem:[%s7568_s6 + $0x120] sm:$0xff]  ;;  %v6110_v1 = vpack.c.bf16 %v941_v7, %v940_v48  ;;  %v943_v48 = vld [vmem:[%s7568_s6 + $0x28] sm:$0xff]  ;;  %v961_v7 = vld [vmem:[%s7568_s6 + $0xb8] sm:$0xff] }
 0x2de   :  { %4423 = vmatpush3.bf16.msra.mxu1 %v6032_v42  ;;  %v544_v29 = vsel %vm139_vm5, %v513_v27, %v519_v63  ;;  %7714 = vst [vmem:[#allocation43_spill] sm:$0xff] %v6063_v62  ;;  %v6086_v63 = vpack.c.bf16 %v955_v22, %v954_v51  ;;  %v939_v27 = vld [vmem:[%s7568_s6 + $0x8] sm:$0xff]  ;;  %v958_v51 = vld [vmem:[%s7568_s6 + $0xa0] sm:$0xff] }
 0x2df   :  { %775 = vmatmul.mubr.f32.gmra.mrb[8].mxu0 %v544_v29  ;;  %4425 = vmatprep.subr.bf16.mxu1 %v6045_v44  ;;  %v6092_v29 = vpack.c.bf16 %v939_v27, %v938_v36  ;;  %7719 = vst [vmem:[#allocation48_spill] sm:$0xff] %v6110_v1  ;;  %v959_v22 = vld [vmem:[%s7568_s6 + $0xa8] sm:$0xff]  ;;  %v6119_v36 = vpack.c.bf16 %v975_v60, %v974_v39  ;;  %v976_v27 = vld [vmem:[%s7568_s6 + $0x130] sm:$0xff]  ;;  %v977_v39 = vld [vmem:[%s7568_s6 + $0x138] sm:$0xff] }
 0x2e0   :  { %v538_v50 = vpop.permute.xlu1 %537  ;;  %7716 = vst [vmem:[#allocation45_spill] sm:$0xff] %v6086_v63  ;;  %4429 = vmatprep.subr.bf16.mxu0 %v6086_v63  ;;  %v960_v60 = vld [vmem:[%s7568_s6 + $0xb0] sm:$0xff]  ;;  %v1170_v63 = vld [vmem:[%s7569_s7 + $0x28] sm:$0xff] }
 0x2e1   :  { %v536_v18 = vpop.permute.xlu0 %535  ;;  %7717 = vst [vmem:[#allocation46_spill] sm:$0xff] %v6092_v29  ;;  %4431 = vmatpush3.bf16.msra.mxu0 %v6092_v29  ;;  %7720 = vst [vmem:[#allocation49_spill] sm:$0xff] %v6119_v36 }
 0x2e2   :  { %4427 = vmatpush3.bf16.msra.mxu1 %v6045_v44  ;;  %4126 = vmatprep.mubr.msk.f32.mxu1 %vm139_vm5, %v536_v18  ;;  %v956_v18 = vld [vmem:[%s7568_s6 + $0x90] sm:$0xff] }
 0x2e3   :  { %4460 = vmatprep.subr.bf16.mxu1 %v7603_v11  ;;  %v980_v44 = vld [vmem:[%s7568_s6 + $0x150] sm:$0xff] }
 0x2e5   :  { %4127 = vmatmul.mubr.msk.f32.vlgmr.msra.gmra.mrb[8].mxu1 %vm139_vm5, %v538_v50  ;;  %v957_v50 = vld [vmem:[%s7568_s6 + $0x98] sm:$0xff] }
 0x2e6   :  { %4462 = vmatpush1.bf16.msra.mxu1 %v6063_v62  ;;  %v6104_v17 = vpack.c.bf16 %v957_v50, %v956_v18  ;;  %v6125_v18 = vpack.c.bf16 %v959_v22, %v958_v51  ;;  %v942_v50 = vld [vmem:[%s7568_s6 + $0x20] sm:$0xff]  ;;  %v6147_v22 = vpack.c.bf16 %v977_v39, %v976_v27  ;;  %v944_v62 = vld [vmem:[%s7568_s6 + $0x30] sm:$0xff]  ;;  %v979_v27 = vld [vmem:[%s7568_s6 + $0x148] sm:$0xff] }
 0x2e7   :  { %4463 = vmatprep.subr.bf16.mxu1 %v7603_v11  ;;  %v6144_v51 = vpack.c.bf16 %v943_v48, %v942_v50  ;;  %v945_v50 = vld [vmem:[%s7568_s6 + $0x38] sm:$0xff]  ;;  %v7725_v48 = vmov 0.0|0.0   ;;  %v962_v39 = vld [vmem:[%s7568_s6 + $0xc0] sm:$0xff] }
 0x2e8   :  { %7718 = vst [vmem:[#allocation47_spill] sm:$0xff] %v6104_v17  ;;  %4433 = vmatprep.subr.bf16.mxu0 %v6104_v17  ;;  %7721 = vst [vmem:[#allocation50_spill] sm:$0xff] %v6125_v18 }
 0x2e9   :  { %4435 = vmatpush3.bf16.msra.mxu0 %v6110_v1  ;;  %7722 = vst [vmem:[#allocation51_spill] sm:$0xff] %v6144_v51  ;;  %7723 = vst [vmem:[#allocation52_spill] sm:$0xff] %v6147_v22  ;;  %v946_v1 = vld [vmem:[%s7568_s6 + $0x40] sm:$0xff] }
 0x2ea   :  { %4465 = vmatpush1.bf16.msra.mxu1 %v6078_v16  ;;  %4437 = vmatprep.subr.bf16.mxu0 %v6125_v18  ;;  %v6153_v16 = vpack.c.bf16 %v961_v7, %v960_v60  ;;  %v963_v60 = vld [vmem:[%s7568_s6 + $0xc8] sm:$0xff]  ;;  %v6172_v7 = vpack.c.bf16 %v945_v50, %v944_v62  ;;  %v964_v50 = vld [vmem:[%s7568_s6 + $0xd0] sm:$0xff] }
 0x2eb   :  { %4466 = vmatprep.subr.bf16.mxu1 %v7603_v11  ;;  %v978_v11 = vld [vmem:[%s7568_s6 + $0x140] sm:$0xff]  ;;  %v6181_v18 = vpack.c.bf16 %v963_v60, %v962_v39  ;;  %v947_v62 = vld [vmem:[%s7568_s6 + $0x48] sm:$0xff] }
 0x2ec   :  { %7724 = vst [vmem:[#allocation53_spill] sm:$0xff] %v6153_v16  ;;  %7726 = vst [vmem:[#allocation54_spill] sm:$0xff] %v6172_v7  ;;  %v6200_v39 = vpack.c.bf16 %v947_v62, %v946_v1  ;;  %v982_v1 = vld [vmem:[%s7568_s6 + $0x160] sm:$0xff] }
 0x2ed   :  { %4439 = vmatpush3.bf16.msra.mxu0 %v6144_v51  ;;  %7728 = vst [vmem:[#allocation56_spill] sm:$0xff] %v6181_v18  ;;  %v949_v51 = vld [vmem:[%s7568_s6 + $0x58] sm:$0xff] }
 0x2ee   :  { %4468 = vmatpush1.bf16.msra.mxu1 %v6119_v36  ;;  %v6175_v36 = vpack.c.bf16 %v979_v27, %v978_v11  ;;  %4441 = vmatprep.subr.bf16.mxu0 %v6153_v16  ;;  %v981_v11 = vld [vmem:[%s7568_s6 + $0x158] sm:$0xff]  ;;  %7729 = vst [vmem:[#allocation57_spill] sm:$0xff] %v6200_v39  ;;  %v948_v16 = vld [vmem:[%s7568_s6 + $0x50] sm:$0xff] }
 0x2ef   :  { %4469 = vmatprep.subr.bf16.mxu1 %v7725_v48  ;;  %v965_v27 = vld [vmem:[%s7568_s6 + $0xd8] sm:$0xff]  ;;  %v6203_v60 = vpack.c.bf16 %v981_v11, %v980_v44  ;;  %v983_v44 = vld [vmem:[%s7568_s6 + $0x168] sm:$0xff]  ;;  %v6222_v62 = vpack.c.bf16 %v949_v51, %v948_v16  ;;  %v986_v51 = vld [vmem:[%s7568_s6 + $0x180] sm:$0xff] }
 0x2f0   :  { %7727 = vst [vmem:[#allocation55_spill] sm:$0xff] %v6175_v36  ;;  %v6225_v11 = vpack.c.bf16 %v983_v44, %v982_v1  ;;  %v987_v1 = vld [vmem:[%s7568_s6 + $0x188] sm:$0xff] }
 0x2f1   :  { %4443 = vmatpush3.bf16.msra.mxu0 %v6172_v7  ;;  %7730 = vst [vmem:[#allocation58_spill] sm:$0xff] %v6203_v60  ;;  %7732 = vst [vmem:[#allocation60_spill] sm:$0xff] %v6222_v62  ;;  %v6247_v44 = vpack.c.bf16 %v987_v1, %v986_v51 }
 0x2f2   :  { %4471 = vmatpush1.bf16.msra.mxu1 %v6147_v22  ;;  %4445 = vmatprep.subr.bf16.mxu0 %v6181_v18  ;;  %v6206_v22 = vpack.c.bf16 %v965_v27, %v964_v50  ;;  %7733 = vst [vmem:[#allocation61_spill] sm:$0xff] %v6225_v11  ;;  %v984_v50 = vld [vmem:[%s7568_s6 + $0x170] sm:$0xff]  ;;  %v985_v27 = vld [vmem:[%s7568_s6 + $0x178] sm:$0xff]  ;;  %v967_v18 = vld [vmem:[%s7568_s6 + $0xe8] sm:$0xff] }
 0x2f3   :  { %4472 = vmatprep.subr.bf16.mxu1 %v7725_v48  ;;  %v6237_v16 = vpack.c.bf16 %v985_v27, %v984_v50  ;;  %7735 = vst [vmem:[#allocation63_spill] sm:$0xff] %v6247_v44  ;;  %v3478_v27 = vld [vmem:[%s7567_s5] ss:$0 sm:$0xff] }
 0x2f4   :  { %7731 = vst [vmem:[#allocation59_spill] sm:$0xff] %v6206_v22 }
 0x2f5   :  { %4447 = vmatpush3.bf16.msra.mxu0 %v6200_v39  ;;  %7734 = vst [vmem:[#allocation62_spill] sm:$0xff] %v6237_v16 }
 0x2f6   :  { %4474 = vmatpush1.bf16.msra.mxu1 %v6175_v36  ;;  %4449 = vmatprep.subr.bf16.mxu0 %v6206_v22 }
 0x2f7   :  { %4475 = vmatprep.subr.bf16.mxu1 %v7725_v48 }
 0x2f9   :  { %4451 = vmatpush3.bf16.msra.mxu0 %v6222_v62 }
 0x2fa   :  { %4477 = vmatpush1.bf16.msra.mxu1 %v6203_v60 }
 0x2fb   :  { %4478 = vmatprep.subr.bf16.mxu1 %v7725_v48 }
 0x2fe   :  { %4480 = vmatpush1.bf16.msra.mxu1 %v6225_v11 }
 0x2ff   :  { %4481 = vmatprep.subr.bf16.mxu1 %v7725_v48 }
 0x302   :  { %4483 = vmatpush1.bf16.msra.mxu1 %v6237_v16 }
 0x303   :  { %4484 = vmatprep.subr.bf16.mxu1 %v7725_v48 }
 0x306   :  { %4486 = vmatpush1.bf16.msra.mxu1 %v6247_v44  ;;  %v966_v44 = vld [vmem:[%s7568_s6 + $0xe0] sm:$0xff] }
 0x307   :  { %4487 = vmatprep.subr.bf16.mxu1 %v7725_v48  ;;  %v6261_v42 = vpack.c.bf16 %v967_v18, %v966_v44  ;;  %v989_v18 = vld [vmem:[%s7568_s6 + $0x198] sm:$0xff] }
 0x309   :  { %7736 = vst [vmem:[#allocation64_spill] sm:$0xff] %v6261_v42  ;;  %4453 = vmatprep.subr.bf16.mxu0 %v6261_v42 }
 0x3a8   :  { %v3631_v50 = vpop.f32.mrb[4].mxu1 }
 0x3a9   :  { %v3632_v11 = vpop.f32.mrb[5].mxu1 }
 0x3aa   :  { %v3633_v60 = vadd.f32 %v3632_v11, %v3631_v50  ;;  %v3669_v36 = vpop.f32.mrb[6].mxu0  ;;  %v950_v11 = vld [vmem:[%s7568_s6 + $0x60] sm:$0xff] }
 0x3ab   :  { %v3670_v62 = vpop.f32.mrb[7].mxu0 }
 0x3ac   :  { %v697_v22 = vadd.f32 %v3633_v60, %v3478_v27  ;;  %v3671_v39 = vadd.f32 %v3670_v62, %v3669_v36  ;;  %v951_v36 = vld [vmem:[%s7568_s6 + $0x68] sm:$0xff] }
 0x3ad   :  { %v6272_v60 = vpack.c.bf16 %v951_v36, %v950_v11  ;;  %v969_v11 = vld [vmem:[%s7568_s6 + $0xf8] sm:$0xff] }
 0x3ae   :  { %v772_v16 = vadd.f32 %v3671_v39, %v697_v22  ;;  %v988_v22 = vld [vmem:[%s7568_s6 + $0x190] sm:$0xff] }
 0x3af   :  { %v3634_v51 = vpop.f32.mrb[6].mxu1  ;;  %7737 = vst [vmem:[#allocation65_spill] sm:$0xff] %v6272_v60  ;;  %v6278_v50 = vpack.c.bf16 %v989_v18, %v988_v22  ;;  %4455 = vmatpush3.bf16.msra.mxu0 %v6272_v60  ;;  %v990_v22 = vld [vmem:[%s7568_s6 + $0x1a0] sm:$0xff] }
 0x3b0   :  { %v3635_v1 = vpop.f32.mrb[7].mxu1 }
 0x3b1   :  { %v3636_v7 = vadd.f32 %v3635_v1, %v3634_v51  ;;  %7738 = vst [vmem:[#allocation66_spill] sm:$0xff] %v6278_v50  ;;  %v968_v1 = vld [vmem:[%s7568_s6 + $0xf0] sm:$0xff]  ;;  %4489 = vmatpush1.bf16.msra.mxu1 %v6278_v50  ;;  %v1181_v50 = vld [vmem:[%s7569_s7 + $0x80] sm:$0xff] }
 0x3b2   :  { %v3672_v39 = vpop.f32.mrb[8].mxu0  ;;  %v6288_v36 = vpack.c.bf16 %v969_v11, %v968_v1  ;;  %4490 = vmatprep.subr.bf16.mxu1 %v7725_v48 }
 0x3b3   :  { %v702_v62 = vadd.f32 %v3636_v7, %v3478_v27  ;;  %v3673_v44 = vpop.f32.mrb[9].mxu0  ;;  %v952_v7 = vld [vmem:[%s7568_s6 + $0x70] sm:$0xff]  ;;  %v953_v27 = vld [vmem:[%s7568_s6 + $0x78] sm:$0xff] }
 0x3b4   :  { %v3674_v51 = vadd.f32 %v3673_v44, %v3672_v39  ;;  %7739 = vst [vmem:[#allocation67_spill] sm:$0xff] %v6288_v36  ;;  %v6300_v18 = vpack.c.bf16 %v953_v27, %v952_v7  ;;  %v991_v44 = vld [vmem:[%s7568_s6 + $0x1a8] sm:$0xff]  ;;  %4457 = vmatprep.subr.bf16.mxu0 %v6288_v36 }
 0x3b5   :  { %v6306_v1 = vpack.c.bf16 %v991_v44, %v990_v22  ;;  %v992_v22 = vld [vmem:[%s7568_s6 + $0x1b0] sm:$0xff]  ;;  %v993_v44 = vld [vmem:[%s7568_s6 + $0x1b8] sm:$0xff] }
 0x3b6   :  { %v777_v39 = vadd.f32 %v3674_v51, %v702_v62  ;;  %7740 = vst [vmem:[#allocation68_spill] sm:$0xff] %v6300_v18  ;;  %4459 = vmatpush3.bf16.msra.mxu0 %v6300_v18  ;;  %v1182_v62 = vld [vmem:[%s7569_s7 + $0x88] sm:$0xff]  ;;  %v6325_v36 = vpack.c.bf16 %v993_v44, %v992_v22 }
 0x3b7   :  { %7741 = vst [vmem:[#allocation69_spill] sm:$0xff] %v6306_v1  ;;  %4492 = vmatpush1.bf16.msra.mxu1 %v6306_v1  ;;  %v6316_v27 = vpack.c.bf16 %v1182_v62, %v1181_v50  ;;  %v5171_v50 = vld [vmem:[%s7562_s0] sm:$0xff] }
 0x3b8   :  { %v4128_v11 = vpop.f32.mrb[8].mxu1  ;;  %4493 = vmatprep.subr.bf16.mxu1 %v7725_v48  ;;  %7743 = vst [vmem:[#allocation71_spill] sm:$0xff] %v6325_v36 }
 0x3b9   :  { %v852_v51 = vadd.f32 %v4128_v11, %v777_v39  ;;  %v846_v7 = vpop.f32.mrb[9].mxu1  ;;  %7742 = vst [vmem:[#allocation70_spill] sm:$0xff] %v6316_v27  ;;  %v5170_v39 = vld [vmem:[%s7562_s0 + $0x8] sm:$0xff]  ;;  %4506 = vmatprep.subr.bf16.mxu0 %v6316_v27  ;;  %v7635_v27 = vmov 0.0  }
 0x3ba   :  { %v847_v18 = vadd.f32 %v846_v7, %v772_v16  ;;  %v3486_v7 = vld [vmem:[%s7562_s0 + $0x10] sm:$0xff] }
 0x3bb   :  { %v856_v11 = vadd.f32 %v5170_v39, %v852_v51  ;;  %4495 = vmatpush1.bf16.msra.mxu1 %v6325_v36  ;;  %v994_v51 = vld [vmem:[%s7568_s6 + $0x1c0] sm:$0xff] }
 0x3bc   :  { %v855_v62 = vadd.f32 %v5171_v50, %v847_v18  ;;  %4496 = vmatprep.subr.bf16.mxu1 %v7725_v48  ;;  %v995_v18 = vld [vmem:[%s7568_s6 + $0x1c8] sm:$0xff]  ;;  %v3487_v50 = vld [vmem:[%s7562_s0 + $0x18] sm:$0xff]  ;;  %v998_v36 = vld [vmem:[%s7568_s6 + $0x1e0] sm:$0xff] }
 0x3bd   :  { %v6334_v1 = vmax.f32 %v856_v11, 0.0  ;;  %v6352_v44 = vpack.c.bf16 %v995_v18, %v994_v51  ;;  %v1424_v11 = vrot.slane %v3486_v7, 7  ;;  %v996_v51 = vld [vmem:[%s7568_s6 + $0x1d0] sm:$0xff]  ;;  %v997_v18 = vld [vmem:[%s7568_s6 + $0x1d8] sm:$0xff] }
 0x3be   :  { %v6337_v16 = vmax.f32 %v855_v62, 0.0  ;;  %v6371_v7 = vpack.c.bf16 %v997_v18, %v996_v51  ;;  %v999_v51 = vld [vmem:[%s7568_s6 + $0x1e8] sm:$0xff] }
 0x3bf   :  { %v6350_v22 = vrot.slane %v6334_v1, 1  ;;  %7744 = vst [vmem:[#allocation72_spill] sm:$0xff] %v6352_v44  ;;  %4498 = vmatpush1.bf16.msra.mxu1 %v6352_v44  ;;  %v1429_v44 = vsel %vm55_vm0, 0.0, %v1424_v11  ;;  %v6385_v18 = vpack.c.bf16 %v999_v51, %v998_v36 }
 0x3c0   :  { %867 = vrot.lane.b32.xlu0 %v6337_v16, %s7663_s24  ;;  %v873_v39 = vrot.slane %v6337_v16, 1  ;;  %4499 = vmatprep.subr.bf16.mxu1 %v7725_v48  ;;  %7745 = vst [vmem:[#allocation73_spill] sm:$0xff] %v6371_v7  ;;  %v894_v36 = vrot.slane %v6337_v16, 2 }
 0x3c1   :  { %7746 = vst [vmem:[#allocation74_spill] sm:$0xff] %v6385_v18 }
 0x3c2   :  { %v875_v62 = vsel %vm97_vm3, %v873_v39, %v6350_v22  ;;  %v1425_v39 = vrot.slane %v3487_v50, 7 }
 0x3c3   :  { %876 = vrot.lane.b32.xlu1 %v875_v62, %s7641_s20  ;;  %4501 = vmatpush1.bf16.msra.mxu1 %v6371_v7  ;;  %v1000_v7 = vld [vmem:[%s7568_s6 + $0x1f0] sm:$0xff] }
 0x3c4   :  { %861 = vrot.lane.b32.xlu0 %v6337_v16, %s7637_s21  ;;  %4502 = vmatprep.subr.bf16.mxu1 %v7725_v48  ;;  %v1426_v50 = vsel %vm55_vm0, %v1424_v11, %v1425_v39 }
 0x3c7   :  { %882 = vrot.lane.b32.xlu1 %v875_v62, %s7639_s27  ;;  %4504 = vmatpush1.bf16.msra.mxu1 %v6385_v18 }
 0x3c8   :  { %1433 = vrot.lane.b32.xlu0 %v1429_v44, %s7665_s22  ;;  %1150 = vmatprep.subr.mxu1 %v7635_v27  ;;  %v6399_v44 = vrot.slane %v6334_v1, 2  ;;  %v1165_v27 = vld [vmem:[%s7569_s7] sm:$0xff] }
 0x3ca   :  { %v896_v11 = vsel %vm121_vm4, %v894_v36, %v6399_v44 }
 0x3cb   :  { %1435 = vrot.lane.b32.xlu1 %v1426_v50, %s7665_s22  ;;  %1151 = vmatpush1.msra.mxu1 %v1000_v7  ;;  %v1430_v7 = vsel %vm55_vm0, %v1425_v39, 0.0  ;;  %v1183_v39 = vld [vmem:[%s7569_s7 + $0x90] sm:$0xff] }
 0x3cc   :  { %869 = vrot.lane.b32.xlu0 %v6334_v1, %s7663_s24  ;;  %4537 = vmatprep.subr.bf16.mxu1 %v7725_v48  ;;  %s7831_s24 = smov 104  }
 0x3cf   :  { %878 = vrot.lane.b32.xlu1 %v6350_v22, %s7641_s20 }
 0x3d0   :  { %863 = vrot.lane.b32.xlu0 %v6334_v1, %s7637_s21 }
 0x3d3   :  { %903 = vrot.lane.b32.xlu1 %v896_v11, %s7665_s22 }
 0x3d4   :  { %897 = vrot.lane.b32.xlu0 %v896_v11, %s5213_s19 }
 0x3d7   :  { %909 = vrot.lane.b32.xlu1 %v896_v11, %s5206_s18  ;;  %v1184_v11 = vld [vmem:[%s7569_s7 + $0x98] sm:$0xff] }
 0x3d8   :  { %888 = vrot.lane.b32.xlu0 %v875_v62, %s5214_s2  ;;  %v1166_v62 = vld [vmem:[%s7569_s7 + $0x8] sm:$0xff]  ;;  %v6439_v34 = vpack.c.bf16 %v1184_v11, %v1183_v39 }
 0x3d9   :  { %v6433_v42 = vpack.c.bf16 %v1166_v62, %v1165_v27 }
 0x3da   :  { %7748 = vst [vmem:[#allocation76_spill] sm:$0xff] %v6439_v34 }
 0x3db   :  { %884 = vrot.lane.b32.xlu1 %v6350_v22, %s7639_s27  ;;  %7747 = vst [vmem:[#allocation75_spill] sm:$0xff] %v6433_v42  ;;  %s7796_s27 = smov 4  }
 0x3dc   :  { %1437 = vrot.lane.b32.xlu0 %v1430_v7, %s7665_s22 }
 0x432   :  { %v868_v51 = vpop.permute.xlu0 %867 }
 0x435   :  { %v877_v50 = vpop.permute.xlu1 %876 }
 0x436   :  { %v862_v36 = vpop.permute.xlu0 %861  ;;  %v922_v18 = vsel %vm921_vm7, %v868_v51, %v877_v50 }
 0x437   :  { %v916_v7 = vsel %vm915_vm6, %v6337_v16, %v862_v36  ;;  %v1168_v16 = vld [vmem:[%s7569_s7 + $0x18] sm:$0xff]  ;;  %v1186_v36 = vld [vmem:[%s7569_s7 + $0xa8] sm:$0xff] }
 0x438   :  { %v6448_v50 = vsel %vm918_vm9, %v916_v7, %v868_v51  ;;  %v6465_v51 = vpack.c.bf16 %v1168_v16, %v1167_v6  ;;  %v1187_v16 = vld [vmem:[%s7569_s7 + $0xb0] sm:$0xff] }
 0x439   :  { %v6431_v60 = vpop.permute.xlu1 %882 }
 0x43a   :  { %v1434_v17 = vpop.permute.xlu0 %1433  ;;  %v6437_v29 = vsel %vm924_vm8, %v922_v18, %v6431_v60  ;;  %v1185_v18 = vld [vmem:[%s7569_s7 + $0xa0] sm:$0xff]  ;;  %7749 = vst [vmem:[#allocation77_spill] sm:$0xff] %v6465_v51 }
 0x43b   :  { %v1442_v27 = vsel %vm74_vm1, 0.0, %v1434_v17  ;;  %1079 = vmatprep.mubr.f32.mxu0 %v6437_v29  ;;  %v6471_v7 = vpack.c.bf16 %v1186_v36, %v1185_v18  ;;  %v1188_v18 = vld [vmem:[%s7569_s7 + $0xb8] sm:$0xff] }
 0x43c   :  { %v6459_v62 = vsel %vm78_vm2, %v1442_v27, 0.0  ;;  %1080 = vmatmul.mubr.f32.vlgmr.msra.gmra.mrb[10].mxu0 %v6448_v50  ;;  %v6501_v25 = vpack.c.bf16 %v1188_v18, %v1187_v16  ;;  %v1173_v18 = vld [vmem:[%s7569_s7 + $0x40] sm:$0xff] }
 0x43d   :  { %4508 = vmatpush3.bf16.msra.mxu0 %v6433_v42  ;;  %1456 = vrot.lane.b32.xlu1 %v6459_v62, %s5202_s29  ;;  %v1436_v17 = vpop.permute.xlu1 %1435  ;;  %7750 = vst [vmem:[#allocation78_spill] sm:$0xff] %v6471_v7  ;;  %v1463_v27 = vrot.slane %v6459_v62, 1  ;;  %v1169_v42 = vld [vmem:[%s7569_s7 + $0x20] sm:$0xff]  ;;  %v1486_v57 = vrot.slane %v6459_v62, 2 }
 0x43e   :  { %v1443_v39 = vsel %vm74_vm1, 0.0, %v1436_v17  ;;  %v6468_v11 = vpop.permute.xlu0 %869  ;;  %4510 = vmatprep.subr.bf16.mxu0 %v6439_v34  ;;  %v6493_v34 = vpack.c.bf16 %v1170_v63, %v1169_v42  ;;  %7752 = vst [vmem:[#allocation80_spill] sm:$0xff] %v6501_v25  ;;  %v1189_v42 = vld [vmem:[%s7569_s7 + $0xc0] sm:$0xff]  ;;  %v1190_v63 = vld [vmem:[%s7569_s7 + $0xc8] sm:$0xff] }
 0x43f   :  { %v6481_v6 = vsel %vm78_vm2, %v1443_v39, 0.0 }
 0x440   :  { %v7659_v36 = vrot.slane %v6481_v6, 1  ;;  %7751 = vst [vmem:[#allocation79_spill] sm:$0xff] %v6493_v34 }
 0x441   :  { %4512 = vmatpush3.bf16.msra.mxu0 %v6465_v51  ;;  %1450 = vrot.lane.b32.xlu1 %v6459_v62, %s5204_s16  ;;  %v879_v17 = vpop.permute.xlu1 %878  ;;  %v1171_v51 = vld [vmem:[%s7569_s7 + $0x30] sm:$0xff] }
 0x442   :  { %v864_v39 = vpop.permute.xlu0 %863  ;;  %4514 = vmatprep.subr.bf16.mxu0 %v6471_v7  ;;  %v6499_v35 = vsel %vm97_vm3, %v1463_v27, %v7659_v36  ;;  %v6520_v16 = vpack.c.bf16 %v1172_v2, %v1171_v51  ;;  %v6526_v7 = vpack.c.bf16 %v1190_v63, %v1189_v42  ;;  %v1192_v2 = vld [vmem:[%s7569_s7 + $0xd8] sm:$0xff]  ;;  %v1197_v51 = vld [vmem:[%s7569_s7 + $0x100] sm:$0xff]  ;;  %v1198_v42 = vld [vmem:[%s7569_s7 + $0x108] sm:$0xff] }
 0x443   :  { %1468 = vrot.lane.b32.xlu0 %v6499_v35, %s5203_s30  ;;  %v6551_v46 = vpack.c.bf16 %v1192_v2, %v1191_v56  ;;  %v1193_v56 = vld [vmem:[%s7569_s7 + $0xe0] sm:$0xff]  ;;  %v1199_v2 = vld [vmem:[%s7569_s7 + $0x110] sm:$0xff] }
 0x444   :  { %7753 = vst [vmem:[#allocation81_spill] sm:$0xff] %v6520_v16  ;;  %7754 = vst [vmem:[#allocation82_spill] sm:$0xff] %v6526_v7 }
 0x445   :  { %4516 = vmatpush3.bf16.msra.mxu0 %v6493_v34  ;;  %905 = vrot.lane.b32.xlu1 %v6399_v44, %s7665_s22  ;;  %v904_v27 = vpop.permute.xlu1 %903  ;;  %v1174_v34 = vld [vmem:[%s7569_s7 + $0x48] sm:$0xff]  ;;  %s5219_s22 = smov 44  }
 0x446   :  { %v898_v36 = vpop.permute.xlu0 %897  ;;  %4518 = vmatprep.subr.bf16.mxu0 %v6501_v25  ;;  %v6549_v12 = vpack.c.bf16 %v1174_v34, %v1173_v18  ;;  %v1176_v34 = vld [vmem:[%s7569_s7 + $0x58] sm:$0xff]  ;;  %v6571_v18 = vpack.c.bf16 %v1198_v42, %v1197_v51  ;;  %v917_v51 = vsel %vm915_vm6, %v6334_v1, %v864_v39  ;;  %v1177_v39 = vld [vmem:[%s7569_s7 + $0x60] sm:$0xff] }
 0x447   :  { %899 = vrot.lane.b32.xlu0 %v6399_v44, %s5213_s19  ;;  %v934_v63 = vsel %vm933_vm10, %v898_v36, %v904_v27 }
 0x448   :  { %7755 = vst [vmem:[#allocation83_spill] sm:$0xff] %v6571_v18 }
 0x449   :  { %4520 = vmatpush3.bf16.msra.mxu0 %v6520_v16  ;;  %911 = vrot.lane.b32.xlu1 %v6399_v44, %s5206_s18  ;;  %v910_v25 = vpop.permute.xlu1 %909  ;;  %v1194_v44 = vld [vmem:[%s7569_s7 + $0xe8] sm:$0xff] }
 0x44a   :  { %v6559_v27 = vsel %vm139_vm5, %v934_v63, %v910_v25  ;;  %v889_v16 = vpop.permute.xlu0 %888  ;;  %4522 = vmatprep.subr.bf16.mxu0 %v6526_v7  ;;  %v1200_v63 = vld [vmem:[%s7569_s7 + $0x118] sm:$0xff]  ;;  %v6598_v47 = vpack.c.bf16 %v1194_v44, %v1193_v56 }
 0x44b   :  { %v928_v25 = vsel %vm927_vm11, %v6431_v60, %v889_v16  ;;  %890 = vrot.lane.b32.xlu0 %v6350_v22, %s5214_s2  ;;  %3482 = vmatprep.mubr.msk.f32.mxu1 %vm1008_vm12, %v6559_v27  ;;  %v923_v60 = vsel %vm921_vm7, %v6468_v11, %v879_v17  ;;  %v6596_v16 = vpack.c.bf16 %v1176_v34, %v1175_v53  ;;  %v1178_v53 = vld [vmem:[%s7569_s7 + $0x68] sm:$0xff]  ;;  %v1195_v34 = vld [vmem:[%s7569_s7 + $0xf0] sm:$0xff] }
 0x44c   :  { %v6588_v42 = vsel %vm930_vm13, %v928_v25, %v898_v36  ;;  %v7756_v36 = vrot.slane %v6481_v6, 2  ;;  %v6618_v56 = vpack.c.bf16 %v1200_v63, %v1199_v2  ;;  %v1196_v25 = vld [vmem:[%s7569_s7 + $0xf8] sm:$0xff]  ;;  %v1202_v2 = vld [vmem:[%s7569_s7 + $0x128] sm:$0xff] }
 0x44d   :  { %4524 = vmatpush3.bf16.msra.mxu0 %v6549_v12  ;;  %1155 = vmatmul.mubr.f32.vlgmr.msra.gmra.mrb[10].mxu1 %v6588_v42  ;;  %v6594_v22 = vpop.permute.xlu1 %884 }
 0x44e   :  { %v1438_v7 = vpop.permute.xlu0 %1437  ;;  %4526 = vmatprep.subr.bf16.mxu0 %v6551_v46  ;;  %v926_v1 = vsel %vm924_vm8, %v923_v60, %v6594_v22  ;;  %v6606_v17 = vsel %vm121_vm4, %v1486_v57, %v7756_v36  ;;  %4539 = vmatpush1.bf16.msra.mxu1 %v6571_v18  ;;  %v920_v57 = vsel %vm918_vm9, %v917_v51, %v6468_v11  ;;  %v1201_v60 = vld [vmem:[%s7569_s7 + $0x120] sm:$0xff]  ;;  %v1180_v18 = vld [vmem:[%s7569_s7 + $0x78] sm:$0xff] }
 0x44f   :  { %v1444_v44 = vsel %vm74_vm1, 0.0, %v1438_v7  ;;  %1458 = vrot.lane.b32.xlu0 %v6481_v6, %s5202_s29  ;;  %1084 = vmatprep.mubr.f32.mxu0 %v926_v1  ;;  %v5074_v11 = vpack.i.bf16 %v6606_v17, %v6481_v6  ;;  %v6640_v51 = vpack.c.bf16 %v1178_v53, %v1177_v39  ;;  %v6643_v36 = vpack.c.bf16 %v1196_v25, %v1195_v34  ;;  %v1203_v34 = vld [vmem:[%s7569_s7 + $0x130] sm:$0xff]  ;;  %v1204_v25 = vld [vmem:[%s7569_s7 + $0x138] sm:$0xff] }
 0x450   :  { %v1447_v7 = vsel %vm78_vm2, %v1444_v44, 0.0  ;;  %1085 = vmatmul.mubr.f32.gmra.mrb[12].mxu0 %v920_v57  ;;  %4540 = vmatprep.subr.bf16.mxu1 %v7725_v48  ;;  %v1179_v44 = vld [vmem:[%s7569_s7 + $0x70] sm:$0xff]  ;;  %v7757_v39 = vrot.slane %v6481_v6, 1 }
 0x451   :  { %v1466_v63 = vrot.slane %v1447_v7, 1  ;;  %4528 = vmatpush3.bf16.msra.mxu0 %v6596_v16  ;;  %1292 = vmatprep.mubr.f32.mxu0 %v6437_v29  ;;  %v6652_v29 = vpack.c.bf16 %v1202_v2, %v1201_v60  ;;  %v6667_v60 = vpack.c.bf16 %v1180_v18, %v1179_v44  ;;  %v6671_v2 = vpack.c.bf16 %v1204_v25, %v1203_v34  ;;  %v1206_v18 = vld [vmem:[%s7569_s7 + $0x148] sm:$0xff]  ;;  %v1208_v34 = vld [vmem:[%s7569_s7 + $0x158] sm:$0xff] }
 0x452   :  { %4530 = vmatprep.subr.bf16.mxu0 %v6598_v47  ;;  %4542 = vmatpush1.bf16.msra.mxu1 %v6618_v56  ;;  %v7758_v44 = vrot.slane %v6481_v6, 2  ;;  %v1216_v25 = vld [vmem:[%s7569_s7 + $0x198] sm:$0xff] }
 0x453   :  { %5075 = vrot.lane.b32.xlu0 %v5074_v11, %s5204_s16  ;;  %v1467_v53 = vsel %vm97_vm3, %v7757_v39, %v1466_v63  ;;  %4543 = vmatprep.subr.bf16.mxu1 %v7725_v48  ;;  %v1489_v63 = vrot.slane %v1447_v7, 2  ;;  %v1205_v11 = vld [vmem:[%s7569_s7 + $0x140] sm:$0xff] }
 0x454   :  { %1470 = vrot.lane.b32.xlu1 %v1467_v53, %s5203_s30  ;;  %v6686_v7 = vpack.c.bf16 %v1206_v18, %v1205_v11  ;;  %v1220_v11 = vld [vmem:[%s7569_s7 + $0x1b8] sm:$0xff]  ;;  %v1222_v18 = vld [vmem:[%s7569_s7 + $0x1c8] sm:$0xff] }
 0x455   :  { %4532 = vmatpush3.bf16.msra.mxu0 %v6640_v51  ;;  %v6693_v39 = vsel %vm121_vm4, %v7758_v44, %v1489_v63  ;;  %v1218_v63 = vld [vmem:[%s7569_s7 + $0x1a8] sm:$0xff]  ;;  %v1224_v44 = vld [vmem:[%s7569_s7 + $0x1d8] sm:$0xff] }
 0x456   :  { %4534 = vmatprep.subr.bf16.mxu0 %v6643_v36  ;;  %4545 = vmatpush1.bf16.msra.mxu1 %v6652_v29 }
 0x457   :  { %1480 = vrot.lane.b32.xlu0 %v6499_v35, %s5206_s18  ;;  %4546 = vmatprep.subr.bf16.mxu1 %v7725_v48 }
 0x458   :  { %1474 = vrot.lane.b32.xlu1 %v6499_v35, %s5205_s17  ;;  %v1207_v35 = vld [vmem:[%s7569_s7 + $0x150] sm:$0xff] }
 0x459   :  { %4536 = vmatpush3.bf16.msra.mxu0 %v6667_v60 }
 0x45a   :  { %4548 = vmatpush1.bf16.msra.mxu1 %v6671_v2  ;;  %4583 = vmatprep.subr.bf16.mxu0 %v5326_v10  ;;  %v6707_v10 = vpack.c.bf16 %v1208_v34, %v1207_v35 }
 0x45b   :  { %1476 = vrot.lane.b32.xlu0 %v1467_v53, %s5205_s17  ;;  %4549 = vmatprep.subr.bf16.mxu1 %v7725_v48 }
 0x45c   :  { %1293 = vmatmul.mubr.f32.vlgmr.msra.gmra.mrb[14].mxu0 %v6448_v50  ;;  %1495 = vrot.lane.b32.xlu1 %v6693_v39, %s5204_s16  ;;  %v1209_v50 = vld [vmem:[%s7569_s7 + $0x160] sm:$0xff] }
 0x45d   :  { %1297 = vmatprep.mubr.f32.mxu0 %v926_v1  ;;  %4585 = vmatpush3.bf16.msra.mxu0 %v5337_v14  ;;  %v1210_v1 = vld [vmem:[%s7569_s7 + $0x168] sm:$0xff] }
 0x45e   :  { %4551 = vmatpush1.bf16.msra.mxu1 %v6686_v7  ;;  %4587 = vmatprep.subr.bf16.mxu0 %v5351_v19  ;;  %v6722_v14 = vpack.c.bf16 %v1210_v1, %v1209_v50  ;;  %v1211_v19 = vld [vmem:[%s7569_s7 + $0x170] sm:$0xff]  ;;  %v7759_v50 = vmov 0.0  }
 0x45f   :  { %1499 = vrot.lane.b32.xlu0 %v6606_v17, %s5202_s29  ;;  %4552 = vmatprep.subr.bf16.mxu1 %v7725_v48  ;;  %v6825_v1 = vld [vmem:[%s7569_s7 + $0x1f0] sm:$0xff] }
 0x460   :  { %1298 = vmatmul.mubr.f32.gmra.mrb[16].mxu0 %v920_v57  ;;  %1482 = vrot.lane.b32.xlu1 %v1467_v53, %s5206_s18  ;;  %v1212_v57 = vld [vmem:[%s7569_s7 + $0x178] sm:$0xff]  ;;  %v1214_v53 = vld [vmem:[%s7569_s7 + $0x188] sm:$0xff] }
 0x461   :  { %4589 = vmatpush3.bf16.msra.mxu0 %v5366_v24  ;;  %v6736_v24 = vpack.c.bf16 %v1212_v57, %v1211_v19 }
 0x462   :  { %4554 = vmatpush1.bf16.msra.mxu1 %v6707_v10  ;;  %4591 = vmatprep.subr.bf16.mxu0 %v5390_v32  ;;  %v1213_v32 = vld [vmem:[%s7569_s7 + $0x180] sm:$0xff] }
 0x463   :  { %4555 = vmatprep.subr.bf16.mxu1 %v7725_v48 }
 0x464   :  { %1501 = vrot.lane.b32.xlu1 %v6693_v39, %s5202_s29 }
 0x465   :  { %4593 = vmatpush3.bf16.msra.mxu0 %v5414_v40  ;;  %v6748_v40 = vpack.c.bf16 %v1214_v53, %v1213_v32 }
 0x466   :  { %4557 = vmatpush1.bf16.msra.mxu1 %v6722_v14  ;;  %4595 = vmatprep.subr.bf16.mxu0 %v5428_v45  ;;  %v1215_v45 = vld [vmem:[%s7569_s7 + $0x190] sm:$0xff] }
 0x467   :  { %4558 = vmatprep.subr.bf16.mxu1 %v7725_v48 }
 0x469   :  { %4597 = vmatpush3.bf16.msra.mxu0 %v5458_v55  ;;  %v6760_v55 = vpack.c.bf16 %v1216_v25, %v1215_v45 }
 0x46a   :  { %4560 = vmatpush1.bf16.msra.mxu1 %v6736_v24  ;;  %4599 = vmatprep.subr.bf16.mxu0 %v5467_v58  ;;  %v1217_v58 = vld [vmem:[%s7569_s7 + $0x1a0] sm:$0xff] }
 0x46b   :  { %4561 = vmatprep.subr.bf16.mxu1 %v7725_v48 }
 0x46d   :  { %4601 = vmatpush3.bf16.msra.mxu0 %v5494_v3  ;;  %v6772_v3 = vpack.c.bf16 %v1218_v63, %v1217_v58 }
 0x46e   :  { %4563 = vmatpush1.bf16.msra.mxu1 %v6748_v40  ;;  %4603 = vmatprep.subr.bf16.mxu0 %v5497_v4  ;;  %v1219_v4 = vld [vmem:[%s7569_s7 + $0x1b0] sm:$0xff] }
 0x46f   :  { %4564 = vmatprep.subr.bf16.mxu1 %v7725_v48 }
 0x471   :  { %4605 = vmatpush3.bf16.msra.mxu0 %v5512_v8  ;;  %v6784_v8 = vpack.c.bf16 %v1220_v11, %v1219_v4 }
 0x472   :  { %4566 = vmatpush1.bf16.msra.mxu1 %v6760_v55  ;;  %4607 = vmatprep.subr.bf16.mxu0 %v5535_v20  ;;  %v1221_v20 = vld [vmem:[%s7569_s7 + $0x1c0] sm:$0xff] }
 0x473   :  { %4567 = vmatprep.subr.bf16.mxu1 %v7725_v48 }
 0x475   :  { %4609 = vmatpush3.bf16.msra.mxu0 %v5546_v26  ;;  %v6796_v26 = vpack.c.bf16 %v1222_v18, %v1221_v20 }
 0x476   :  { %4569 = vmatpush1.bf16.msra.mxu1 %v6772_v3  ;;  %4611 = vmatprep.subr.bf16.mxu0 %v5571_v37  ;;  %v1223_v37 = vld [vmem:[%s7569_s7 + $0x1d0] sm:$0xff] }
 0x477   :  { %4570 = vmatprep.subr.bf16.mxu1 %v7725_v48  ;;  %v6807_v35 = vpack.c.bf16 %v1224_v44, %v1223_v37  ;;  %v7764_v37 = vld [vmem:[#allocation11_spill] sm:$0xff]  ;;  %v7765_v44 = vld [vmem:[#allocation8_spill] sm:$0xff] }
 0x479   :  { %4613 = vmatpush3.bf16.msra.mxu0 %v5582_v43  ;;  %v1226_v43 = vld [vmem:[%s7569_s7 + $0x1e8] sm:$0xff] }
 0x47a   :  { %4572 = vmatpush1.bf16.msra.mxu1 %v6784_v8  ;;  %4615 = vmatprep.subr.bf16.mxu0 %v5339_v15  ;;  %v1225_v15 = vld [vmem:[%s7569_s7 + $0x1e0] sm:$0xff] }
 0x47b   :  { %4573 = vmatprep.subr.bf16.mxu1 %v7725_v48  ;;  %v6817_v34 = vpack.c.bf16 %v1226_v43, %v1225_v15  ;;  %v7767_v15 = vld [vmem:[#allocation13_spill] sm:$0xff] }
 0x47e   :  { %4575 = vmatpush1.bf16.msra.mxu1 %v6796_v26 }
 0x47f   :  { %4576 = vmatprep.subr.bf16.mxu1 %v7725_v48 }
 0x482   :  { %4578 = vmatpush1.bf16.msra.mxu1 %v6807_v35 }
 0x483   :  { %4579 = vmatprep.subr.bf16.mxu1 %v7725_v48 }
 0x486   :  { %4581 = vmatpush1.bf16.msra.mxu1 %v6817_v34 }
 0x487   :  { %1363 = vmatprep.subr.mxu1 %v7759_v50 }
 0x48a   :  { %1364 = vmatpush1.msra.mxu1 %v6825_v1 }
 0x48b   :  { %4647 = vmatprep.subr.bf16.mxu1 %v5610_v59 }
 0x4af   :  { %v1457_v19 = vpop.permute.xlu1 %1456 }
 0x4b3   :  { %v1451_v57 = vpop.permute.xlu1 %1450 }
 0x4b4   :  { %v1503_v45 = vsel %vm139_vm5, %v6459_v62, %v1451_v57  ;;  %v7769_v57 = vld [vmem:[#allocation12_spill] sm:$0xff] }
 0x4b5   :  { %v1469_v32 = vpop.permute.xlu0 %1468 }
 0x4b6   :  { %v1505_v53 = vsel %vm139_vm5, %v1457_v19, %v1469_v32  ;;  %v7768_v19 = vld [vmem:[#allocation15_spill] sm:$0xff]  ;;  %v7770_v32 = vld [vmem:[#allocation17_spill] sm:$0xff] }
 0x4b7   :  { %1579 = vmatprep.mubr.f32.mxu0 %v1505_v53  ;;  %v906_v25 = vpop.permute.xlu1 %905  ;;  %v7771_v53 = vld [vmem:[#allocation14_spill] sm:$0xff] }
 0x4b8   :  { %1580 = vmatmul.mubr.f32.vlgmr.msra.gmra.mrb[18].mxu0 %v1503_v45  ;;  %v7773_v45 = vld [vmem:[#allocation16_spill] sm:$0xff] }
 0x4b9   :  { %4617 = vmatpush3.bf16.msra.mxu0 %v5364_v23  ;;  %v900_v58 = vpop.permute.xlu0 %899 }
 0x4ba   :  { %v935_v63 = vsel %vm933_vm10, %v900_v58, %v906_v25  ;;  %4619 = vmatprep.subr.bf16.mxu0 %v5378_v28  ;;  %v7774_v25 = vld [vmem:[#allocation20_spill] sm:$0xff] }
 0x4bb   :  { %v912_v4 = vpop.permute.xlu1 %911 }
 0x4bc   :  { %v937_v11 = vsel %vm139_vm5, %v935_v63, %v912_v4  ;;  %v7776_v63 = vld [vmem:[#allocation23_spill] sm:$0xff]  ;;  %v7777_v4 = vld [vmem:[#allocation21_spill] sm:$0xff] }
 0x4bd   :  { %4621 = vmatpush3.bf16.msra.mxu0 %v5392_v33  ;;  %v891_v20 = vpop.permute.xlu0 %890  ;;  %3483 = vmatprep.mubr.msk.f32.mxu1 %vm1008_vm12, %v937_v11 }
 0x4be   :  { %v929_v62 = vsel %vm927_vm11, %v6594_v22, %v891_v20  ;;  %4623 = vmatprep.subr.bf16.mxu0 %v5416_v41  ;;  %v7779_v20 = vld [vmem:[#allocation22_spill] sm:$0xff] }
 0x4bf   :  { %v932_v23 = vsel %vm930_vm13, %v929_v62, %v900_v58  ;;  %v7775_v58 = vld [vmem:[#allocation18_spill] sm:$0xff]  ;;  %v7780_v62 = vld [vmem:[#allocation27_spill] sm:$0xff] }
 0x4c0   :  { %1160 = vmatmul.mubr.f32.gmra.mrb[12].mxu1 %v932_v23 }
 0x4c1   :  { %4625 = vmatpush3.bf16.msra.mxu0 %v5440_v49  ;;  %v1459_v18 = vpop.permute.xlu0 %1458  ;;  %3484 = vmatprep.mubr.msk.f32.mxu1 %vm1008_vm12, %v6559_v27 }
 0x4c2   :  { %4627 = vmatprep.subr.bf16.mxu0 %v5449_v52 }
 0x4c4   :  { %1368 = vmatmul.mubr.f32.vlgmr.msra.gmra.mrb[14].mxu1 %v6588_v42 }
 0x4c5   :  { %4629 = vmatpush3.bf16.msra.mxu0 %v5476_v61  ;;  %v5076_v28 = vpop.permute.xlu0 %5075  ;;  %3485 = vmatprep.mubr.msk.f32.mxu1 %vm1008_vm12, %v937_v11  ;;  %v7778_v11 = vld [vmem:[#allocation24_spill] sm:$0xff] }
 0x4c6   :  { %v5078_v33 = vunpack.i.h.bf16 %v5076_v28  ;;  %v5077_v41 = vunpack.i.l.bf16 %v5076_v28  ;;  %v1471_v22 = vpop.permute.xlu1 %1470  ;;  %4631 = vmatprep.subr.bf16.mxu0 %v5485_v0  ;;  %4649 = vmatpush3.bf16.msra.mxu1 %v5610_v59  ;;  %v7783_v28 = vld [vmem:[#allocation26_spill] sm:$0xff] }
 0x4c7   :  { %v1506_v49 = vsel %vm139_vm5, %v1459_v18, %v1471_v22  ;;  %4651 = vmatprep.subr.bf16.mxu1 %v5649_v54  ;;  %v7782_v18 = vld [vmem:[#allocation28_spill] sm:$0xff]  ;;  %v7786_v22 = vld [vmem:[#allocation33_spill] sm:$0xff] }
 0x4c8   :  { %1373 = vmatmul.mubr.f32.gmra.mrb[16].mxu1 %v932_v23  ;;  %1584 = vmatprep.mubr.f32.mxu0 %v1506_v49  ;;  %v1504_v52 = vsel %vm139_vm5, %v6481_v6, %v5077_v41  ;;  %v1509_v61 = vsel %vm139_vm5, %v6606_v17, %v5078_v33  ;;  %v7760_v6 = vld [vmem:[#allocation5_spill] sm:$0xff]  ;;  %v7784_v33 = vld [vmem:[#allocation31_spill] sm:$0xff]  ;;  %v7787_v49 = vld [vmem:[#allocation30_spill] sm:$0xff] }
 0x4c9   :  { %4633 = vmatpush3.bf16.msra.mxu0 %v5500_v5  ;;  %v1481_v27 = vpop.permute.xlu0 %1480  ;;  %v7781_v23 = vld [vmem:[#allocation25_spill] sm:$0xff] }
 0x4ca   :  { %1585 = vmatmul.mubr.f32.gmra.mrb[20].mxu0 %v1504_v52  ;;  %v1475_v42 = vpop.permute.xlu1 %1474  ;;  %4635 = vmatprep.subr.bf16.mxu0 %v5524_v13  ;;  %v7785_v41 = vld [vmem:[#allocation29_spill] sm:$0xff]  ;;  %v7788_v52 = vld [vmem:[#allocation35_spill] sm:$0xff] }
 0x4cb   :  { %1654 = vmatprep.mubr.f32.mxu0 %v1509_v61  ;;  %4653 = vmatpush3.bf16.msra.mxu1 %v5649_v54  ;;  %v7761_v54 = vld [vmem:[#allocation9_spill] sm:$0xff]  ;;  %v7789_v61 = vld [vmem:[#allocation32_spill] sm:$0xff] }
 0x4cc   :  { %4655 = vmatprep.subr.bf16.mxu1 %v5662_v9 }
 0x4cd   :  { %4637 = vmatpush3.bf16.msra.mxu0 %v5537_v21  ;;  %v1477_v0 = vpop.permute.xlu0 %1476  ;;  %v7762_v21 = vld [vmem:[#allocation6_spill] sm:$0xff] }
 0x4ce   :  { %v1496_v59 = vpop.permute.xlu1 %1495  ;;  %4639 = vmatprep.subr.bf16.mxu0 %v5560_v31  ;;  %v7763_v31 = vld [vmem:[#allocation7_spill] sm:$0xff] }
 0x4cf   :  { %4657 = vmatpush3.bf16.msra.mxu1 %v5662_v9  ;;  %v1507_v9 = vsel %vm139_vm5, %v1475_v42, %v1481_v27  ;;  %v7790_v27 = vld [vmem:[#allocation37_spill] sm:$0xff]  ;;  %v7791_v42 = vld [vmem:[#allocation34_spill] sm:$0xff] }
 0x4d0   :  { %4659 = vmatprep.subr.bf16.mxu1 %v5676_v30 }
 0x4d1   :  { %4641 = vmatpush3.bf16.msra.mxu0 %v5573_v38  ;;  %v1500_v5 = vpop.permute.xlu0 %1499  ;;  %v1510_v38 = vsel %vm139_vm5, %v6693_v39, %v1496_v59  ;;  %v7772_v39 = vld [vmem:[#allocation19_spill] sm:$0xff]  ;;  %v7793_v59 = vld [vmem:[#allocation36_spill] sm:$0xff] }
 0x4d2   :  { %4145 = vmatprep.mubr.msk.f32.mxu1 %vm139_vm5, %v1500_v5  ;;  %v1483_v13 = vpop.permute.xlu1 %1482  ;;  %4643 = vmatprep.subr.bf16.mxu0 %v7760_v6  ;;  %v7794_v5 = vld [vmem:[#allocation45_spill] sm:$0xff] }
 0x4d3   :  { %4661 = vmatpush3.bf16.msra.mxu1 %v5676_v30  ;;  %v7766_v30 = vld [vmem:[#allocation10_spill] sm:$0xff]  ;;  %v1508_v43 = vsel %vm139_vm5, %v1477_v0, %v1483_v13  ;;  %v7795_v13 = vld [vmem:[#allocation39_spill] sm:$0xff] }
 0x4d4   :  { %4695 = vmatprep.subr.bf16.mxu1 %v7761_v54  ;;  %v7792_v0 = vld [vmem:[#allocation38_spill] sm:$0xff] }
 0x4d5   :  { %4645 = vmatpush3.bf16.msra.mxu0 %v7762_v21 }
 0x4d6   :  { %v1502_v17 = vpop.permute.xlu1 %1501  ;;  %4663 = vmatprep.subr.bf16.mxu0 %v7763_v31 }
 0x4d7   :  { %4146 = vmatmul.mubr.msk.f32.vlgmr.msra.gmra.mrb[18].mxu1 %vm139_vm5, %v1502_v17  ;;  %v6912_v17 = vld [vmem:[%s7570_s8] ss:$0 sm:$0xff]  ;;  %s5222_s8 = smov 96  }
 0x4d8   :  { %1655 = vmatmul.mubr.f32.vlgmr.msra.gmra.mrb[22].mxu0 %v1507_v9  ;;  %4697 = vmatpush3.bf16.msra.mxu1 %v7764_v37 }
 0x4d9   :  { %1659 = vmatprep.mubr.f32.mxu0 %v1510_v38  ;;  %4665 = vmatpush3.bf16.msra.mxu0 %v7765_v44 }
 0x4da   :  { %4667 = vmatprep.subr.bf16.mxu0 %v7766_v30  ;;  %4699 = vmatprep.subr.bf16.mxu1 %v7767_v15 }
 0x4dc   :  { %1660 = vmatmul.mubr.f32.gmra.mrb[24].mxu0 %v1508_v43  ;;  %4701 = vmatpush3.bf16.msra.mxu1 %v7768_v19 }
 0x4dd   :  { %4669 = vmatpush3.bf16.msra.mxu0 %v7769_v57  ;;  %4703 = vmatprep.subr.bf16.mxu1 %v7770_v32 }
 0x4de   :  { %4671 = vmatprep.subr.bf16.mxu0 %v7771_v53 }
 0x4e0   :  { %4705 = vmatpush3.bf16.msra.mxu1 %v7772_v39 }
 0x4e1   :  { %4673 = vmatpush3.bf16.msra.mxu0 %v7773_v45  ;;  %4707 = vmatprep.subr.bf16.mxu1 %v7774_v25 }
 0x4e2   :  { %4675 = vmatprep.subr.bf16.mxu0 %v7775_v58 }
 0x4e4   :  { %4709 = vmatpush3.bf16.msra.mxu1 %v7776_v63 }
 0x4e5   :  { %4677 = vmatpush3.bf16.msra.mxu0 %v7777_v4  ;;  %4711 = vmatprep.subr.bf16.mxu1 %v7778_v11 }
 0x4e6   :  { %4679 = vmatprep.subr.bf16.mxu0 %v7779_v20 }
 0x4e8   :  { %4713 = vmatpush3.bf16.msra.mxu1 %v7780_v62 }
 0x4e9   :  { %4681 = vmatpush3.bf16.msra.mxu0 %v7781_v23  ;;  %4715 = vmatprep.subr.bf16.mxu1 %v7782_v18 }
 0x4ea   :  { %4683 = vmatprep.subr.bf16.mxu0 %v7783_v28 }
 0x4ec   :  { %4717 = vmatpush3.bf16.msra.mxu1 %v7784_v33 }
 0x4ed   :  { %4685 = vmatpush3.bf16.msra.mxu0 %v7785_v41  ;;  %4719 = vmatprep.subr.bf16.mxu1 %v7786_v22 }
 0x4ee   :  { %4687 = vmatprep.subr.bf16.mxu0 %v7787_v49 }
 0x4f0   :  { %4721 = vmatpush3.bf16.msra.mxu1 %v7788_v52 }
 0x4f1   :  { %4689 = vmatpush3.bf16.msra.mxu0 %v7789_v61  ;;  %4723 = vmatprep.subr.bf16.mxu1 %v7790_v27 }
 0x4f2   :  { %4691 = vmatprep.subr.bf16.mxu0 %v7791_v42 }
 0x4f4   :  { %4725 = vmatpush3.bf16.msra.mxu1 %v7792_v0 }
 0x4f5   :  { %4693 = vmatpush3.bf16.msra.mxu0 %v7793_v59  ;;  %4743 = vmatprep.subr.bf16.mxu1 %v7794_v5 }
 0x4f6   :  { %4727 = vmatprep.subr.bf16.mxu0 %v7795_v13 }
 0x50f   :  { %v3717_v6 = vpop.f32.mrb[10].mxu0 }
 0x510   :  { %v3718_v54 = vpop.f32.mrb[11].mxu0 }
 0x511   :  { %v3719_v21 = vadd.f32 %v3718_v54, %v3717_v6 }
 0x513   :  { %v1082_v31 = vadd.f32 %v3719_v21, %v6912_v17  ;;  %v5172_v21 = vld [vmem:[%s7565_s3] ss:$0 sm:$0xff] }
 0x520   :  { %v1156_v9 = vpop.f32.mrb[10].mxu1 }
 0x521   :  { %v1157_v38 = vadd.f32 %v1156_v9, %v1082_v31  ;;  %v1158_v37 = vpop.f32.mrb[11].mxu1 }
 0x523   :  { %v3720_v44 = vpop.f32.mrb[12].mxu0 }
 0x524   :  { %v3721_v30 = vpop.f32.mrb[13].mxu0 }
 0x525   :  { %v3722_v15 = vadd.f32 %v3721_v30, %v3720_v44 }
 0x527   :  { %v1087_v63 = vadd.f32 %v3722_v15, %v6912_v17 }
 0x52f   :  { %v3755_v43 = vpop.f32.mrb[14].mxu0 }
 0x530   :  { %v3756_v19 = vpop.f32.mrb[15].mxu0 }
 0x531   :  { %v3757_v57 = vadd.f32 %v3756_v19, %v3755_v43 }
 0x533   :  { %v3758_v32 = vpop.f32.mrb[16].mxu0  ;;  %v1295_v62 = vadd.f32 %v3757_v57, %v6912_v17 }
 0x534   :  { %v3759_v53 = vpop.f32.mrb[17].mxu0 }
 0x535   :  { %v3760_v39 = vadd.f32 %v3759_v53, %v3758_v32 }
 0x537   :  { %v1300_v41 = vadd.f32 %v3760_v39, %v6912_v17 }
 0x58b   :  { %v3793_v45 = vpop.f32.mrb[18].mxu0 }
 0x58c   :  { %v3794_v25 = vpop.f32.mrb[19].mxu0 }
 0x58d   :  { %v3795_v58 = vadd.f32 %v3794_v25, %v3793_v45 }
 0x58f   :  { %v1582_v31 = vadd.f32 %v5172_v21, %v3795_v58 }
 0x593   :  { %v1161_v4 = vpop.f32.mrb[12].mxu1 }
 0x594   :  { %v1162_v11 = vadd.f32 %v1161_v4, %v1087_v63  ;;  %v1163_v20 = vpop.f32.mrb[13].mxu1 }
 0x597   :  { %v1369_v23 = vpop.f32.mrb[14].mxu1 }
 0x598   :  { %v1370_v18 = vadd.f32 %v1369_v23, %v1295_v62  ;;  %v1371_v28 = vpop.f32.mrb[15].mxu1 }
 0x59a   :  { %v6917_v33 = vmax.f32 %v1157_v38, %v1370_v18 }
 0x59b   :  { %v1374_v22 = vpop.f32.mrb[16].mxu1 }
 0x59c   :  { %v1375_v49 = vadd.f32 %v1374_v22, %v1300_v41  ;;  %v1376_v52 = vpop.f32.mrb[17].mxu1 }
 0x59d   :  { %v3796_v61 = vpop.f32.mrb[20].mxu0 }
 0x59e   :  { %v6920_v27 = vmax.f32 %v1162_v11, %v1375_v49  ;;  %v3797_v42 = vpop.f32.mrb[21].mxu0 }
 0x59f   :  { %v3798_v0 = vadd.f32 %v3797_v42, %v3796_v61 }
 0x5a1   :  { %v1587_v30 = vadd.f32 %v5172_v21, %v3798_v0 }
 0x5aa   :  { %v4147_v59 = vpop.f32.mrb[18].mxu1 }
 0x5ab   :  { %v3831_v5 = vpop.f32.mrb[22].mxu0  ;;  %v1731_v6 = vpop.f32.mrb[19].mxu1 }
 0x5ac   :  { %v3832_v54 = vpop.f32.mrb[23].mxu0 }
 0x5ad   :  { %v3833_v9 = vadd.f32 %v3832_v54, %v3831_v5 }
 0x5af   :  { %v1657_v38 = vadd.f32 %v3833_v9, %v1582_v31  ;;  %v3834_v37 = vpop.f32.mrb[24].mxu0 }
 0x5b0   :  { %v3835_v44 = vpop.f32.mrb[25].mxu0 }
 0x5b1   :  { %v1732_v15 = vadd.f32 %v1731_v6, %v1657_v38  ;;  %v3836_v43 = vadd.f32 %v3835_v44, %v3834_v37 }
 0x5b3   :  { %v1740_v19 = vmax.f32 %v1732_v15, 0.0  ;;  %v1662_v57 = vadd.f32 %v3836_v43, %v1587_v30 }
 0x5b5   :  { %v1744_v32 = vrot.slane %v1740_v19, 7  ;;  %v1737_v53 = vadd.f32 %v4147_v59, %v1662_v57 }
 0x5b7   :  { %v1749_v39 = vsel %vm55_vm0, 0.0, %v1744_v32  ;;  %v1741_v45 = vmax.f32 %v1737_v53, 0.0 }
 0x5b8   :  { %1753 = vrot.lane.b32.xlu0 %v1749_v39, %s7796_s27 }
 0x5b9   :  { %v1745_v25 = vrot.slane %v1741_v45, 7 }
 0x5bb   :  { %v1750_v63 = vsel %vm55_vm0, %v1745_v25, 0.0  ;;  %v1746_v58 = vsel %vm55_vm0, %v1744_v32, %v1745_v25  ;;  %v7797_v25 = vld [vmem:[#allocation40_spill] sm:$0xff] }
 0x5bc   :  { %1757 = vrot.lane.b32.xlu0 %v1750_v63, %s7796_s27  ;;  %1755 = vrot.lane.b32.xlu1 %v1746_v58, %s7796_s27  ;;  %v7798_v58 = vld [vmem:[#allocation46_spill] sm:$0xff] }
 0x62a   :  { %v1754_v4 = vpop.permute.xlu0 %1753 }
 0x62b   :  { %v1762_v11 = vsel %vm74_vm1, 0.0, %v1754_v4 }
 0x62c   :  { %v1765_v20 = vsel %vm78_vm2, %v1762_v11, 0.0 }
 0x62d   :  { %1776 = vrot.lane.b32.xlu1 %v1765_v20, %s5202_s29  ;;  %v1806_v41 = vrot.slane %v1765_v20, 2  ;;  %v1783_v61 = vrot.slane %v1765_v20, 1 }
 0x62e   :  { %v1758_v62 = vpop.permute.xlu0 %1757  ;;  %v1756_v23 = vpop.permute.xlu1 %1755 }
 0x62f   :  { %v1764_v18 = vsel %vm74_vm1, 0.0, %v1758_v62  ;;  %v1763_v28 = vsel %vm74_vm1, 0.0, %v1756_v23  ;;  %v7799_v23 = vld [vmem:[#allocation47_spill] sm:$0xff]  ;;  %vm7112_vm1 = vmpackc.low %vm2518_vm14, %vm5215_vm15 }
 0x630   :  { %v1766_v22 = vsel %vm78_vm2, %v1763_v28, 0.0  ;;  %v1767_v49 = vsel %vm78_vm2, %v1764_v18, 0.0  ;;  %v7800_v28 = vld [vmem:[#allocation41_spill] sm:$0xff]  ;;  %vm5216_vm2 = vmmov 0  }
 0x631   :  { %v1807_v52 = vrot.slane %v1766_v22, 2  ;;  %1778 = vrot.lane.b32.xlu0 %v1766_v22, %s5202_s29  ;;  %v1784_v42 = vrot.slane %v1766_v22, 1  ;;  %v1809_v5 = vrot.slane %v1767_v49, 2  ;;  %v1786_v21 = vrot.slane %v1767_v49, 1 }
 0x633   :  { %v1785_v0 = vsel %vm97_vm3, %v1783_v61, %v1784_v42  ;;  %v1808_v59 = vsel %vm121_vm4, %v1806_v41, %v1807_v52  ;;  %v1810_v54 = vsel %vm121_vm4, %v1807_v52, %v1809_v5  ;;  %v1787_v9 = vsel %vm97_vm3, %v1784_v42, %v1786_v21  ;;  %v7801_v52 = vld [vmem:[#allocation48_spill] sm:$0xff]  ;;  %v7802_v42 = vld [vmem:[#allocation50_spill] sm:$0xff]  ;;  %v7805_v5 = vld [vmem:[#allocation53_spill] sm:$0xff] }
 0x634   :  { %v5079_v6 = vpack.i.bf16 %v1808_v59, %v1765_v20  ;;  %v5084_v31 = vpack.i.bf16 %v1810_v54, %v1766_v22  ;;  %v7807_v21 = vld [vmem:[#allocation43_spill] sm:$0xff] }
 0x635   :  { %1788 = vrot.lane.b32.xlu0 %v1785_v0, %s5203_s30 }
 0x636   :  { %5080 = vrot.lane.b32.xlu1 %v5079_v6, %s5204_s16 }
 0x639   :  { %1794 = vrot.lane.b32.xlu0 %v1785_v0, %s5205_s17 }
 0x63a   :  { %1800 = vrot.lane.b32.xlu1 %v1785_v0, %s5206_s18  ;;  %v7803_v0 = vld [vmem:[#allocation42_spill] sm:$0xff] }
 0x63d   :  { %5085 = vrot.lane.b32.xlu0 %v5084_v31, %s5204_s16  ;;  %v7808_v31 = vld [vmem:[#allocation56_spill] sm:$0xff]  ;;  %s5223_s16 = smov 24  }
 0x63e   :  { %1790 = vrot.lane.b32.xlu1 %v1787_v9, %s5203_s30 }
 0x641   :  { %1802 = vrot.lane.b32.xlu0 %v1787_v9, %s5206_s18 }
 0x642   :  { %1796 = vrot.lane.b32.xlu1 %v1787_v9, %s5205_s17  ;;  %v7809_v9 = vld [vmem:[#allocation57_spill] sm:$0xff] }
 0x645   :  { %1821 = vrot.lane.b32.xlu0 %v1810_v54, %s5202_s29 }
 0x646   :  { %1819 = vrot.lane.b32.xlu1 %v1808_v59, %s5202_s29 }
 0x69f   :  { %v1777_v37 = vpop.permute.xlu1 %1776 }
 0x6a3   :  { %v1779_v38 = vpop.permute.xlu0 %1778 }
 0x6a7   :  { %v1789_v44 = vpop.permute.xlu0 %1788 }
 0x6a8   :  { %v5081_v30 = vpop.permute.xlu1 %5080  ;;  %v1825_v15 = vsel %vm139_vm5, %v1777_v37, %v1789_v44  ;;  %v7811_v37 = vld [vmem:[#allocation59_spill] sm:$0xff]  ;;  %v7812_v44 = vld [vmem:[#allocation60_spill] sm:$0xff] }
 0x6a9   :  { %v5083_v43 = vunpack.i.h.bf16 %v5081_v30  ;;  %v5082_v19 = vunpack.i.l.bf16 %v5081_v30  ;;  %1899 = vmatprep.mubr.f32.mxu0 %v1825_v15  ;;  %v7813_v30 = vld [vmem:[#allocation49_spill] sm:$0xff]  ;;  %v7814_v15 = vld [vmem:[#allocation64_spill] sm:$0xff] }
 0x6ab   :  { %v1795_v57 = vpop.permute.xlu0 %1794  ;;  %v1823_v32 = vsel %vm139_vm5, %v1765_v20, %v5082_v19  ;;  %v1829_v53 = vsel %vm139_vm5, %v1808_v59, %v5083_v43  ;;  %v7804_v59 = vld [vmem:[#allocation51_spill] sm:$0xff]  ;;  %v7815_v43 = vld [vmem:[#allocation65_spill] sm:$0xff]  ;;  %v7816_v19 = vld [vmem:[#allocation52_spill] sm:$0xff] }
 0x6ac   :  { %v1801_v39 = vpop.permute.xlu1 %1800  ;;  %1900 = vmatmul.mubr.f32.vlgmr.msra.gmra.mrb[26].mxu0 %v1823_v32  ;;  %1974 = vmatprep.mubr.f32.mxu1 %v1829_v53  ;;  %v7818_v32 = vld [vmem:[#allocation68_spill] sm:$0xff]  ;;  %v7819_v53 = vld [vmem:[#allocation55_spill] sm:$0xff] }
 0x6ad   :  { %v1827_v45 = vsel %vm139_vm5, %v1795_v57, %v1801_v39  ;;  %4729 = vmatpush3.bf16.msra.mxu0 %v7795_v13  ;;  %v7817_v57 = vld [vmem:[#allocation67_spill] sm:$0xff]  ;;  %v7820_v39 = vld [vmem:[#allocation70_spill] sm:$0xff] }
 0x6ae   :  { %1975 = vmatmul.mubr.f32.vlgmr.msra.gmra.mrb[20].mxu1 %v1827_v45  ;;  %4731 = vmatprep.subr.bf16.mxu0 %v7797_v25  ;;  %v7821_v45 = vld [vmem:[#allocation58_spill] sm:$0xff] }
 0x6af   :  { %v5086_v63 = vpop.permute.xlu0 %5085  ;;  %4745 = vmatpush3.bf16.msra.mxu1 %v7798_v58  ;;  %v7824_v58 = vld [vmem:[#allocation63_spill] sm:$0xff] }
 0x6b0   :  { %v5088_v4 = vunpack.i.h.bf16 %v5086_v63  ;;  %v5087_v11 = vunpack.i.l.bf16 %v5086_v63  ;;  %v1791_v62 = vpop.permute.xlu1 %1790  ;;  %4747 = vmatprep.subr.bf16.mxu1 %v7799_v23  ;;  %v7823_v63 = vld [vmem:[#allocation62_spill] sm:$0xff]  ;;  %v7828_v23 = vld [vmem:[#allocation72_spill] sm:$0xff] }
 0x6b1   :  { %4733 = vmatpush3.bf16.msra.mxu0 %v7797_v25  ;;  %v1826_v20 = vsel %vm139_vm5, %v1779_v38, %v1791_v62  ;;  %v7810_v38 = vld [vmem:[#allocation44_spill] sm:$0xff]  ;;  %v7822_v25 = vld [vmem:[#allocation61_spill] sm:$0xff]  ;;  %v7827_v62 = vld [vmem:[#allocation71_spill] sm:$0xff] }
 0x6b2   :  { %1904 = vmatprep.mubr.f32.mxu0 %v1826_v20  ;;  %v1824_v18 = vsel %vm139_vm5, %v1766_v22, %v5087_v11  ;;  %v1830_v13 = vsel %vm139_vm5, %v1810_v54, %v5088_v4  ;;  %4735 = vmatprep.subr.bf16.mxu0 %v7800_v28  ;;  %v7806_v54 = vld [vmem:[#allocation54_spill] sm:$0xff]  ;;  %v7826_v11 = vld [vmem:[#allocation69_spill] sm:$0xff] }
 0x6b3   :  { %v1803_v41 = vpop.permute.xlu0 %1802  ;;  %1905 = vmatmul.mubr.f32.gmra.mrb[28].mxu0 %v1824_v18  ;;  %1979 = vmatprep.mubr.f32.mxu1 %v1830_v13  ;;  %v7825_v4 = vld [vmem:[#allocation66_spill] sm:$0xff]  ;;  %v7829_v20 = vld [vmem:[#allocation73_spill] sm:$0xff] }
 0x6b4   :  { %v1797_v49 = vpop.permute.xlu1 %1796  ;;  %4749 = vmatpush3.bf16.msra.mxu1 %v7801_v52  ;;  %v7830_v18 = vld [vmem:[#allocation74_spill] sm:$0xff] }
 0x6b5   :  { %4737 = vmatpush3.bf16.msra.mxu0 %v7800_v28  ;;  %v1828_v61 = vsel %vm139_vm5, %v1797_v49, %v1803_v41  ;;  %4751 = vmatprep.subr.bf16.mxu1 %v7802_v42  ;;  %v5173_v13 = vld [vmem:[%s7568_s6 + $0x1f0] sm:$0xff]  ;;  %v5174_v42 = vld [vmem:[%s7567_s5] ss:$0 sm:$0xff]  ;;  %s5217_s5 = smov 32  }
 0x6b6   :  { %1980 = vmatmul.mubr.f32.gmra.mrb[22].mxu1 %v1828_v61  ;;  %4739 = vmatprep.subr.bf16.mxu0 %v7803_v0 }
 0x6b7   :  { %v1822_v6 = vpop.permute.xlu0 %1821 }
 0x6b8   :  { %v1820_v22 = vpop.permute.xlu1 %1819  ;;  %4753 = vmatpush3.bf16.msra.mxu1 %v7804_v59 }
 0x6b9   :  { %4741 = vmatpush3.bf16.msra.mxu0 %v7803_v0  ;;  %4164 = vmatprep.mubr.msk.f32.mxu0 %vm139_vm5, %v1820_v22 }
 0x6ba   :  { %4774 = vmatprep.subr.bf16.mxu0 %v7725_v48  ;;  %4755 = vmatprep.subr.bf16.mxu1 %v7805_v5 }
 0x6bc   :  { %4165 = vmatmul.mubr.msk.f32.vlgmr.msra.gmra.mrb[30].mxu0 %vm139_vm5, %v1822_v6  ;;  %4757 = vmatpush3.bf16.msra.mxu1 %v7806_v54 }
 0x6bd   :  { %4776 = vmatpush1.bf16.msra.mxu0 %v7807_v21  ;;  %4759 = vmatprep.subr.bf16.mxu1 %v7808_v31 }
 0x6be   :  { %4777 = vmatprep.subr.bf16.mxu0 %v7725_v48 }
 0x6c0   :  { %4761 = vmatpush3.bf16.msra.mxu1 %v7809_v9 }
 0x6c1   :  { %4779 = vmatpush1.bf16.msra.mxu0 %v7810_v38  ;;  %4763 = vmatprep.subr.bf16.mxu1 %v7811_v37 }
 0x6c2   :  { %4780 = vmatprep.subr.bf16.mxu0 %v7725_v48 }
 0x6c4   :  { %4765 = vmatpush3.bf16.msra.mxu1 %v7812_v44 }
 0x6c5   :  { %4782 = vmatpush1.bf16.msra.mxu0 %v7813_v30  ;;  %4767 = vmatprep.subr.bf16.mxu1 %v7814_v15 }
 0x6c6   :  { %4783 = vmatprep.subr.bf16.mxu0 %v7725_v48 }
 0x6c8   :  { %4769 = vmatpush3.bf16.msra.mxu1 %v7815_v43 }
 0x6c9   :  { %4785 = vmatpush1.bf16.msra.mxu0 %v7816_v19  ;;  %4771 = vmatprep.subr.bf16.mxu1 %v7817_v57  ;;  %v5175_v19 = vld [vmem:[%s7562_s0 + $0x18] sm:$0xff] }
 0x6ca   :  { %4786 = vmatprep.subr.bf16.mxu0 %v7725_v48 }
 0x6cc   :  { %4773 = vmatpush3.bf16.msra.mxu1 %v7818_v32  ;;  %v5176_v32 = vld [vmem:[%s7562_s0 + $0x10] sm:$0xff] }
 0x6cd   :  { %4788 = vmatpush1.bf16.msra.mxu0 %v7819_v53  ;;  %4820 = vmatprep.subr.bf16.mxu1 %v7820_v39 }
 0x6ce   :  { %4789 = vmatprep.subr.bf16.mxu0 %v7725_v48 }
 0x6d1   :  { %4791 = vmatpush1.bf16.msra.mxu0 %v7821_v45 }
 0x6d2   :  { %4792 = vmatprep.subr.bf16.mxu0 %v7725_v48 }
 0x6d5   :  { %4794 = vmatpush1.bf16.msra.mxu0 %v7822_v25 }
 0x6d6   :  { %4795 = vmatprep.subr.bf16.mxu0 %v7725_v48 }
 0x6d9   :  { %4797 = vmatpush1.bf16.msra.mxu0 %v7823_v63 }
 0x6da   :  { %4798 = vmatprep.subr.bf16.mxu0 %v7725_v48 }
 0x6dd   :  { %4800 = vmatpush1.bf16.msra.mxu0 %v7824_v58 }
 0x6de   :  { %4801 = vmatprep.subr.bf16.mxu0 %v7725_v48 }
 0x6e1   :  { %4803 = vmatpush1.bf16.msra.mxu0 %v7825_v4 }
 0x6e2   :  { %4804 = vmatprep.subr.bf16.mxu0 %v7725_v48 }
 0x6e5   :  { %4806 = vmatpush1.bf16.msra.mxu0 %v7826_v11 }
 0x6e6   :  { %4807 = vmatprep.subr.bf16.mxu0 %v7725_v48 }
 0x6e9   :  { %4809 = vmatpush1.bf16.msra.mxu0 %v7827_v62 }
 0x6ea   :  { %4810 = vmatprep.subr.bf16.mxu0 %v7725_v48 }
 0x6ed   :  { %4812 = vmatpush1.bf16.msra.mxu0 %v7828_v23 }
 0x6ee   :  { %4813 = vmatprep.subr.bf16.mxu0 %v7725_v48 }
 0x6f1   :  { %4815 = vmatpush1.bf16.msra.mxu0 %v7829_v20 }
 0x6f2   :  { %4816 = vmatprep.subr.bf16.mxu0 %v7725_v48 }
 0x6f5   :  { %4818 = vmatpush1.bf16.msra.mxu0 %v7830_v18 }
 0x6f6   :  { %2277 = vmatprep.subr.mxu0 %v7759_v50 }
 0x6f9   :  { %2278 = vmatpush1.msra.mxu0 %v5173_v13 }
 0x6fa   :  { %4906 = vmatprep.subr.bf16.mxu0 %v7725_v48 }
 0x77f   :  { %v3879_v28 = vpop.f32.mrb[26].mxu0 }
 0x780   :  { %v3880_v41 = vpop.f32.mrb[27].mxu0 }
 0x781   :  { %v3881_v49 = vadd.f32 %v3880_v41, %v3879_v28  ;;  %v3917_v52 = vpop.f32.mrb[20].mxu1 }
 0x782   :  { %v3918_v61 = vpop.f32.mrb[21].mxu1 }
 0x783   :  { %v1902_v0 = vadd.f32 %v5174_v42, %v3881_v49  ;;  %v3919_v22 = vadd.f32 %v3918_v61, %v3917_v52 }
 0x785   :  { %v1977_v59 = vadd.f32 %v3919_v22, %v1902_v0 }
 0x786   :  { %v3882_v5 = vpop.f32.mrb[28].mxu0 }
 0x787   :  { %v3883_v6 = vpop.f32.mrb[29].mxu0 }
 0x788   :  { %v3884_v54 = vadd.f32 %v3883_v6, %v3882_v5 }
 0x789   :  { %v3920_v21 = vpop.f32.mrb[22].mxu1 }
 0x78a   :  { %v1907_v31 = vadd.f32 %v5174_v42, %v3884_v54  ;;  %v3921_v9 = vpop.f32.mrb[23].mxu1  ;;  %v7835_v42 = vld [vmem:[#allocation75_spill] sm:$0xff]  ;;  %v7837_v54 = vld [vmem:[#allocation77_spill] sm:$0xff] }
 0x78b   :  { %v3922_v38 = vadd.f32 %v3921_v9, %v3920_v21 }
 0x78d   :  { %v1982_v37 = vadd.f32 %v3922_v38, %v1907_v31  ;;  %v7838_v38 = vld [vmem:[#allocation78_spill] sm:$0xff] }
 0x78f   :  { %v4166_v44 = vpop.f32.mrb[30].mxu0 }
 0x790   :  { %v2057_v30 = vadd.f32 %v4166_v44, %v1982_v37  ;;  %v2051_v15 = vpop.f32.mrb[31].mxu0  ;;  %v7839_v44 = vld [vmem:[#allocation79_spill] sm:$0xff] }
 0x791   :  { %v2052_v43 = vadd.f32 %v2051_v15, %v1977_v59  ;;  %v7836_v59 = vld [vmem:[#allocation76_spill] sm:$0xff] }
 0x792   :  { %v2061_v57 = vadd.f32 %v5175_v19, %v2057_v30 }
 0x793   :  { %v2060_v53 = vadd.f32 %v5176_v32, %v2052_v43  ;;  %v7840_v43 = vld [vmem:[#allocation80_spill] sm:$0xff]  ;;  %v2499_v32 = vld [vmem:[%s7571_s9 + $0x8] sm:$0xff] }
 0x794   :  { %v2063_v39 = vmax.f32 %v2061_v57, 0.0  ;;  %v2498_v57 = vld [vmem:[%s7571_s9] sm:$0xff] }
 0x795   :  { %v2062_v45 = vmax.f32 %v2060_v53, 0.0 }
 0x796   :  { %v2079_v25 = vrot.slane %v2063_v39, 1  ;;  %v2100_v11 = vrot.slane %v2063_v39, 2 }
 0x797   :  { %2072 = vrot.lane.b32.xlu1 %v2062_v45, %s7831_s24  ;;  %v2078_v63 = vrot.slane %v2062_v45, 1  ;;  %v2099_v4 = vrot.slane %v2062_v45, 2 }
 0x799   :  { %v2080_v58 = vsel %vm97_vm3, %v2078_v63, %v2079_v25  ;;  %v2101_v62 = vsel %vm121_vm4, %v2099_v4, %v2100_v11  ;;  %vm2506_vm3 = vcmask 97280   ;;  %vm2514_vm4 = vcmask 359424  }
 0x79a   :  { %2081 = vrot.lane.b32.xlu0 %v2080_v58, %s7832_s25 }
 0x79b   :  { %2066 = vrot.lane.b32.xlu1 %v2062_v45, %s7833_s26 }
 0x79e   :  { %2087 = vrot.lane.b32.xlu0 %v2080_v58, %s7834_s4 }
 0x79f   :  { %2074 = vrot.lane.b32.xlu1 %v2063_v39, %s7831_s24 }
 0x7a2   :  { %2083 = vrot.lane.b32.xlu0 %v2079_v25, %s7832_s25 }
 0x7a3   :  { %2068 = vrot.lane.b32.xlu1 %v2063_v39, %s7833_s26  ;;  %s5221_s26 = smov 112  }
 0x7a6   :  { %2089 = vrot.lane.b32.xlu0 %v2079_v25, %s7834_s4 }
 0x7a7   :  { %2102 = vrot.lane.b32.xlu1 %v2101_v62, %s5213_s19 }
 0x7aa   :  { %2108 = vrot.lane.b32.xlu0 %v2101_v62, %s7796_s27 }
 0x7ab   :  { %2093 = vrot.lane.b32.xlu1 %v2080_v58, %s5214_s2  ;;  %v7842_v58 = vld [vmem:[#allocation82_spill] sm:$0xff] }
 0x7ae   :  { %2114 = vrot.lane.b32.xlu0 %v2101_v62, %s5206_s18  ;;  %v2500_v62 = vld [vmem:[%s7571_s9 + $0x10] sm:$0xff] }
 0x7af   :  { %2104 = vrot.lane.b32.xlu1 %v2100_v11, %s5213_s19 }
 0x7b2   :  { %2110 = vrot.lane.b32.xlu0 %v2100_v11, %s7796_s27 }
 0x7b3   :  { %2095 = vrot.lane.b32.xlu1 %v2079_v25, %s5214_s2 }
 0x7b6   :  { %2116 = vrot.lane.b32.xlu0 %v2100_v11, %s5206_s18  ;;  %v7080_v11 = vpack.c.bf16 %v2499_v32, %v2498_v57 }
 0x809   :  { %v2073_v23 = vpop.permute.xlu1 %2072 }
 0x80c   :  { %v2082_v20 = vpop.permute.xlu0 %2081 }
 0x80d   :  { %v2067_v18 = vpop.permute.xlu1 %2066  ;;  %v2124_v28 = vsel %vm921_vm7, %v2073_v23, %v2082_v20 }
 0x80e   :  { %v2120_v13 = vsel %vm915_vm6, %v2062_v45, %v2067_v18 }
 0x80f   :  { %v7052_v61 = vsel %vm918_vm9, %v2120_v13, %v2073_v23  ;;  %v2501_v23 = vld [vmem:[%s7571_s9 + $0x18] sm:$0xff] }
 0x810   :  { %v2088_v41 = vpop.permute.xlu0 %2087  ;;  %v7093_v13 = vpack.c.bf16 %v2501_v23, %v2500_v62 }
 0x811   :  { %v2075_v49 = vpop.permute.xlu1 %2074  ;;  %v2126_v52 = vsel %vm924_vm8, %v2124_v28, %v2088_v41 }
 0x812   :  { %2206 = vmatprep.mubr.f32.mxu1 %v2126_v52 }
 0x813   :  { %2207 = vmatmul.mubr.f32.vlgmr.msra.gmra.mrb[24].mxu1 %v7052_v61 }
 0x814   :  { %4822 = vmatpush3.bf16.msra.mxu1 %v7835_v42  ;;  %v2084_v0 = vpop.permute.xlu0 %2083 }
 0x815   :  { %v2069_v22 = vpop.permute.xlu1 %2068  ;;  %4824 = vmatprep.subr.bf16.mxu1 %v7836_v59  ;;  %v2125_v6 = vsel %vm921_vm7, %v2075_v49, %v2084_v0 }
 0x816   :  { %v2121_v5 = vsel %vm915_vm6, %v2063_v39, %v2069_v22  ;;  %v7841_v39 = vld [vmem:[#allocation81_spill] sm:$0xff] }
 0x817   :  { %v2123_v37 = vsel %vm918_vm9, %v2121_v5, %v2075_v49 }
 0x818   :  { %4826 = vmatpush3.bf16.msra.mxu1 %v7837_v54  ;;  %v2090_v21 = vpop.permute.xlu0 %2089 }
 0x819   :  { %v2103_v31 = vpop.permute.xlu1 %2102  ;;  %v2127_v9 = vsel %vm924_vm8, %v2125_v6, %v2090_v21  ;;  %4828 = vmatprep.subr.bf16.mxu1 %v7838_v38 }
 0x81a   :  { %2211 = vmatprep.mubr.f32.mxu1 %v2127_v9 }
 0x81b   :  { %2212 = vmatmul.mubr.f32.gmra.mrb[26].mxu1 %v2123_v37 }
 0x81c   :  { %4830 = vmatpush3.bf16.msra.mxu1 %v7839_v44  ;;  %2356 = vmatprep.mubr.f32.mxu1 %v2126_v52  ;;  %v2109_v30 = vpop.permute.xlu0 %2108 }
 0x81d   :  { %v2094_v15 = vpop.permute.xlu1 %2093  ;;  %4832 = vmatprep.subr.bf16.mxu1 %v7840_v43  ;;  %v2132_v53 = vsel %vm933_vm10, %v2103_v31, %v2109_v30  ;;  %v7190_v43 = vld [vmem:[%s7572_s10] ss:$0 sm:$0xff]  ;;  %s5218_s10 = smov 116  }
 0x81e   :  { %v2128_v19 = vsel %vm927_vm11, %v2088_v41, %v2094_v15  ;;  %v2502_v41 = vld [vmem:[%s7571_s9 + $0x20] sm:$0xff] }
 0x81f   :  { %v7078_v4 = vsel %vm930_vm13, %v2128_v19, %v2103_v31 }
 0x820   :  { %4834 = vmatpush3.bf16.msra.mxu1 %v7841_v39  ;;  %v2115_v45 = vpop.permute.xlu0 %2114 }
 0x821   :  { %v2134_v25 = vsel %vm139_vm5, %v2132_v53, %v2115_v45  ;;  %v2105_v63 = vpop.permute.xlu1 %2104  ;;  %4836 = vmatprep.subr.bf16.mxu1 %v7842_v58 }
 0x822   :  { %3492 = vmatprep.mubr.msk.f32.mxu0 %vm1008_vm12, %v2134_v25 }
 0x823   :  { %2282 = vmatmul.mubr.f32.vlgmr.msra.gmra.mrb[32].mxu0 %v7078_v4 }
 0x824   :  { %4838 = vmatpush3.bf16.msra.mxu1 %v6549_v12  ;;  %v2111_v20 = vpop.permute.xlu0 %2110  ;;  %4908 = vmatpush3.bf16.msra.mxu0 %v7080_v11  ;;  %v2503_v12 = vld [vmem:[%s7571_s9 + $0x28] sm:$0xf] }
 0x825   :  { %v2096_v18 = vpop.permute.xlu1 %2095  ;;  %4840 = vmatprep.subr.bf16.mxu1 %v6551_v46  ;;  %4909 = vmatprep.subr.bf16.mxu0 %v7725_v48  ;;  %v2133_v49 = vsel %vm933_vm10, %v2105_v63, %v2111_v20  ;;  %v7110_v0 = vpack.c.bf16 %v2503_v12, %v2502_v41 }
 0x826   :  { %v2129_v28 = vsel %vm927_vm11, %v2090_v21, %v2096_v18 }
 0x827   :  { %v2131_v42 = vsel %vm930_vm13, %v2129_v28, %v2105_v63 }
 0x828   :  { %4842 = vmatpush3.bf16.msra.mxu1 %v6596_v16  ;;  %v2117_v52 = vpop.permute.xlu0 %2116  ;;  %4911 = vmatpush3.bf16.msra.mxu0 %v7093_v13 }
 0x829   :  { %v2135_v46 = vsel %vm139_vm5, %v2133_v49, %v2117_v52  ;;  %4844 = vmatprep.subr.bf16.mxu1 %v6598_v47  ;;  %4912 = vmatprep.subr.bf16.mxu0 %v7725_v48  ;;  %v7845_v47 = vld [vmem:[#allocation83_spill] sm:$0xff]  ;;  %vm3206_vm5 = vcmask 588800  }
 0x82a   :  { %3493 = vmatprep.mubr.msk.f32.mxu0 %vm1008_vm12, %v2135_v46 }
 0x82b   :  { %2287 = vmatmul.mubr.f32.gmra.mrb[34].mxu0 %v2131_v42 }
 0x82c   :  { %4846 = vmatpush3.bf16.msra.mxu1 %v6640_v51  ;;  %4915 = vmatpush3.bf16.msk.msra.mxu0 %vm7112_vm1, %v7110_v0 }
 0x82d   :  { %4848 = vmatprep.subr.bf16.mxu1 %v6643_v36  ;;  %4194 = vmatprep.mubr.msk.f32.mxu0 %vm5216_vm2, %v7759_v50 }
 0x82e   :  { %4916 = vmatprep.subr.bf16.mxu0 %v7725_v48 }
 0x830   :  { %4850 = vmatpush3.bf16.msra.mxu1 %v6667_v60 }
 0x831   :  { %4851 = vmatprep.subr.bf16.mxu1 %v7725_v48 }
 0x833   :  { %2357 = vmatmul.mubr.f32.vlgmr.msra.gmra.mrb[28].mxu1 %v7052_v61 }
 0x834   :  { %2361 = vmatprep.mubr.f32.mxu1 %v2127_v9  ;;  %4853 = vmatpush1.bf16.msra.mxu1 %v7845_v47 }
 0x835   :  { %4854 = vmatprep.subr.bf16.mxu1 %v7725_v48 }
 0x837   :  { %2362 = vmatmul.mubr.f32.gmra.mrb[30].mxu1 %v2123_v37 }
 0x838   :  { %4856 = vmatpush1.bf16.msra.mxu1 %v6618_v56  ;;  %3494 = vmatprep.mubr.msk.f32.mxu1 %vm1008_vm12, %v2134_v25  ;;  %v7171_v56 = vld [vmem:[%s7563_s1] sm:$0x3] }
 0x839   :  { %4857 = vmatprep.subr.bf16.mxu1 %v7725_v48  ;;  %v2507_v51 = vsel %vm2506_vm3, %v7171_v56, 0.0 }
 0x83c   :  { %4859 = vmatpush1.bf16.msra.mxu1 %v6652_v29 }
 0x83d   :  { %4860 = vmatprep.subr.bf16.mxu1 %v7725_v48 }
 0x840   :  { %4862 = vmatpush1.bf16.msra.mxu1 %v6671_v2 }
 0x841   :  { %4863 = vmatprep.subr.bf16.mxu1 %v7725_v48 }
 0x844   :  { %4865 = vmatpush1.bf16.msra.mxu1 %v6686_v7 }
 0x845   :  { %4866 = vmatprep.subr.bf16.mxu1 %v7725_v48 }
 0x848   :  { %4868 = vmatpush1.bf16.msra.mxu1 %v6707_v10 }
 0x849   :  { %4869 = vmatprep.subr.bf16.mxu1 %v7725_v48 }
 0x84c   :  { %4871 = vmatpush1.bf16.msra.mxu1 %v6722_v14 }
 0x84d   :  { %4872 = vmatprep.subr.bf16.mxu1 %v7725_v48 }
 0x850   :  { %4874 = vmatpush1.bf16.msra.mxu1 %v6736_v24 }
 0x851   :  { %4875 = vmatprep.subr.bf16.mxu1 %v7725_v48 }
 0x854   :  { %4877 = vmatpush1.bf16.msra.mxu1 %v6748_v40 }
 0x855   :  { %4878 = vmatprep.subr.bf16.mxu1 %v7725_v48 }
 0x858   :  { %4880 = vmatpush1.bf16.msra.mxu1 %v6760_v55 }
 0x859   :  { %4881 = vmatprep.subr.bf16.mxu1 %v7725_v48 }
 0x85c   :  { %4883 = vmatpush1.bf16.msra.mxu1 %v6772_v3 }
 0x85d   :  { %4884 = vmatprep.subr.bf16.mxu1 %v7725_v48 }
 0x860   :  { %4886 = vmatpush1.bf16.msra.mxu1 %v6784_v8 }
 0x861   :  { %4887 = vmatprep.subr.bf16.mxu1 %v7725_v48 }
 0x864   :  { %4889 = vmatpush1.bf16.msra.mxu1 %v6796_v26 }
 0x865   :  { %4890 = vmatprep.subr.bf16.mxu1 %v7725_v48 }
 0x868   :  { %4892 = vmatpush1.bf16.msra.mxu1 %v6807_v35 }
 0x869   :  { %4893 = vmatprep.subr.bf16.mxu1 %v7725_v48 }
 0x86c   :  { %4895 = vmatpush1.bf16.msra.mxu1 %v6817_v34 }
 0x86d   :  { %2427 = vmatprep.subr.mxu1 %v7759_v50 }
 0x870   :  { %2428 = vmatpush1.msra.mxu1 %v6825_v1 }
 0x871   :  { %2432 = vmatmul.mubr.f32.vlgmr.msra.gmra.mrb[32].mxu1 %v7078_v4  ;;  %4896 = vmatprep.subr.bf16.mxu1 %v7725_v48 }
 0x872   :  { %3495 = vmatprep.mubr.msk.f32.mxu1 %vm1008_vm12, %v2135_v46  ;;  %4898 = vmatpush3.bf16.msra.mxu1 %v7080_v11 }
 0x873   :  { %4899 = vmatprep.subr.bf16.mxu1 %v7725_v48 }
 0x875   :  { %2437 = vmatmul.mubr.f32.gmra.mrb[34].mxu1 %v2131_v42 }
 0x876   :  { %4901 = vmatpush3.bf16.msra.mxu1 %v7093_v13  ;;  %4179 = vmatprep.mubr.msk.f32.mxu1 %vm5216_vm2, %v7759_v50 }
 0x877   :  { %4902 = vmatprep.subr.bf16.mxu1 %v7725_v48 }
 0x87a   :  { %4905 = vmatpush3.bf16.msk.msra.mxu1 %vm7112_vm1, %v7110_v0 }
 0x87d   :  { %4180 = vmatmul.mubr.msk.f32.vlgmr.msra.gmra.mrb[36].mxu1 %vm2514_vm4, %v2507_v51 }
 0x8e6   :  { %v3965_v36 = vpop.f32.mrb[24].mxu1 }
 0x8e7   :  { %v3966_v29 = vpop.f32.mrb[25].mxu1 }
 0x8e8   :  { %v3967_v60 = vadd.f32 %v3966_v29, %v3965_v36 }
 0x8ea   :  { %v2209_v14 = vadd.f32 %v3967_v60, %v6912_v17 }
 0x8ee   :  { %v3968_v2 = vpop.f32.mrb[26].mxu1 }
 0x8ef   :  { %v3969_v7 = vpop.f32.mrb[27].mxu1 }
 0x8f0   :  { %v3970_v10 = vadd.f32 %v3969_v7, %v3968_v2 }
 0x8f2   :  { %v2214_v3 = vadd.f32 %v3970_v10, %v6912_v17 }
 0x8f6   :  { %v2283_v24 = vpop.f32.mrb[32].mxu0 }
 0x8f7   :  { %v2284_v40 = vadd.f32 %v2283_v24, %v2209_v14  ;;  %v2285_v55 = vpop.f32.mrb[33].mxu0 }
 0x8fe   :  { %v2288_v8 = vpop.f32.mrb[34].mxu0 }
 0x8ff   :  { %v2289_v26 = vadd.f32 %v2288_v8, %v2214_v3  ;;  %v2290_v35 = vpop.f32.mrb[35].mxu0 }
 0x906   :  { %v4003_v34 = vpop.f32.mrb[28].mxu1 }
 0x907   :  { %v4004_v1 = vpop.f32.mrb[29].mxu1 }
 0x908   :  { %v4005_v61 = vadd.f32 %v4004_v1, %v4003_v34 }
 0x90a   :  { %v4006_v22 = vpop.f32.mrb[30].mxu1  ;;  %v2359_v6 = vadd.f32 %v4005_v61, %v6912_v17 }
 0x90b   :  { %v4007_v59 = vpop.f32.mrb[31].mxu1 }
 0x90c   :  { %v4008_v5 = vadd.f32 %v4007_v59, %v4006_v22 }
 0x90e   :  { %v2364_v38 = vadd.f32 %v4008_v5, %v6912_v17 }
 0x944   :  { %v2433_v54 = vpop.f32.mrb[32].mxu1 }
 0x945   :  { %v2434_v21 = vadd.f32 %v2433_v54, %v2359_v6  ;;  %v2435_v31 = vpop.f32.mrb[33].mxu1 }
 0x947   :  { %v7182_v9 = vmax.f32 %v2284_v40, %v2434_v21 }
 0x948   :  { %v2438_v37 = vpop.f32.mrb[34].mxu1 }
 0x949   :  { %v2439_v44 = vadd.f32 %v2438_v37, %v2364_v38  ;;  %v2440_v30 = vpop.f32.mrb[35].mxu1 }
 0x94b   :  { %v7185_v15 = vmax.f32 %v2289_v26, %v2439_v44 }
 0x950   :  { %v2588_v19 = vpop.f32.mrb[36].mxu1 }
 0x951   :  { %v2589_v57 = vadd.f32 %v7190_v43, %v2588_v19  ;;  %v4181_v32 = vpop.f32.mrb[37].mxu1 }
 0x953   :  { %5114 = vtanh.f32 %v2589_v57  ;;  %v2592_v39 = vsub.f32 0.0, %v2589_v57 }
 0x955   :  { %v2593_v17 = vmul.f32 1.442695, %v2592_v39 }
 0x957   :  { %5116 = vpow2.f32 %v2593_v17 }
 0x95d   :  { %v5115_v53 = vpop.eup %5114 }
 0x95e   :  { %2600 = vrot.lane.b32.xlu1 %v5115_v53, %s5203_s30 }
 0x961   :  { %v5117_v45 = vpop.eup %5116 }
 0x962   :  { %v2595_v25 = vadd.f32 1.0, %v5117_v45 }
 0x964   :  { %5118 = vrcp.f32 %v2595_v25 }
 0x96e   :  { %v5119_v63 = vpop.eup %5118 }
 0x96f   :  { %v2598_v62 = vmul.f32 0.0, %v5119_v63 }
 0x9d0   :  { %v2601_v58 = vpop.permute.xlu1 %2600 }
 0x9d1   :  { %v2603_v4 = vmul.f32 %v5119_v63, %v2601_v58 }
 0x9d3   :  { %2605 = vrot.lane.b32.xlu0 %v2603_v4, %s5217_s5 }
 0x9d7   :  { %2616 = vrot.lane.b32.xlu0 %v7171_v56, %s5218_s10 }
 0xa45   :  { %v2606_v23 = vpop.permute.xlu0 %2605 }
 0xa46   :  { %v2608_v20 = vadd.f32 %v2606_v23, %v2598_v62 }
 0xa48   :  { %5120 = vtanh.f32 %v2608_v20 }
 0xa49   :  { %v2617_v12 = vpop.permute.xlu0 %2616 }
 0xa52   :  { %v5121_v18 = vpop.eup %5120 }
 0xa53   :  { %2611 = vrot.lane.b32.xlu1 %v5121_v18, %s5203_s30 }
 0xac5   :  { %v2612_v28 = vpop.permute.xlu1 %2611 }
 0xac6   :  { %v2614_v41 = vmul.f32 %v5119_v63, %v2612_v28 }
 0xac8   :  { %2620 = vrot.lane.b32.xlu1 %v2614_v41, %s5219_s22 }
 0xb3a   :  { %v2621_v49 = vpop.permute.xlu1 %2620 }
 0xb3b   :  { %v2623_v52 = vsel %vm2506_vm3, %v2617_v12, %v2621_v49 }
 0xb3c   :  { %4195 = vmatmul.mubr.msk.f32.vlgmr.msra.gmra.mrb[36].mxu0 %vm2514_vm4, %v2623_v52 }
 0xb3d   :  { %4918 = vmatpush3.bf16.msra.mxu0 %v7080_v11  ;;  %4209 = vmatprep.mubr.msk.f32.mxu0 %vm5216_vm2, %v7759_v50 }
 0xb3e   :  { %4919 = vmatprep.subr.bf16.mxu0 %v7725_v48 }
 0xb41   :  { %4921 = vmatpush3.bf16.msra.mxu0 %v7093_v13 }
 0xb42   :  { %4922 = vmatprep.subr.bf16.mxu0 %v7725_v48 }
 0xb45   :  { %4925 = vmatpush3.bf16.msk.msra.mxu0 %vm7112_vm1, %v7110_v0 }
 0xb46   :  { %4926 = vmatprep.subr.bf16.mxu0 %v7725_v48 }
 0xc0f   :  { %v2693_v46 = vpop.f32.mrb[36].mxu0 }
 0xc10   :  { %v2694_v42 = vadd.f32 %v7190_v43, %v2693_v46  ;;  %v4196_v47 = vpop.f32.mrb[37].mxu0 }
 0xc12   :  { %5122 = vtanh.f32 %v2694_v42  ;;  %v2697_v36 = vsub.f32 0.0, %v2694_v42 }
 0xc14   :  { %v2698_v29 = vmul.f32 1.442695, %v2697_v36 }
 0xc16   :  { %5124 = vpow2.f32 %v2698_v29 }
 0xc1c   :  { %v5123_v51 = vpop.eup %5122 }
 0xc1d   :  { %2705 = vrot.lane.b32.xlu0 %v5123_v51, %s5203_s30 }
 0xc20   :  { %v5125_v60 = vpop.eup %5124 }
 0xc21   :  { %v2700_v2 = vadd.f32 1.0, %v5125_v60 }
 0xc23   :  { %5126 = vrcp.f32 %v2700_v2 }
 0xc2d   :  { %v5127_v7 = vpop.eup %5126 }
 0xc2e   :  { %v2703_v24 = vmul.f32 %v5127_v7, %v2608_v20 }
 0xc8f   :  { %v2706_v10 = vpop.permute.xlu0 %2705 }
 0xc90   :  { %v2708_v14 = vmul.f32 %v5127_v7, %v2706_v10 }
 0xc92   :  { %2710 = vrot.lane.b32.xlu1 %v2708_v14, %s5217_s5 }
 0xc96   :  { %2720 = vrot.lane.b32.xlu1 %v7171_v56, %s7831_s24  ;;  %s5220_s24 = smov 68  }
 0xd04   :  { %v2711_v40 = vpop.permute.xlu1 %2710 }
 0xd05   :  { %v2713_v55 = vadd.f32 %v2711_v40, %v2703_v24 }
 0xd07   :  { %5128 = vtanh.f32 %v2713_v55 }
 0xd08   :  { %v2721_v35 = vpop.permute.xlu1 %2720 }
 0xd11   :  { %v5129_v3 = vpop.eup %5128 }
 0xd12   :  { %2716 = vrot.lane.b32.xlu0 %v5129_v3, %s5203_s30 }
 0xd84   :  { %v2717_v8 = vpop.permute.xlu0 %2716 }
 0xd85   :  { %v2719_v26 = vmul.f32 %v5127_v7, %v2717_v8 }
 0xd87   :  { %2724 = vrot.lane.b32.xlu0 %v2719_v26, %s5219_s22 }
 0xdf9   :  { %v2725_v34 = vpop.permute.xlu0 %2724 }
 0xdfa   :  { %v2727_v1 = vsel %vm2506_vm3, %v2721_v35, %v2725_v34 }
 0xdfb   :  { %4210 = vmatmul.mubr.msk.f32.vlgmr.msra.gmra.mrb[38].mxu0 %vm2514_vm4, %v2727_v1 }
 0xdfc   :  { %4928 = vmatpush3.bf16.msra.mxu0 %v7080_v11  ;;  %4224 = vmatprep.mubr.msk.f32.mxu0 %vm5216_vm2, %v7759_v50 }
 0xdfd   :  { %4929 = vmatprep.subr.bf16.mxu0 %v7725_v48 }
 0xe00   :  { %4931 = vmatpush3.bf16.msra.mxu0 %v7093_v13 }
 0xe01   :  { %4932 = vmatprep.subr.bf16.mxu0 %v7725_v48 }
 0xe04   :  { %4935 = vmatpush3.bf16.msk.msra.mxu0 %vm7112_vm1, %v7110_v0 }
 0xe05   :  { %4936 = vmatprep.subr.bf16.mxu0 %v7725_v48 }
 0xece   :  { %v2797_v61 = vpop.f32.mrb[38].mxu0 }
 0xecf   :  { %v2798_v22 = vadd.f32 %v7190_v43, %v2797_v61  ;;  %v4211_v59 = vpop.f32.mrb[39].mxu0 }
 0xed1   :  { %5130 = vtanh.f32 %v2798_v22  ;;  %v2801_v6 = vsub.f32 0.0, %v2798_v22 }
 0xed3   :  { %v2802_v54 = vmul.f32 1.442695, %v2801_v6 }
 0xed5   :  { %5132 = vpow2.f32 %v2802_v54 }
 0xedb   :  { %v5131_v5 = vpop.eup %5130 }
 0xedc   :  { %2809 = vrot.lane.b32.xlu1 %v5131_v5, %s5203_s30 }
 0xedf   :  { %v5133_v21 = vpop.eup %5132 }
 0xee0   :  { %v2804_v31 = vadd.f32 1.0, %v5133_v21 }
 0xee2   :  { %5134 = vrcp.f32 %v2804_v31 }
 0xeec   :  { %v5135_v38 = vpop.eup %5134 }
 0xeed   :  { %v2807_v30 = vmul.f32 %v5135_v38, %v2713_v55 }
 0xf4e   :  { %v2810_v37 = vpop.permute.xlu1 %2809 }
 0xf4f   :  { %v2812_v44 = vmul.f32 %v5135_v38, %v2810_v37 }
 0xf51   :  { %2814 = vrot.lane.b32.xlu0 %v2812_v44, %s5217_s5 }
 0xf55   :  { %2824 = vrot.lane.b32.xlu0 %v7171_v56, %s7834_s4 }
 0xfc3   :  { %v2815_v19 = vpop.permute.xlu0 %2814 }
 0xfc4   :  { %v2817_v57 = vadd.f32 %v2815_v19, %v2807_v30  ;;  %v2445_v30 = vrot.slane %v7182_v9, 1  ;;  %v1381_v19 = vrot.slane %v6917_v33, 1 }
 0xfc6   :  { %5136 = vtanh.f32 %v2817_v57 }
 0xfc7   :  { %v2825_v17 = vpop.permute.xlu0 %2824 }
 0xfd0   :  { %v5137_v32 = vpop.eup %5136 }
 0xfd1   :  { %2820 = vrot.lane.b32.xlu1 %v5137_v32, %s5203_s30 }
0x1043   :  { %v2821_v53 = vpop.permute.xlu1 %2820 }
0x1044   :  { %v2823_v39 = vmul.f32 %v5135_v38, %v2821_v53 }
0x1046   :  { %2828 = vrot.lane.b32.xlu1 %v2823_v39, %s5219_s22 }
0x10b8   :  { %v2829_v45 = vpop.permute.xlu1 %2828 }
0x10b9   :  { %v2831_v25 = vsel %vm2506_vm3, %v2825_v17, %v2829_v45 }
0x10ba   :  { %4225 = vmatmul.mubr.msk.f32.vlgmr.msra.gmra.mrb[40].mxu0 %vm2514_vm4, %v2831_v25  ;;  %v2449_v25 = vrot.slane %v7185_v15, 1 }
0x10bb   :  { %4938 = vmatpush3.bf16.msra.mxu0 %v7080_v11  ;;  %4239 = vmatprep.mubr.msk.f32.mxu0 %vm5216_vm2, %v7759_v50 }
0x10bc   :  { %4939 = vmatprep.subr.bf16.mxu0 %v7725_v48 }
0x10bf   :  { %4941 = vmatpush3.bf16.msra.mxu0 %v7093_v13 }
0x10c0   :  { %4942 = vmatprep.subr.bf16.mxu0 %v7725_v48 }
0x10c3   :  { %4945 = vmatpush3.bf16.msk.msra.mxu0 %vm7112_vm1, %v7110_v0 }
0x10c4   :  { %4946 = vmatprep.subr.bf16.mxu0 %v7725_v48 }
0x118d   :  { %v2901_v63 = vpop.f32.mrb[40].mxu0 }
0x118e   :  { %v2902_v58 = vadd.f32 %v7190_v43, %v2901_v63  ;;  %v4226_v4 = vpop.f32.mrb[41].mxu0 }
0x118f   :  { %v7299_v4 = vmax.f32 %v7185_v15, %v2449_v25  ;;  %v3142_v15 = vld [vmem:[%s7573_s11] sm:$0xff]  ;;  %v3157_v25 = vld [vmem:[%s7573_s11 + $0x78] sm:$0xff] }
0x1190   :  { %5138 = vtanh.f32 %v2902_v58  ;;  %v2905_v23 = vsub.f32 0.0, %v2902_v58  ;;  %v1385_v58 = vrot.slane %v6920_v27, 1 }
0x1192   :  { %v2906_v20 = vmul.f32 1.442695, %v2905_v23  ;;  %v7303_v23 = vmax.f32 %v6920_v27, %v1385_v58  ;;  %v3143_v27 = vld [vmem:[%s7573_s11 + $0x8] sm:$0xff] }
0x1194   :  { %5140 = vpow2.f32 %v2906_v20  ;;  %v2473_v20 = vrot.slane %v7299_v4, 4 }
0x119a   :  { %v5139_v62 = vpop.eup %5138 }
0x119b   :  { %2913 = vrot.lane.b32.xlu0 %v5139_v62, %s5203_s30 }
0x119e   :  { %v5141_v18 = vpop.eup %5140 }
0x119f   :  { %v2908_v28 = vadd.f32 1.0, %v5141_v18  ;;  %v3158_v18 = vld [vmem:[%s7573_s11 + $0x80] sm:$0xff] }
0x11a1   :  { %5142 = vrcp.f32 %v2908_v28  ;;  %v3159_v28 = vld [vmem:[%s7573_s11 + $0x88] sm:$0xff] }
0x11ab   :  { %v5143_v41 = vpop.eup %5142 }
0x11ac   :  { %v2911_v52 = vmul.f32 %v5143_v41, %v2817_v57  ;;  %v7283_v57 = vmax.f32 %v7182_v9, %v2445_v30  ;;  %v3155_v30 = vld [vmem:[%s7573_s11 + $0x68] sm:$0xff] }
0x11ae   :  { %v2457_v17 = vrot.slane %v7283_v57, 4  ;;  %v2453_v9 = vrot.slane %v7283_v57, 2 }
0x120d   :  { %v2914_v12 = vpop.permute.xlu0 %2913 }
0x120e   :  { %v2916_v49 = vmul.f32 %v5143_v41, %v2914_v12  ;;  %v3160_v12 = vld [vmem:[%s7573_s11 + $0x90] sm:$0xff] }
0x1210   :  { %2918 = vrot.lane.b32.xlu1 %v2916_v49, %s5217_s5  ;;  %v3161_v49 = vld [vmem:[%s7573_s11 + $0x98] sm:$0xff] }
0x1214   :  { %2928 = vrot.lane.b32.xlu1 %v7171_v56, %s5213_s19 }
0x1282   :  { %v2919_v46 = vpop.permute.xlu1 %2918 }
0x1283   :  { %v2921_v42 = vadd.f32 %v2919_v46, %v2911_v52  ;;  %v1409_v52 = vrot.slane %v7303_v23, 4  ;;  %v4958_v46 = vpack.c.bf16 %v3143_v27, %v3142_v15 }
0x1285   :  { %5144 = vtanh.f32 %v2921_v42 }
0x1286   :  { %v2929_v29 = vpop.permute.xlu1 %2928 }
0x128f   :  { %v5145_v47 = vpop.eup %5144 }
0x1290   :  { %2924 = vrot.lane.b32.xlu0 %v5145_v47, %s5203_s30  ;;  %v3144_v47 = vld [vmem:[%s7573_s11 + $0x10] sm:$0xff] }
0x1302   :  { %v2925_v51 = vpop.permute.xlu0 %2924 }
0x1303   :  { %v2927_v36 = vmul.f32 %v5143_v41, %v2925_v51  ;;  %v4956_v41 = vpack.c.bf16 %v3159_v28, %v3158_v18  ;;  %v3145_v51 = vld [vmem:[%s7573_s11 + $0x18] sm:$0xff]  ;;  %v3175_v18 = vld [vmem:[%s7573_s11 + $0x108] sm:$0xff]  ;;  %v3176_v28 = vld [vmem:[%s7573_s11 + $0x110] sm:$0xff] }
0x1305   :  { %2932 = vrot.lane.b32.xlu0 %v2927_v36, %s5219_s22  ;;  %v3162_v36 = vld [vmem:[%s7573_s11 + $0xa0] sm:$0xff]  ;;  %4957 = vmatprep.subr.bf16.mxu1 %v4956_v41  ;;  %v3177_v41 = vld [vmem:[%s7573_s11 + $0x118] sm:$0xff] }
0x1306   :  { %4959 = vmatpush3.bf16.msra.mxu1 %v4958_v46  ;;  %v4992_v27 = vpack.c.bf16 %v3177_v41, %v3176_v28  ;;  %v3179_v46 = vld [vmem:[%s7573_s11 + $0x128] sm:$0xff] }
0x1377   :  { %v2933_v60 = vpop.permute.xlu0 %2932 }
0x1378   :  { %v2935_v2 = vsel %vm2506_vm3, %v2929_v29, %v2933_v60  ;;  %v3163_v29 = vld [vmem:[%s7573_s11 + $0xa8] sm:$0xff]  ;;  %v4962_v60 = vpack.c.bf16 %v3145_v51, %v3144_v47 }
0x1379   :  { %4240 = vmatmul.mubr.msk.f32.vlgmr.msra.gmra.mrb[42].mxu0 %vm2514_vm4, %v2935_v2  ;;  %v4964_v2 = vpack.c.bf16 %v3163_v29, %v3162_v36  ;;  %v3181_v36 = vld [vmem:[%s7573_s11 + $0x138] sm:$0xff] }
0x137a   :  { %4948 = vmatpush3.bf16.msra.mxu0 %v7080_v11  ;;  %4254 = vmatprep.mubr.msk.f32.mxu0 %vm5216_vm2, %v7759_v50 }
0x137b   :  { %4949 = vmatprep.subr.bf16.mxu0 %v7725_v48 }
0x137e   :  { %4951 = vmatpush3.bf16.msra.mxu0 %v7093_v13 }
0x137f   :  { %4952 = vmatprep.subr.bf16.mxu0 %v7725_v48 }
0x1382   :  { %4955 = vmatpush3.bf16.msk.msra.mxu0 %vm7112_vm1, %v7110_v0 }
0x1383   :  { %4988 = vmatprep.subr.bf16.mxu0 %v7725_v48 }
0x144c   :  { %v3005_v7 = vpop.f32.mrb[42].mxu0 }
0x144d   :  { %v3006_v10 = vadd.f32 %v7190_v43, %v3005_v7  ;;  %v4241_v14 = vpop.f32.mrb[43].mxu0  ;;  %v3146_v7 = vld [vmem:[%s7573_s11 + $0x20] sm:$0xff] }
0x144e   :  { %v3164_v14 = vld [vmem:[%s7573_s11 + $0xb0] sm:$0xff] }
0x144f   :  { %5146 = vtanh.f32 %v3006_v10  ;;  %v3009_v24 = vsub.f32 0.0, %v3006_v10  ;;  %v3147_v10 = vld [vmem:[%s7573_s11 + $0x28] sm:$0xff] }
0x1451   :  { %v3010_v40 = vmul.f32 1.442695, %v3009_v24  ;;  %v4966_v24 = vpack.c.bf16 %v3147_v10, %v3146_v7  ;;  %v3184_v7 = vld [vmem:[%s7573_s11 + $0x150] sm:$0xff]  ;;  %v3185_v10 = vld [vmem:[%s7573_s11 + $0x158] sm:$0xff] }
0x1453   :  { %5148 = vpow2.f32 %v3010_v40 }
0x1459   :  { %v5147_v11 = vpop.eup %5146 }
0x145a   :  { %3017 = vrot.lane.b32.xlu1 %v5147_v11, %s5203_s30  ;;  %v3165_v11 = vld [vmem:[%s7573_s11 + $0xb8] sm:$0xff] }
0x145b   :  { %v4968_v40 = vpack.c.bf16 %v3165_v11, %v3164_v14  ;;  %v5004_v14 = vpack.c.bf16 %v3185_v10, %v3184_v7  ;;  %v3186_v11 = vld [vmem:[%s7573_s11 + $0x160] sm:$0xff] }
0x145d   :  { %v5149_v13 = vpop.eup %5148 }
0x145e   :  { %v3012_v55 = vadd.f32 1.0, %v5149_v13  ;;  %v3148_v13 = vld [vmem:[%s7573_s11 + $0x30] sm:$0xff] }
0x1460   :  { %5150 = vrcp.f32 %v3012_v55  ;;  %v3149_v55 = vld [vmem:[%s7573_s11 + $0x38] sm:$0xff] }
0x146a   :  { %v5151_v3 = vpop.eup %5150 }
0x146b   :  { %v3015_v0 = vmul.f32 %v5151_v3, %v2921_v42  ;;  %v4960_v42 = vpack.c.bf16 %v3161_v49, %v3160_v12  ;;  %v2469_v12 = vrot.slane %v7299_v4, 2  ;;  %v5104_v49 = vpack.i.bf16 %v7303_v23, %v7299_v4  ;;  %v3180_v4 = vld [vmem:[%s7573_s11 + $0x130] sm:$0xff] }
0x146c   :  { %v4998_v29 = vpack.c.bf16 %v3181_v36, %v3180_v4 }
0x146d   :  { %4961 = vmatprep.subr.bf16.mxu1 %v4960_v42  ;;  %v1405_v42 = vrot.slane %v7303_v23, 2  ;;  %v3182_v23 = vld [vmem:[%s7573_s11 + $0x140] sm:$0xff] }
0x146e   :  { %4963 = vmatpush3.bf16.msra.mxu1 %v4962_v60  ;;  %v3183_v60 = vld [vmem:[%s7573_s11 + $0x148] sm:$0xff] }
0x146f   :  { %4965 = vmatprep.subr.bf16.mxu1 %v4964_v2  ;;  %v5109_v51 = vpack.i.bf16 %v1405_v42, %v2469_v12  ;;  %v5001_v2 = vpack.c.bf16 %v3183_v60, %v3182_v23 }
0x1472   :  { %4967 = vmatpush3.bf16.msra.mxu1 %v4966_v24  ;;  %v3187_v24 = vld [vmem:[%s7573_s11 + $0x168] sm:$0xff] }
0x1473   :  { %4969 = vmatprep.subr.bf16.mxu1 %v4968_v40  ;;  %v5007_v40 = vpack.c.bf16 %v3187_v24, %v3186_v11 }
0x14cc   :  { %v3018_v8 = vpop.permute.xlu1 %3017 }
0x14cd   :  { %v3020_v16 = vmul.f32 %v5151_v3, %v3018_v8  ;;  %v3167_v8 = vld [vmem:[%s7573_s11 + $0xc8] sm:$0xff] }
0x14cf   :  { %3022 = vrot.lane.b32.xlu0 %v3020_v16, %s5217_s5  ;;  %v4970_v16 = vpack.c.bf16 %v3149_v55, %v3148_v13  ;;  %v3188_v13 = vld [vmem:[%s7573_s11 + $0x170] sm:$0xff]  ;;  %v3189_v55 = vld [vmem:[%s7573_s11 + $0x178] sm:$0xff] }
0x14d1   :  { %4971 = vmatpush3.bf16.msra.mxu1 %v4970_v16  ;;  %v3191_v16 = vld [vmem:[%s7573_s11 + $0x188] sm:$0xff] }
0x14d3   :  { %3032 = vrot.lane.b32.xlu0 %v7171_v56, %s5220_s24 }
0x1541   :  { %v3023_v26 = vpop.permute.xlu0 %3022 }
0x1542   :  { %v7270_v35 = vadd.f32 %v3023_v26, %v3015_v0  ;;  %v3150_v26 = vld [vmem:[%s7573_s11 + $0x40] sm:$0xff] }
0x1544   :  { %5152 = vtanh.f32 %v7270_v35 }
0x1545   :  { %v3033_v22 = vpop.permute.xlu0 %3032 }
0x154e   :  { %v5153_v34 = vpop.eup %5152 }
0x154f   :  { %3028 = vrot.lane.b32.xlu1 %v5153_v34, %s5203_s30  ;;  %v3151_v34 = vld [vmem:[%s7573_s11 + $0x48] sm:$0xff] }
0x15c1   :  { %v3029_v1 = vpop.permute.xlu1 %3028 }
0x15c2   :  { %v3031_v61 = vmul.f32 %v5151_v3, %v3029_v1  ;;  %v3166_v3 = vld [vmem:[%s7573_s11 + $0xc0] sm:$0xff] }
0x15c3   :  { %v4972_v0 = vpack.c.bf16 %v3167_v8, %v3166_v3  ;;  %v5010_v3 = vpack.c.bf16 %v3189_v55, %v3188_v13  ;;  %v3190_v8 = vld [vmem:[%s7573_s11 + $0x180] sm:$0xff] }
0x15c4   :  { %3036 = vrot.lane.b32.xlu1 %v3031_v61, %s5219_s22  ;;  %v4974_v61 = vpack.c.bf16 %v3151_v34, %v3150_v26  ;;  %v3192_v26 = vld [vmem:[%s7573_s11 + $0x190] sm:$0xff]  ;;  %v3193_v34 = vld [vmem:[%s7573_s11 + $0x198] sm:$0xff] }
0x15c5   :  { %4973 = vmatprep.subr.bf16.mxu1 %v4972_v0  ;;  %v5013_v0 = vpack.c.bf16 %v3191_v16, %v3190_v8 }
0x15c6   :  { %4975 = vmatpush3.bf16.msra.mxu1 %v4974_v61  ;;  %v3194_v61 = vld [vmem:[%s7573_s11 + $0x1a0] sm:$0xff] }
0x1636   :  { %v3037_v59 = vpop.permute.xlu1 %3036 }
0x1637   :  { %v3039_v5 = vsel %vm2506_vm3, %v3033_v22, %v3037_v59 }
0x1638   :  { %4255 = vmatmul.mubr.msk.f32.vlgmr.msra.gmra.mrb[44].mxu0 %vm2514_vm4, %v3039_v5  ;;  %v3168_v5 = vld [vmem:[%s7573_s11 + $0xd0] sm:$0xff] }
0x170b   :  { %v3109_v6 = vpop.f32.mrb[44].mxu0 }
0x170c   :  { %v3110_v54 = vadd.f32 %v7190_v43, %v3109_v6  ;;  %v4256_v21 = vpop.f32.mrb[45].mxu0  ;;  %v7286_v43 = vmax.f32 %v6917_v33, %v1381_v19  ;;  %v3169_v6 = vld [vmem:[%s7573_s11 + $0xd8] sm:$0xff] }
0x170d   :  { %v3152_v21 = vld [vmem:[%s7573_s11 + $0x50] sm:$0xff] }
0x170e   :  { %5154 = vtanh.f32 %v3110_v54  ;;  %v3113_v31 = vsub.f32 0.0, %v3110_v54  ;;  %v1393_v45 = vrot.slane %v7286_v43, 4  ;;  %v1389_v33 = vrot.slane %v7286_v43, 2 }
0x170f   :  { %v4976_v54 = vpack.c.bf16 %v3169_v6, %v3168_v5  ;;  %v1397_v58 = vrot.slane %v7286_v43, 6  ;;  %v3196_v5 = vld [vmem:[%s7573_s11 + $0x1b0] sm:$0xff]  ;;  %v3197_v6 = vld [vmem:[%s7573_s11 + $0x1b8] sm:$0xff] }
0x1710   :  { %v3114_v38 = vmul.f32 1.442695, %v3113_v31  ;;  %v5089_v63 = vpack.i.bf16 %v1393_v45, %v2457_v17  ;;  %v5099_v62 = vpack.i.bf16 %v1389_v33, %v2453_v9  ;;  %v3170_v31 = vld [vmem:[%s7573_s11 + $0xe0] sm:$0xff]  ;;  %v3156_v45 = vld [vmem:[%s7573_s11 + $0x70] sm:$0xff]  ;;  %v2461_v9 = vrot.slane %v7283_v57, 6 }
0x1711   :  { %4977 = vmatprep.subr.bf16.mxu1 %v4976_v54  ;;  %v5022_v54 = vpack.c.bf16 %v3197_v6, %v3196_v5  ;;  %v3372_v6 = vld [vmem:[%s7575_s13] sm:$0xff] }
0x1712   :  { %5156 = vpow2.f32 %v3114_v38  ;;  %v3171_v38 = vld [vmem:[%s7573_s11 + $0xe8] sm:$0xff] }
0x1718   :  { %v5155_v56 = vpop.eup %5154 }
0x1719   :  { %3121 = vrot.lane.b32.xlu0 %v5155_v56, %s5203_s30 }
0x171c   :  { %v5157_v37 = vpop.eup %5156 }
0x171d   :  { %v3116_v44 = vadd.f32 1.0, %v5157_v37  ;;  %v4980_v37 = vpack.c.bf16 %v3171_v38, %v3170_v31 }
0x171f   :  { %5158 = vrcp.f32 %v3116_v44  ;;  %v3154_v44 = vld [vmem:[%s7573_s11 + $0x60] sm:$0xff] }
0x1720   :  { %v4982_v19 = vpack.c.bf16 %v3155_v30, %v3154_v44 }
0x1729   :  { %v7288_v32 = vpop.eup %5158 }
0x172a   :  { %v3119_v1 = vmul.f32 %v7288_v32, %v7270_v35  ;;  %v3153_v35 = vld [vmem:[%s7573_s11 + $0x58] sm:$0xff] }
0x172b   :  { %v4978_v56 = vpack.c.bf16 %v3153_v35, %v3152_v21  ;;  %v3198_v21 = vld [vmem:[%s7573_s11 + $0x1c0] sm:$0xff] }
0x172d   :  { %4979 = vmatpush3.bf16.msra.mxu1 %v4978_v56 }
0x172e   :  { %4981 = vmatprep.subr.bf16.mxu1 %v4980_v37 }
0x1731   :  { %4983 = vmatpush3.bf16.msra.mxu1 %v4982_v19 }
0x178b   :  { %v3122_v53 = vpop.permute.xlu0 %3121 }
0x178c   :  { %v3124_v39 = vmul.f32 %v7288_v32, %v3122_v53  ;;  %v3172_v53 = vld [vmem:[%s7573_s11 + $0xf0] sm:$0xff] }
0x178e   :  { %3126 = vrot.lane.b32.xlu1 %v3124_v39, %s5217_s5  ;;  %v3173_v39 = vld [vmem:[%s7573_s11 + $0xf8] sm:$0xff] }
0x178f   :  { %v4984_v17 = vpack.c.bf16 %v3173_v39, %v3172_v53 }
0x1791   :  { %4985 = vmatprep.subr.bf16.mxu1 %v4984_v17 }
0x1792   :  { %5090 = vrot.lane.b32.xlu1 %v5089_v63, %s5221_s26  ;;  %v4986_v63 = vpack.c.bf16 %v3157_v25, %v3156_v45 }
0x1794   :  { %4987 = vmatpush3.bf16.msra.mxu1 %v4986_v63 }
0x1795   :  { %5024 = vmatprep.subr.bf16.mxu1 %v7725_v48 }
0x1796   :  { %5100 = vrot.lane.b32.xlu1 %v5099_v62, %s5206_s18  ;;  %v5094_v62 = vpack.i.bf16 %v1397_v58, %v2461_v9 }
0x179a   :  { %2474 = vrot.lane.b32.xlu1 %v2473_v20, %s5213_s19  ;;  %v3174_v20 = vld [vmem:[%s7573_s11 + $0x100] sm:$0xff] }
0x179b   :  { %v4989_v15 = vpack.c.bf16 %v3175_v18, %v3174_v20 }
0x179d   :  { %4990 = vmatpush1.bf16.msra.mxu0 %v4989_v15 }
0x179e   :  { %1410 = vrot.lane.b32.xlu1 %v1409_v52, %s5213_s19  ;;  %4991 = vmatprep.subr.bf16.mxu0 %v7725_v48  ;;  %v3178_v52 = vld [vmem:[%s7573_s11 + $0x120] sm:$0xff] }
0x179f   :  { %v4995_v47 = vpack.c.bf16 %v3179_v46, %v3178_v52 }
0x17a1   :  { %4993 = vmatpush1.bf16.msra.mxu0 %v4992_v27 }
0x17a2   :  { %4994 = vmatprep.subr.bf16.mxu0 %v7725_v48 }
0x17a5   :  { %4996 = vmatpush1.bf16.msra.mxu0 %v4995_v47 }
0x17a6   :  { %4997 = vmatprep.subr.bf16.mxu0 %v7725_v48 }
0x17a9   :  { %4999 = vmatpush1.bf16.msra.mxu0 %v4998_v29 }
0x17aa   :  { %5000 = vmatprep.subr.bf16.mxu0 %v7725_v48 }
0x17ad   :  { %5002 = vmatpush1.bf16.msra.mxu0 %v5001_v2 }
0x17ae   :  { %5003 = vmatprep.subr.bf16.mxu0 %v7725_v48 }
0x17b1   :  { %5005 = vmatpush1.bf16.msra.mxu0 %v5004_v14 }
0x17b2   :  { %5006 = vmatprep.subr.bf16.mxu0 %v7725_v48 }
0x17b5   :  { %5008 = vmatpush1.bf16.msra.mxu0 %v5007_v40 }
0x17b6   :  { %5009 = vmatprep.subr.bf16.mxu0 %v7725_v48 }
0x17b9   :  { %5011 = vmatpush1.bf16.msra.mxu0 %v5010_v3 }
0x17ba   :  { %5012 = vmatprep.subr.bf16.mxu0 %v7725_v48 }
0x17bd   :  { %5014 = vmatpush1.bf16.msra.mxu0 %v5013_v0 }
0x17be   :  { %5015 = vmatprep.subr.bf16.mxu0 %v7725_v48 }
0x1800   :  { %v3127_v22 = vpop.permute.xlu1 %3126 }
0x1801   :  { %v3129_v59 = vadd.f32 %v3127_v22, %v3119_v1  ;;  %v5016_v1 = vpack.c.bf16 %v3193_v34, %v3192_v26  ;;  %v3195_v22 = vld [vmem:[%s7573_s11 + $0x1a8] sm:$0xff] }
0x1803   :  { %5160 = vtanh.f32 %v3129_v59  ;;  %5017 = vmatpush1.bf16.msra.mxu0 %v5016_v1  ;;  %v5019_v59 = vpack.c.bf16 %v3195_v22, %v3194_v61 }
0x1804   :  { %5018 = vmatprep.subr.bf16.mxu0 %v7725_v48  ;;  %v5091_v35 = vpop.permute.xlu1 %5090 }
0x1805   :  { %v5092_v19 = vunpack.i.l.bf16 %v5091_v35 }
0x1807   :  { %5020 = vmatpush1.bf16.msra.mxu0 %v5019_v59 }
0x1808   :  { %5021 = vmatprep.subr.bf16.mxu0 %v7725_v48  ;;  %v5101_v56 = vpop.permute.xlu1 %5100 }
0x1809   :  { %v5102_v38 = vunpack.i.l.bf16 %v5101_v56  ;;  %v5103_v39 = vunpack.i.h.bf16 %v5101_v56  ;;  %v3375_v56 = vld [vmem:[%s7575_s13 + $0x18] sm:$0xff] }
0x180b   :  { %5023 = vmatpush1.bf16.msra.mxu0 %v5022_v54  ;;  %v2477_v30 = vsel %vm915_vm6, %v7283_v57, %v5102_v38  ;;  %v3373_v54 = vld [vmem:[%s7575_s13 + $0x8] sm:$0xff] }
0x180c   :  { %3328 = vmatprep.subr.mxu0 %v7759_v50  ;;  %v2478_v25 = vsel %vm918_vm9, %v2477_v30, %v5092_v19 }
0x180d   :  { %v5161_v33 = vpop.eup %5160  ;;  %v2486_v18 = vrot.slane %v2478_v25, 7 }
0x180e   :  { %3132 = vrot.lane.b32.xlu0 %v5161_v33, %s5203_s30  ;;  %v5093_v33 = vunpack.i.h.bf16 %v5091_v35  ;;  %v5025_v35 = vpack.c.bf16 %v3373_v54, %v3372_v6 }
0x180f   :  { %3329 = vmatpush1.msra.mxu0 %v3198_v21  ;;  %v3374_v21 = vld [vmem:[%s7575_s13 + $0x10] sm:$0xff]  ;;  %s5224_s13 = smov [#allocation2]  }
0x1810   :  { %s3467_s3 = sshll.u32 %s5224_s13, 4  ;;  %s3468_s3 = int_to_ptr.vmem [resolvable:$true] %s3467_s3 }
0x1811   :  { %p5182_p1 = scmp.lt.s32.totalorder %s3468_s3, %s3468_s3 }
0x1812   :  { %5095 = vrot.lane.b32.xlu0 %v5094_v62, %s7832_s25  ;;  %v2475_v62 = vpop.permute.xlu1 %2474 }
0x1813   :  { %v2489_v23 = vrot.slane %v2475_v62, 7 }
0x1816   :  { %5105 = vrot.lane.b32.xlu0 %v5104_v49, %s5222_s8 }
0x181a   :  { %5110 = vrot.lane.b32.xlu0 %v5109_v51, %s5223_s16  ;;  %v1411_v51 = vpop.permute.xlu1 %1410 }
0x181b   :  { %v2497_v60 = vsel %vm55_vm0, %v1411_v51, %v2489_v23 }
0x1880   :  { %v3133_v31 = vpop.permute.xlu0 %3132 }
0x1881   :  { %v3135_v37 = vmul.f32 %v7288_v32, %v3133_v31  ;;  %v1413_v32 = vsel %vm915_vm6, %v7286_v43, %v5103_v39  ;;  %v5028_v31 = vpack.c.bf16 %v3375_v56, %v3374_v21  ;;  %vm3459_vm6 = vcmask 33792  }
0x1882   :  { %v1414_v52 = vsel %vm918_vm9, %v1413_v32, %v5093_v33 }
0x1883   :  { %3137 = vrot.lane.b32.xlu0 %v3135_v37, %s7832_s25  ;;  %v2494_v42 = vsel %vm55_vm0, %v1414_v52, %v2486_v18 }
0x1884   :  { %v5096_v44 = vpop.permute.xlu0 %5095 }
0x1885   :  { %v5097_v53 = vunpack.i.l.bf16 %v5096_v44  ;;  %v5098_v17 = vunpack.i.h.bf16 %v5096_v44 }
0x1887   :  { %v2479_v58 = vsel %vm921_vm7, %v5092_v19, %v5097_v53  ;;  %v1415_v28 = vsel %vm921_vm7, %v5093_v33, %v5098_v17  ;;  %v3511_v19 = vld [vmem:[%s7576_s14] ss:$0 sm:$0xff] }
0x1888   :  { %v5106_v45 = vpop.permute.xlu0 %5105 }
0x1889   :  { %v5108_v63 = vunpack.i.h.bf16 %v5106_v45  ;;  %v5107_v9 = vunpack.i.l.bf16 %v5106_v45 }
0x188b   :  { %v2480_v20 = vsel %vm924_vm8, %v2479_v58, %v5107_v9  ;;  %v1416_v12 = vsel %vm924_vm8, %v1415_v28, %v5108_v63 }
0x188c   :  { %v5111_v57 = vpop.permute.xlu0 %5110  ;;  %v2487_v15 = vrot.slane %v2480_v20, 7 }
0x188d   :  { %v5113_v41 = vunpack.i.h.bf16 %v5111_v57  ;;  %v5112_v27 = vunpack.i.l.bf16 %v5111_v57 }
0x188e   :  { %v2495_v49 = vsel %vm55_vm0, %v1416_v12, %v2487_v15 }
0x188f   :  { %v1417_v46 = vsel %vm927_vm11, %v5108_v63, %v5113_v41  ;;  %v2481_v43 = vsel %vm927_vm11, %v5107_v9, %v5112_v27  ;;  %3274 = vmatprep.mubr.f32.mxu1 %v2495_v49 }
0x1890   :  { %3275 = vmatmul.mubr.f32.vlgmr.msra.gmra.mrb[38].mxu1 %v2494_v42  ;;  %v2482_v47 = vsel %vm930_vm13, %v2481_v43, %v2475_v62  ;;  %v1418_v36 = vsel %vm930_vm13, %v1417_v46, %v1411_v51 }
0x1891   :  { %v2488_v4 = vrot.slane %v2482_v47, 7  ;;  %4265 = vmatprep.mubr.msk.f32.mxu1 %vm5216_vm2, %v7759_v50  ;;  %v3509_v50 = vld [vmem:[%s7574_s12] ss:$0 sm:$0xff]  ;;  %5026 = vmatpush3.bf16.msra.mxu1 %v5025_v35 }
0x1892   :  { %5027 = vmatprep.subr.bf16.mxu1 %v7725_v48 }
0x1893   :  { %v2496_v29 = vsel %vm55_vm0, %v1418_v36, %v2488_v4  ;;  %vm3386_vm0 = vcmask 261120  }
0x1895   :  { %5029 = vmatpush3.bf16.msra.mxu1 %v5028_v31 }
0x18f5   :  { %v3138_v2 = vpop.permute.xlu0 %3137 }
0x18f6   :  { %v3140_v7 = vsel %vm933_vm10, %v2497_v60, %v3138_v2 }
0x18f7   :  { %v3141_v10 = vsel %vm921_vm7, %v3140_v7, 1.0 }
0x18f8   :  { %3510 = vmatprep.mubr.msk.f32.mxu0 %vm3206_vm5, %v3141_v10 }
0x18f9   :  { %3345 = vmatmul.mubr.f32.vlgmr.msra.gmra.mrb[46].mxu0 %v2496_v29 }
0x1963   :  { %v4083_v14 = vpop.f32.mrb[38].mxu1 }
0x1964   :  { %v4084_v11 = vpop.f32.mrb[39].mxu1 }
0x1965   :  { %v4085_v24 = vadd.f32 %v4084_v11, %v4083_v14 }
0x1967   :  { %v3277_v40 = vadd.f32 %v4085_v24, %v3509_v50 }
0x19cc   :  { %v3346_v13 = vpop.f32.mrb[46].mxu0 }
0x19cd   :  { %v3347_v55 = vadd.f32 %v3346_v13, %v3277_v40  ;;  %v3348_v3 = vpop.f32.mrb[47].mxu0 }
0x19cf   :  { %5162 = vtanh.f32 %v3347_v55  ;;  %v3350_v16 = vsub.f32 0.0, %v3347_v55 }
0x19d1   :  { %v3351_v0 = vmul.f32 1.442695, %v3350_v16 }
0x19d3   :  { %5164 = vpow2.f32 %v3351_v0 }
0x19d9   :  { %v5163_v8 = vpop.eup %5162 }
0x19da   :  { %3357 = vrot.lane.b32.xlu1 %v5163_v8, %s5203_s30 }
0x19dd   :  { %v5165_v26 = vpop.eup %5164 }
0x19de   :  { %v3353_v34 = vadd.f32 1.0, %v5165_v26 }
0x19e0   :  { %5166 = vrcp.f32 %v3353_v34 }
0x19ea   :  { %v5167_v1 = vpop.eup %5166 }
0x1a4c   :  { %v3358_v61 = vpop.permute.xlu1 %3357 }
0x1a4d   :  { %v3360_v22 = vmul.f32 %v5167_v1, %v3358_v61 }
0x1a4f   :  { %3362 = vrot.lane.b32.xlu0 %v3360_v22, %s5217_s5 }
0x1ac1   :  { %v3363_v59 = vpop.permute.xlu0 %3362 }
0x1ac2   :  { %v3365_v5 = vadd.f32 %v5167_v1, %v3363_v59 }
0x1ac4   :  { %5168 = vtanh.f32 %v3365_v5 }
0x1ace   :  { %v5169_v38 = vpop.eup %5168 }
0x1acf   :  { %3368 = vrot.lane.b32.xlu1 %v5169_v38, %s5203_s30  ;;  %s5177_s30 = scalar_lea.vmem %s3468_s3, 32 }
0x1ad0   :  { %p5178_p0 = scmp.ne.s32.totalorder %s3468_s3, %s5177_s30  ;;  %p5183_p2 = scmp.lt.s32.totalorder %s5177_s30, %s5177_s30 }
0x1ad2   :  { %p5184_p3 = por %p5183_p2, %p5182_p1 }
0x1ad4   :  { %p5185_p4 = pnand %p5184_p3, %p5178_p0 }
0x1b41   :  { %v3369_v37 = vpop.permute.xlu1 %3368 }
0x1b42   :  { %v3371_v44 = vmul.f32 %v5167_v1, %v3369_v37 }
0x1b44   :  { %3384 = vrot.lane.b32.xlu0 %v3371_v44, %s5217_s5 }
0x1bb6   :  { %v3385_v30 = vpop.permute.xlu0 %3384 }
0x1bb7   :  { %4266 = vmatmul.mubr.msk.f32.vlgmr.msra.gmra.mrb[40].mxu1 %vm3386_vm0, %v3385_v30 }
0x1c8a   :  { %v3455_v53 = vpop.f32.mrb[40].mxu1 }
0x1c8b   :  { %v3456_v48 = vadd.f32 %v3511_v19, %v3455_v53  ;;  %v4267_v39 = vpop.f32.mrb[41].mxu1 }
0x1c8d   :  { %3460 = vst.msk [vmem:[#allocation2] sm:$0x3] %vm3459_vm6, %v3456_v48 }
0x1c8e   :  { %5188 = shalt.err (!%p5185_p4)
}
0x1c8f   :  { %s5189_s16 = scalar_lea.hbm %s7577_s15, 32 }
0x1c90   :  { %p5190_p5 = scmp.ne.s32.totalorder %s7577_s15, %s5189_s16  ;;  %p5193_p6 = scmp.lt.u32.totalorder %s5189_s16, %s7577_s15 }
0x1c92   :  { %p5195_p7 = pnand %p5193_p6, %p5190_p5 }
0x1c94   :  { %5198 = shalt.err (!%p5195_p7)
}
0x1c95   :  { %3470 = dma.vmem_to_hbm [thread:$0]  %s3468_s3, 32, %s7577_s15, [#allocation3]  }
0x1c96   :  { %5199 = dma.done.wait [#allocation3], 32  }
0x1c97   :  { %5200 = vsyncadd [#allocation3], 4294967264 }
0x1c98   :  { %3474 = vsyncpa [#allocation3], 1 }

</bundles_post_ra>
